<compile_context>
chip_gen: v7x
topology: tpu7x:2x2x1
jax: 0.10.0
libtpu: 0.0.40
codegen_flags: <defaults>
</compile_context>

<pallas_src>
import math

import jax
import jax.numpy as jnp
from jax.experimental import pallas as pl
from jax.experimental.pallas import tpu as pltpu


# --------------------------------------------------------------------------- helpers

def _gelu_tanh(x):
    # PyTorch nn.GELU(approximate='tanh')
    c = math.sqrt(2.0 / math.pi)
    return 0.5 * x * (1.0 + jnp.tanh(c * (x + 0.044715 * x * x * x)))


def _layernorm_f32(x, gamma, beta, eps=1e-5):
    mu = jnp.mean(x, axis=-1, keepdims=True)
    var = jnp.mean((x - mu) ** 2, axis=-1, keepdims=True)
    return (x - mu) * jax.lax.rsqrt(var + eps) * gamma + beta


def _pick_tile(n, candidates):
    for c in candidates:
        if n % c == 0:
            return c
    return n  # full extent (always a legal block dim)


def _vmem_capacity_bytes():
    """Per-core VMEM capacity (64 MiB on v7x, 128 MiB on v5e/v6e)."""
    try:
        return int(pltpu.get_tpu_info().vmem_capacity_bytes)
    except Exception:
        return 64 << 20  # conservative default (v7x per-TC)


def _maybe_buffered_spec(shape, index_map, bufs):
    """BlockSpec with an explicit pipeline buffer count; falls back to the default
    (double-buffered) spec if this JAX version does not support pipeline_mode."""
    if bufs is None:
        return pl.BlockSpec(shape, index_map)
    try:
        return pl.BlockSpec(shape, index_map, pipeline_mode=pl.Buffered(bufs))
    except Exception:
        return pl.BlockSpec(shape, index_map)


# --------------------------------------------------------------------------- one-time weight prep

def prepare_block_params(raw):
    """One-time conversion of PyTorch-layout weights (out_features, in_features) to the
    kernel layout: pre-transposed, Q split from the fused KV block, biases as (1, n)."""
    D = raw["ln1_w"].shape[0]
    wqkv_t = raw["attn_w"].T          # (D, 3D), columns = [q | k | v]
    bqkv = raw["attn_b"]
    return dict(
        g1=raw["ln1_w"].reshape(1, D), b1=raw["ln1_b"].reshape(1, D),
        wq=wqkv_t[:, :D], bq=bqkv[:D].reshape(1, D),
        wkv=wqkv_t[:, D:], bkv=bqkv[D:].reshape(1, 2 * D),
        wo=raw["attn_proj_w"].T, bo=raw["attn_proj_b"].reshape(1, D),
        g2=raw["ln2_w"].reshape(1, D), b2=raw["ln2_b"].reshape(1, D),
        w_fc=raw["fc_w"].T, b_fc=raw["fc_b"].reshape(1, -1),
        w_proj=raw["proj_w"].T, b_proj=raw["proj_b"].reshape(1, D),
    )


# --------------------------------------------------------------------------- kernel 1: LN1 + attention + residual

def attn_ln_residual_forward(x, g1, b1, wq, bq, wkv, bkv, wo, bo, *, n_head,
                             tq=None, tk=None):
    B, T, D = x.shape
    hd = D // n_head
    scale = 1.0 / math.sqrt(hd)

    if tq is None:
        tq = _pick_tile(T, (256, 128, 64, 32, 16, 8))
    if tk is None:
        tk = _pick_tile(T, (512, 256, 128, 64, 32, 16, 8))
    n_q, n_kv = T // tq, T // tk

    w_dt = wq.dtype
    w_it = jnp.dtype(w_dt).itemsize
    x_it = jnp.dtype(x.dtype).itemsize
    cap = _vmem_capacity_bytes()

    # TODO(synk): for very large D (>= ~4k bf16) the QKV / out-proj weights should be
    # streamed along an extra grid axis like the MLP streams H; here they stay resident
    # but single-buffered (constant block index), which already halves their VMEM.

    def kernel(xq_ref, xkv_ref, g_ref, bln_ref, wq_ref, bq_ref,
               wkv_ref, bkv_ref, wo_ref, bo_ref, o_ref,
               q_ref, m_ref, l_ref, acc_ref):
        kv = pl.program_id(2)

        @pl.when(kv == 0)
        def _init():
            # LN1 (f32 math) + fused full-width Q projection for this query tile.
            xn = _layernorm_f32(xq_ref[0].astype(jnp.float32),
                                g_ref[...].astype(jnp.float32),
                                bln_ref[...].astype(jnp.float32)).astype(w_dt)
            q = jnp.dot(xn, wq_ref[...], preferred_element_type=jnp.float32)
            q = (q + bq_ref[...].astype(jnp.float32)) * scale
            # Head split as an in-VMEM reshape: (tq, D) -> (n_head, tq, hd).
            q_ref[...] = q.reshape(tq, n_head, hd).transpose(1, 0, 2).astype(w_dt)
            m_ref[...] = jnp.full_like(m_ref, -jnp.inf)
            l_ref[...] = jnp.zeros_like(l_ref)
            acc_ref[...] = jnp.zeros_like(acc_ref)

        # K/V for this kv tile via one fused (tk, D) x (D, 2D) matmul.
        xn_kv = _layernorm_f32(xkv_ref[0].astype(jnp.float32),
                               g_ref[...].astype(jnp.float32),
                               bln_ref[...].astype(jnp.float32)).astype(w_dt)
        kvp = jnp.dot(xn_kv, wkv_ref[...], preferred_element_type=jnp.float32)
        kvp = kvp + bkv_ref[...].astype(jnp.float32)
        k = kvp[:, :D].reshape(tk, n_head, hd).transpose(1, 0, 2).astype(w_dt)
        v = kvp[:, D:].reshape(tk, n_head, hd).transpose(1, 0, 2).astype(w_dt)

        # Online softmax over the kv grid axis (full (T,T) scores never materialized).
        s = jnp.einsum('hqd,hkd->hqk', q_ref[...], k,
                       preferred_element_type=jnp.float32)
        m_prev = m_ref[...]
        m_new = jnp.maximum(m_prev, jnp.max(s, axis=-1, keepdims=True))
        alpha = jnp.exp(m_prev - m_new)
        p = jnp.exp(s - m_new)
        l_ref[...] = alpha * l_ref[...] + jnp.sum(p, axis=-1, keepdims=True)
        acc_ref[...] = alpha * acc_ref[...] + jnp.einsum(
            'hqk,hkd->hqd', p.astype(w_dt), v, preferred_element_type=jnp.float32)
        m_ref[...] = m_new

        @pl.when(kv == n_kv - 1)
        def _finalize():
            inv_l = pl.reciprocal(l_ref[...], approx=True)         # EUP, not VALU divide
            o = acc_ref[...] * inv_l                                # (n_head, tq, hd)
            o = o.transpose(1, 0, 2).reshape(tq, D).astype(w_dt)    # head merge
            y = jnp.dot(o, wo_ref[...], preferred_element_type=jnp.float32)
            y = y + bo_ref[...].astype(jnp.float32) + xq_ref[0].astype(jnp.float32)
            o_ref[0] = y.astype(o_ref.dtype)

    flops = B * ((4 + 4 * n_q) * T * D * D + 4 * T * T * D)
    cost = pl.CostEstimate(
        flops=int(flops),
        transcendentals=int(B * n_head * T * (T + n_kv)),
        bytes_accessed=int(B * T * D * (2 + n_q) * x_it + (4 * D * D + 7 * D) * w_it))

    def _vmem_bytes(wbufs):
        weights = wbufs * (4 * D * D + 6 * D) * w_it
        io = 2 * (2 * tq * D + tk * D) * x_it
        scratch = tq * D * (w_it + 4) + 2 * n_head * tq * 4
        transient = 4 * (3 * n_head * tq * tk + 2 * tk * D + 4 * tq * D)
        return weights + io + scratch + transient + (2 << 20)

    def build_and_run(wbufs):
        vlim = int(min(max(_vmem_bytes(wbufs if wbufs else 2), 32 << 20),
                       int(cap * 0.85)))
        const2 = lambda b, i, j: (0, 0)
        return pl.pallas_call(
            kernel,
            out_shape=jax.ShapeDtypeStruct((B, T, D), x.dtype),
            grid_spec=pltpu.PrefetchScalarGridSpec(
                num_scalar_prefetch=0,
                grid=(B, n_q, n_kv),
                in_specs=[
                    pl.BlockSpec((1, tq, D), lambda b, i, j: (b, i, 0)),  # x (query rows / residual)
                    pl.BlockSpec((1, tk, D), lambda b, i, j: (b, j, 0)),  # x (key/value rows)
                    pl.BlockSpec((1, D), const2),                         # ln1 gamma
                    pl.BlockSpec((1, D), const2),                         # ln1 beta
                    _maybe_buffered_spec((D, D), const2, wbufs),          # Wq   (full-width)
                    pl.BlockSpec((1, D), const2),                         # bq
                    _maybe_buffered_spec((D, 2 * D), const2, wbufs),      # Wkv  (fused K|V)
                    pl.BlockSpec((1, 2 * D), const2),                     # bkv
                    _maybe_buffered_spec((D, D), const2, wbufs),          # Wout
                    pl.BlockSpec((1, D), const2),                         # bout
                ],
                out_specs=pl.BlockSpec((1, tq, D), lambda b, i, j: (b, i, 0)),
                scratch_shapes=[
                    pltpu.VMEM((n_head, tq, hd), w_dt),         # scaled Q, head-split
                    pltpu.VMEM((n_head, tq, 1), jnp.float32),   # running max
                    pltpu.VMEM((n_head, tq, 1), jnp.float32),   # running denom
                    pltpu.VMEM((n_head, tq, hd), jnp.float32),  # output accumulator
                ],
            ),
            compiler_params=pltpu.CompilerParams(
                dimension_semantics=("parallel", "parallel", "arbitrary"),
                vmem_limit_bytes=vlim),
            cost_estimate=cost,
        )(x, x, g1, b1, wq, bq, wkv, bkv, wo, bo)

    try:
        # Constant-index weights: one pipeline buffer halves their VMEM footprint.
        return build_and_run(1)
    except Exception:
        return build_and_run(None)   # default double-buffered specs


# --------------------------------------------------------------------------- kernel 2: LN2 + MLP + residual

def _mlp_kernel(x_ref, g_ref, bln_ref, w1_ref, b1_ref, w2_ref, b2_ref, o_ref,
                xn_ref, acc_ref):
    h = pl.program_id(1)

    @pl.when(h == 0)
    def _init():
        xn = _layernorm_f32(x_ref[...].astype(jnp.float32),
                            g_ref[...].astype(jnp.float32),
                            bln_ref[...].astype(jnp.float32))
        xn_ref[...] = xn.astype(xn_ref.dtype)   # weight dtype -> full-rate MXU operand
        acc_ref[...] = jnp.zeros_like(acc_ref)

    # Streamed H tile: fc matmul (f32 accumulation), bias, tanh-GELU, proj matmul.
    hid = jnp.dot(xn_ref[...], w1_ref[...], preferred_element_type=jnp.float32)
    hid = _gelu_tanh(hid + b1_ref[...].astype(jnp.float32))
    acc_ref[...] += jnp.dot(hid.astype(w2_ref.dtype), w2_ref[...],
                            preferred_element_type=jnp.float32)

    @pl.when(h == pl.num_programs(1) - 1)
    def _finalize():
        # proj bias + residual added exactly once.
        y = acc_ref[...] + b2_ref[...].astype(jnp.float32) + x_ref[...].astype(jnp.float32)
        o_ref[...] = y.astype(o_ref.dtype)


def _select_mlp_tiles(M, D, H, x_it, w_it, cap):
    """Largest (tm, th) whose buffered working set fits the VMEM budget.  Large tm first:
    weight slices are re-streamed once per row tile, so intensity ~ tm flops/byte."""
    budget = int(cap * 0.6)
    tm_cands = [c for c in (1024, 512, 256, 128, 64, 32, 16, 8) if M % c == 0] or [M]
    th_cands = [c for c in (2048, 1024, 512, 256, 128) if H % c == 0] or [H]
    for tm in tm_cands:
        for th in th_cands:
            nh = H // th
            wb = 1 if nh == 1 else (3 if cap >= (96 << 20) else 2)
            need = (wb * (2 * D * th + th) * w_it     # streamed weight + bias slices
                    + 4 * tm * D * x_it               # x in + out, double buffered
                    + tm * D * (w_it + 4)             # LN scratch + f32 accumulator
                    + 8 * tm * th                     # transient f32 hidden tiles
                    + (2 << 20))
            if need <= budget:
                return tm, th
    return tm_cands[-1], th_cands[-1]


def mlp_ln_residual_forward(x, g2, b2ln, w_fc, b_fc, w_proj, b_proj, *, tm=None, th=None):
    B, T, D = x.shape
    H = w_fc.shape[1]
    M = B * T

    w_dt = w_fc.dtype
    w_it = jnp.dtype(w_dt).itemsize
    x_it = jnp.dtype(x.dtype).itemsize
    cap = _vmem_capacity_bytes()

    if tm is None or th is None:
        tm_a, th_a = _select_mlp_tiles(M, D, H, x_it, w_it, cap)
        tm = tm_a if tm is None else tm
        th = th_a if th is None else th
    assert M % tm == 0 and H % th == 0
    nh = H // th
    # 1 buffer if the weight block never changes; 3 on 128-MiB gens (v5e/v6e) to hide DMA
    # latency spikes while partially HBM-bound; 2 on v7x (64 MiB).
    wbufs = 1 if nh == 1 else (3 if cap >= (96 << 20) else 2)

    x2 = x.reshape(M, D)
    n_row = M // tm

    cost = pl.CostEstimate(
        flops=int(4 * M * D * H),
        transcendentals=int(M * H),
        # Weight slices are re-streamed once per row tile.
        bytes_accessed=int(2 * M * D * x_it + n_row * (2 * D * H + H) * w_it + 3 * D * x_it))

    def _vmem_bytes(wb):
        return (wb * (2 * D * th + th) * w_it
                + 4 * tm * D * x_it
                + tm * D * (w_it + 4)
                + 8 * tm * th
                + (2 << 20))

    def build_and_run(wb):
        vlim = int(min(max(_vmem_bytes(wb if wb else 2), 32 << 20), int(cap * 0.85)))
        out = pl.pallas_call(
            _mlp_kernel,
            out_shape=jax.ShapeDtypeStruct((M, D), x.dtype),
            grid_spec=pltpu.PrefetchScalarGridSpec(
                num_scalar_prefetch=0,
                grid=(n_row, nh),
                in_specs=[
                    pl.BlockSpec((tm, D), lambda i, h: (i, 0)),               # x row tile (+residual)
                    pl.BlockSpec((1, D), lambda i, h: (0, 0)),                # ln2 gamma
                    pl.BlockSpec((1, D), lambda i, h: (0, 0)),                # ln2 beta
                    _maybe_buffered_spec((D, th), lambda i, h: (0, h), wb),   # W_fc^T   H-slice
                    pl.BlockSpec((1, th), lambda i, h: (0, h)),               # b_fc     H-slice
                    _maybe_buffered_spec((th, D), lambda i, h: (h, 0), wb),   # W_proj^T H-slice
                    pl.BlockSpec((1, D), lambda i, h: (0, 0)),                # b_proj
                ],
                out_specs=pl.BlockSpec((tm, D), lambda i, h: (i, 0)),
                scratch_shapes=[
                    pltpu.VMEM((tm, D), w_dt),         # LN(x) cached across H steps
                    pltpu.VMEM((tm, D), jnp.float32),  # f32 accumulator
                ],
            ),
            compiler_params=pltpu.CompilerParams(
                dimension_semantics=("parallel", "arbitrary"),
                vmem_limit_bytes=vlim),
            cost_estimate=cost,
        )(x2, g2, b2ln, w_fc, b_fc, w_proj, b_proj)
        return out.reshape(B, T, D)

    try:
        return build_and_run(wbufs)
    except Exception:
        return build_and_run(None)


# --------------------------------------------------------------------------- full Block forward

def block_forward(x, p, *, n_head):
    x1 = attn_ln_residual_forward(x, p["g1"], p["b1"], p["wq"], p["bq"],
                                  p["wkv"], p["bkv"], p["wo"], p["bo"], n_head=n_head)
    x2 = mlp_ln_residual_forward(x1, p["g2"], p["b2"],
                                 p["w_fc"], p["b_fc"], p["w_proj"], p["b_proj"])
    return x2


# --------------------------------------------------------------------------- pure-JAX reference

def _ref_block(x, raw, n_head):
    B, T, D = x.shape
    hd = D // n_head
    x32 = x.astype(jnp.float32)

    xn = _layernorm_f32(x32, raw["ln1_w"], raw["ln1_b"])
    qkv = xn @ raw["attn_w"].T.astype(jnp.float32) + raw["attn_b"]
    q, k, v = jnp.split(qkv, 3, axis=-1)

    def heads(z):
        return z.reshape(B, T, n_head, hd).transpose(0, 2, 1, 3)

    q, k, v = heads(q), heads(k), heads(v)
    s = (q @ k.transpose(0, 1, 3, 2)) * (1.0 / math.sqrt(hd))
    p = jax.nn.softmax(s, axis=-1)
    o = (p @ v).transpose(0, 2, 1, 3).reshape(B, T, D)
    o = o @ raw["attn_proj_w"].T.astype(jnp.float32) + raw["attn_proj_b"]
    x1 = x32 + o

    xn2 = _layernorm_f32(x1, raw["ln2_w"], raw["ln2_b"])
    h = xn2 @ raw["fc_w"].T.astype(jnp.float32) + raw["fc_b"]
    h = _gelu_tanh(h)
    y = h @ raw["proj_w"].T.astype(jnp.float32) + raw["proj_b"]
    return (x1 + y).astype(x.dtype)


# --------------------------------------------------------------------------- demo / self-test

if __name__ == "__main__":
    # n_embd=256 with n_head=2 keeps head_dim=128 lane-aligned (clean head split/merge).
    B, T, D, n_head = 2, 8, 256, 2
    H = 4 * D
    dt = jnp.float32

    key = jax.random.PRNGKey(0)
    ks = jax.random.split(key, 10)

    def lin_init(k, out_f, in_f):
        kw, kb = jax.random.split(k)
        bound = 1.0 / math.sqrt(in_f)
        w = jax.random.uniform(kw, (out_f, in_f), dt, -bound, bound)
        b = jax.random.uniform(kb, (out_f,), dt, -bound, bound)
        return w, b

    x = jax.random.normal(ks[0], (B, T, D), dtype=dt)

    attn_w, attn_b = lin_init(ks[1], 3 * D, D)
    attn_proj_w, attn_proj_b = lin_init(ks[2], D, D)
    fc_w, fc_b = lin_init(ks[3], H, D)
    proj_w, proj_b = lin_init(ks[4], D, H)

    raw = dict(
        ln1_w=1.0 + 0.1 * jax.random.normal(ks[5], (D,), dtype=dt),
        ln1_b=0.1 * jax.random.normal(ks[6], (D,), dtype=dt),
        attn_w=attn_w, attn_b=attn_b,
        attn_proj_w=attn_proj_w, attn_proj_b=attn_proj_b,
        ln2_w=1.0 + 0.1 * jax.random.normal(ks[7], (D,), dtype=dt),
        ln2_b=0.1 * jax.random.normal(ks[8], (D,), dtype=dt),
        fc_w=fc_w, fc_b=fc_b, proj_w=proj_w, proj_b=proj_b,
    )

    params = prepare_block_params(raw)          # one-time weight prep

    y = block_forward(x, params, n_head=n_head)
    y = jax.block_until_ready(y)

    with jax.default_matmul_precision("highest"):
        y_ref = _ref_block(x, raw, n_head)

    assert y.shape == (B, T, D)
    err = float(jnp.max(jnp.abs(y - y_ref)))
    # approx reciprocal (EUP) in the softmax normalize -> slightly looser tolerance.
    assert jnp.allclose(y, y_ref, atol=5e-3, rtol=5e-3), (
        "mismatch vs reference: max abs err = %g" % err)

    print("KERNEL_OK")
</pallas_src>

<mosaic_0001>
module attributes {stable_mosaic.version = 11 : i64} {
  func.func @kernel(%arg0: i32, %arg1: i32, %arg2: i32, %arg3: memref<1x8x256xf32, #tpu.memory_space<vmem>>, %arg4: memref<1x8x256xf32, #tpu.memory_space<vmem>>, %arg5: memref<1x256xf32, #tpu.memory_space<vmem>>, %arg6: memref<1x256xf32, #tpu.memory_space<vmem>>, %arg7: memref<256x256xf32, #tpu.memory_space<vmem>>, %arg8: memref<1x256xf32, #tpu.memory_space<vmem>>, %arg9: memref<256x512xf32, #tpu.memory_space<vmem>>, %arg10: memref<1x512xf32, #tpu.memory_space<vmem>>, %arg11: memref<256x256xf32, #tpu.memory_space<vmem>>, %arg12: memref<1x256xf32, #tpu.memory_space<vmem>>, %arg13: memref<1x8x256xf32, #tpu.memory_space<vmem>>, %arg14: memref<2x8x128xf32, #tpu.memory_space<vmem>>, %arg15: memref<2x8x1xf32, #tpu.memory_space<vmem>>, %arg16: memref<2x8x1xf32, #tpu.memory_space<vmem>>, %arg17: memref<2x8x128xf32, #tpu.memory_space<vmem>>) attributes {dimension_semantics = [#tpu.dimension_semantics<parallel>, #tpu.dimension_semantics<parallel>, #tpu.dimension_semantics<arbitrary>], iteration_bounds = array<i64: 2, 1, 1>, scalar_prefetch = 0 : i64, scratch_operands = 4 : i64, tpu.core_type = #tpu.core_type<tc>, window_params = [{transform_indices = @transform_0, window_bounds = array<i64: 1, 8, 256>}, {transform_indices = @transform_1, window_bounds = array<i64: 1, 8, 256>}, {pipeline_mode = #tpu.pipeline_mode<synchronous>, transform_indices = @transform_2, window_bounds = array<i64: 1, 256>}, {pipeline_mode = #tpu.pipeline_mode<synchronous>, transform_indices = @transform_3, window_bounds = array<i64: 1, 256>}, {pipeline_mode = #tpu.pipeline_mode<synchronous>, transform_indices = @transform_4, window_bounds = array<i64: 256, 256>}, {pipeline_mode = #tpu.pipeline_mode<synchronous>, transform_indices = @transform_5, window_bounds = array<i64: 1, 256>}, {pipeline_mode = #tpu.pipeline_mode<synchronous>, transform_indices = @transform_6, window_bounds = array<i64: 256, 512>}, {pipeline_mode = #tpu.pipeline_mode<synchronous>, transform_indices = @transform_7, window_bounds = array<i64: 1, 512>}, {pipeline_mode = #tpu.pipeline_mode<synchronous>, transform_indices = @transform_8, window_bounds = array<i64: 256, 256>}, {pipeline_mode = #tpu.pipeline_mode<synchronous>, transform_indices = @transform_9, window_bounds = array<i64: 1, 256>}, {transform_indices = @transform_10, window_bounds = array<i64: 1, 8, 256>}]} {
    %c0_i32 = arith.constant 0 : i32
    %0 = arith.cmpi eq, %arg2, %c0_i32 : i32
    %1 = arith.extui %0 : i1 to i32
    %c0_i32_0 = arith.constant 0 : i32
    %2 = arith.cmpi ne, %1, %c0_i32_0 : i32
    scf.if %2 {
      %c0_43 = arith.constant 0 : index
      %c0_44 = arith.constant 0 : index
      %c0_45 = arith.constant 0 : index
      %67 = vector.load %arg3[%c0_43, %c0_44, %c0_45] : memref<1x8x256xf32, #tpu.memory_space<vmem>>, vector<1x8x256xf32>
      %68 = vector.shape_cast %67 : vector<1x8x256xf32> to vector<8x256xf32>
      %c0_46 = arith.constant 0 : index
      %c0_47 = arith.constant 0 : index
      %69 = vector.load %arg5[%c0_46, %c0_47] : memref<1x256xf32, #tpu.memory_space<vmem>>, vector<1x256xf32>
      %c0_48 = arith.constant 0 : index
      %c0_49 = arith.constant 0 : index
      %70 = vector.load %arg6[%c0_48, %c0_49] : memref<1x256xf32, #tpu.memory_space<vmem>>, vector<1x256xf32>
      %cst_50 = arith.constant dense<0.000000e+00> : vector<8xf32>
      %71 = vector.multi_reduction <add>, %68, %cst_50 [1] : vector<8x256xf32> to vector<8xf32>
      %72 = vector.shape_cast %71 : vector<8xf32> to vector<8x1xf32>
      %cst_51 = arith.constant 2.560000e+02 : f32
      %73 = vector.broadcast %cst_51 : f32 to vector<8x1xf32>
      %74 = arith.divf %72, %73 : vector<8x1xf32>
      %75 = vector.broadcast %74 : vector<8x1xf32> to vector<8x256xf32>
      %76 = arith.subf %68, %75 : vector<8x256xf32>
      %77 = arith.mulf %76, %76 : vector<8x256xf32>
      %cst_52 = arith.constant dense<0.000000e+00> : vector<8xf32>
      %78 = vector.multi_reduction <add>, %77, %cst_52 [1] : vector<8x256xf32> to vector<8xf32>
      %79 = vector.shape_cast %78 : vector<8xf32> to vector<8x1xf32>
      %cst_53 = arith.constant 2.560000e+02 : f32
      %80 = vector.broadcast %cst_53 : f32 to vector<8x1xf32>
      %81 = arith.divf %79, %80 : vector<8x1xf32>
      %82 = vector.broadcast %74 : vector<8x1xf32> to vector<8x256xf32>
      %83 = arith.subf %68, %82 : vector<8x256xf32>
      %cst_54 = arith.constant 9.99999974E-6 : f32
      %84 = vector.broadcast %cst_54 : f32 to vector<8x1xf32>
      %85 = arith.addf %81, %84 : vector<8x1xf32>
      %86 = math.rsqrt %85 : vector<8x1xf32>
      %87 = vector.broadcast %86 : vector<8x1xf32> to vector<8x256xf32>
      %88 = arith.mulf %83, %87 : vector<8x256xf32>
      %89 = vector.broadcast %69 : vector<1x256xf32> to vector<8x256xf32>
      %90 = arith.mulf %88, %89 : vector<8x256xf32>
      %91 = vector.broadcast %70 : vector<1x256xf32> to vector<8x256xf32>
      %92 = arith.addf %90, %91 : vector<8x256xf32>
      %c0_55 = arith.constant 0 : index
      %c0_56 = arith.constant 0 : index
      %93 = vector.load %arg7[%c0_55, %c0_56] : memref<256x256xf32, #tpu.memory_space<vmem>>, vector<256x256xf32>
      %cst_57 = arith.constant dense<0.000000e+00> : vector<8x256xf32>
      %94 = tpu.matmul %92, %93, %cst_57 {dimension_numbers = #tpu.dot_dimension_numbers<[1], [0], [0], [1], [0, 0, 1, 1], [], []>} : vector<8x256xf32>, vector<256x256xf32>, vector<8x256xf32> -> vector<8x256xf32>
      %c0_58 = arith.constant 0 : index
      %c0_59 = arith.constant 0 : index
      %95 = vector.load %arg8[%c0_58, %c0_59] : memref<1x256xf32, #tpu.memory_space<vmem>>, vector<1x256xf32>
      %96 = vector.broadcast %95 : vector<1x256xf32> to vector<8x256xf32>
      %97 = arith.addf %94, %96 : vector<8x256xf32>
      %cst_60 = arith.constant 0.0883883461 : f32
      %98 = vector.broadcast %cst_60 : f32 to vector<8x256xf32>
      %99 = arith.mulf %97, %98 : vector<8x256xf32>
      %100 = vector.shape_cast %99 : vector<8x256xf32> to vector<8x2x128xf32>
      %101 = tpu.transpose %100, [1, 0, 2] : vector<8x2x128xf32> -> vector<2x8x128xf32>
      %c0_61 = arith.constant 0 : index
      %c0_62 = arith.constant 0 : index
      %c0_63 = arith.constant 0 : index
      %102 = vector.load %arg14[%c0_61, %c0_62, %c0_63] : memref<2x8x128xf32, #tpu.memory_space<vmem>>, vector<2x8x128xf32>
      tpu.vector_store %arg14[%c0_61, %c0_62, %c0_63], %101 {strides = array<i32>} : memref<2x8x128xf32, #tpu.memory_space<vmem>>, vector<2x8x128xf32>,
      %cst_64 = arith.constant 0xFF800000 : f32
      %103 = vector.broadcast %cst_64 : f32 to vector<2x8x1xf32>
      %c0_65 = arith.constant 0 : index
      %c0_66 = arith.constant 0 : index
      %c0_67 = arith.constant 0 : index
      %104 = vector.load %arg15[%c0_65, %c0_66, %c0_67] : memref<2x8x1xf32, #tpu.memory_space<vmem>>, vector<2x8x1xf32>
      tpu.vector_store %arg15[%c0_65, %c0_66, %c0_67], %103 {strides = array<i32>} : memref<2x8x1xf32, #tpu.memory_space<vmem>>, vector<2x8x1xf32>,
      %cst_68 = arith.constant 0.000000e+00 : f32
      %105 = vector.broadcast %cst_68 : f32 to vector<2x8x1xf32>
      %c0_69 = arith.constant 0 : index
      %c0_70 = arith.constant 0 : index
      %c0_71 = arith.constant 0 : index
      %106 = vector.load %arg16[%c0_69, %c0_70, %c0_71] : memref<2x8x1xf32, #tpu.memory_space<vmem>>, vector<2x8x1xf32>
      tpu.vector_store %arg16[%c0_69, %c0_70, %c0_71], %105 {strides = array<i32>} : memref<2x8x1xf32, #tpu.memory_space<vmem>>, vector<2x8x1xf32>,
      %cst_72 = arith.constant 0.000000e+00 : f32
      %107 = vector.broadcast %cst_72 : f32 to vector<2x8x128xf32>
      %c0_73 = arith.constant 0 : index
      %c0_74 = arith.constant 0 : index
      %c0_75 = arith.constant 0 : index
      %108 = vector.load %arg17[%c0_73, %c0_74, %c0_75] : memref<2x8x128xf32, #tpu.memory_space<vmem>>, vector<2x8x128xf32>
      tpu.vector_store %arg17[%c0_73, %c0_74, %c0_75], %107 {strides = array<i32>} : memref<2x8x128xf32, #tpu.memory_space<vmem>>, vector<2x8x128xf32>,
    } else {
    }
    %c0 = arith.constant 0 : index
    %c0_1 = arith.constant 0 : index
    %c0_2 = arith.constant 0 : index
    %3 = vector.load %arg4[%c0, %c0_1, %c0_2] : memref<1x8x256xf32, #tpu.memory_space<vmem>>, vector<1x8x256xf32>
    %4 = vector.shape_cast %3 : vector<1x8x256xf32> to vector<8x256xf32>
    %c0_3 = arith.constant 0 : index
    %c0_4 = arith.constant 0 : index
    %5 = vector.load %arg5[%c0_3, %c0_4] : memref<1x256xf32, #tpu.memory_space<vmem>>, vector<1x256xf32>
    %c0_5 = arith.constant 0 : index
    %c0_6 = arith.constant 0 : index
    %6 = vector.load %arg6[%c0_5, %c0_6] : memref<1x256xf32, #tpu.memory_space<vmem>>, vector<1x256xf32>
    %cst = arith.constant dense<0.000000e+00> : vector<8xf32>
    %7 = vector.multi_reduction <add>, %4, %cst [1] : vector<8x256xf32> to vector<8xf32>
    %8 = vector.shape_cast %7 : vector<8xf32> to vector<8x1xf32>
    %cst_7 = arith.constant 2.560000e+02 : f32
    %9 = vector.broadcast %cst_7 : f32 to vector<8x1xf32>
    %10 = arith.divf %8, %9 : vector<8x1xf32>
    %11 = vector.broadcast %10 : vector<8x1xf32> to vector<8x256xf32>
    %12 = arith.subf %4, %11 : vector<8x256xf32>
    %13 = arith.mulf %12, %12 : vector<8x256xf32>
    %cst_8 = arith.constant dense<0.000000e+00> : vector<8xf32>
    %14 = vector.multi_reduction <add>, %13, %cst_8 [1] : vector<8x256xf32> to vector<8xf32>
    %15 = vector.shape_cast %14 : vector<8xf32> to vector<8x1xf32>
    %cst_9 = arith.constant 2.560000e+02 : f32
    %16 = vector.broadcast %cst_9 : f32 to vector<8x1xf32>
    %17 = arith.divf %15, %16 : vector<8x1xf32>
    %18 = vector.broadcast %10 : vector<8x1xf32> to vector<8x256xf32>
    %19 = arith.subf %4, %18 : vector<8x256xf32>
    %cst_10 = arith.constant 9.99999974E-6 : f32
    %20 = vector.broadcast %cst_10 : f32 to vector<8x1xf32>
    %21 = arith.addf %17, %20 : vector<8x1xf32>
    %22 = math.rsqrt %21 : vector<8x1xf32>
    %23 = vector.broadcast %22 : vector<8x1xf32> to vector<8x256xf32>
    %24 = arith.mulf %19, %23 : vector<8x256xf32>
    %25 = vector.broadcast %5 : vector<1x256xf32> to vector<8x256xf32>
    %26 = arith.mulf %24, %25 : vector<8x256xf32>
    %27 = vector.broadcast %6 : vector<1x256xf32> to vector<8x256xf32>
    %28 = arith.addf %26, %27 : vector<8x256xf32>
    %c0_11 = arith.constant 0 : index
    %c0_12 = arith.constant 0 : index
    %29 = vector.load %arg9[%c0_11, %c0_12] : memref<256x512xf32, #tpu.memory_space<vmem>>, vector<256x512xf32>
    %cst_13 = arith.constant dense<0.000000e+00> : vector<8x512xf32>
    %30 = tpu.matmul %28, %29, %cst_13 {dimension_numbers = #tpu.dot_dimension_numbers<[1], [0], [0], [1], [0, 0, 1, 1], [], []>} : vector<8x256xf32>, vector<256x512xf32>, vector<8x512xf32> -> vector<8x512xf32>
    %c0_14 = arith.constant 0 : index
    %c0_15 = arith.constant 0 : index
    %31 = vector.load %arg10[%c0_14, %c0_15] : memref<1x512xf32, #tpu.memory_space<vmem>>, vector<1x512xf32>
    %32 = vector.broadcast %31 : vector<1x512xf32> to vector<8x512xf32>
    %33 = arith.addf %30, %32 : vector<8x512xf32>
    %34 = vector.extract_strided_slice %33 {offsets = [0, 0], sizes = [8, 256], strides = [1, 1]} : vector<8x512xf32> to vector<8x256xf32>
    %35 = vector.shape_cast %34 : vector<8x256xf32> to vector<8x2x128xf32>
    %36 = tpu.transpose %35, [1, 0, 2] : vector<8x2x128xf32> -> vector<2x8x128xf32>
    %37 = vector.extract_strided_slice %33 {offsets = [0, 256], sizes = [8, 256], strides = [1, 1]} : vector<8x512xf32> to vector<8x256xf32>
    %38 = vector.shape_cast %37 : vector<8x256xf32> to vector<8x2x128xf32>
    %39 = tpu.transpose %38, [1, 0, 2] : vector<8x2x128xf32> -> vector<2x8x128xf32>
    %c0_16 = arith.constant 0 : index
    %c0_17 = arith.constant 0 : index
    %c0_18 = arith.constant 0 : index
    %40 = vector.load %arg14[%c0_16, %c0_17, %c0_18] : memref<2x8x128xf32, #tpu.memory_space<vmem>>, vector<2x8x128xf32>
    "tpu.trace_start"() <{level = 10 : i32, message = "hqd,hkd->hqk"}> : () -> ()
    %cst_19 = arith.constant dense<0.000000e+00> : vector<2x8x8xf32>
    %41 = tpu.matmul %40, %36, %cst_19 {dimension_numbers = #tpu.dot_dimension_numbers<[2], [2], [1], [1], [0, 0, 0, 1, 1, 1], [0], [0]>} : vector<2x8x128xf32>, vector<2x8x128xf32>, vector<2x8x8xf32> -> vector<2x8x8xf32>
    "tpu.trace_stop"() : () -> ()
    %c0_20 = arith.constant 0 : index
    %c0_21 = arith.constant 0 : index
    %c0_22 = arith.constant 0 : index
    %42 = vector.load %arg15[%c0_20, %c0_21, %c0_22] : memref<2x8x1xf32, #tpu.memory_space<vmem>>, vector<2x8x1xf32>
    %cst_23 = arith.constant dense<0xFF800000> : vector<2x8xf32>
    %43 = vector.multi_reduction <maximumf>, %41, %cst_23 [2] : vector<2x8x8xf32> to vector<2x8xf32>
    %44 = vector.shape_cast %43 : vector<2x8xf32> to vector<2x8x1xf32>
    %45 = arith.maximumf %42, %44 : vector<2x8x1xf32>
    %46 = arith.subf %42, %45 : vector<2x8x1xf32>
    %47 = math.exp %46 : vector<2x8x1xf32>
    %48 = vector.broadcast %45 : vector<2x8x1xf32> to vector<2x8x8xf32>
    %49 = arith.subf %41, %48 : vector<2x8x8xf32>
    %50 = math.exp %49 : vector<2x8x8xf32>
    %c0_24 = arith.constant 0 : index
    %c0_25 = arith.constant 0 : index
    %c0_26 = arith.constant 0 : index
    %51 = vector.load %arg16[%c0_24, %c0_25, %c0_26] : memref<2x8x1xf32, #tpu.memory_space<vmem>>, vector<2x8x1xf32>
    %52 = arith.mulf %47, %51 : vector<2x8x1xf32>
    %cst_27 = arith.constant dense<0.000000e+00> : vector<2x8xf32>
    %53 = vector.multi_reduction <add>, %50, %cst_27 [2] : vector<2x8x8xf32> to vector<2x8xf32>
    %54 = vector.shape_cast %53 : vector<2x8xf32> to vector<2x8x1xf32>
    %55 = arith.addf %52, %54 : vector<2x8x1xf32>
    %c0_28 = arith.constant 0 : index
    %c0_29 = arith.constant 0 : index
    %c0_30 = arith.constant 0 : index
    %56 = vector.load %arg16[%c0_28, %c0_29, %c0_30] : memref<2x8x1xf32, #tpu.memory_space<vmem>>, vector<2x8x1xf32>
    tpu.vector_store %arg16[%c0_28, %c0_29, %c0_30], %55 {strides = array<i32>} : memref<2x8x1xf32, #tpu.memory_space<vmem>>, vector<2x8x1xf32>,
    %c0_31 = arith.constant 0 : index
    %c0_32 = arith.constant 0 : index
    %c0_33 = arith.constant 0 : index
    %57 = vector.load %arg17[%c0_31, %c0_32, %c0_33] : memref<2x8x128xf32, #tpu.memory_space<vmem>>, vector<2x8x128xf32>
    %58 = vector.broadcast %47 : vector<2x8x1xf32> to vector<2x8x128xf32>
    %59 = arith.mulf %58, %57 : vector<2x8x128xf32>
    "tpu.trace_start"() <{level = 10 : i32, message = "hqk,hkd->hqd"}> : () -> ()
    %cst_34 = arith.constant dense<0.000000e+00> : vector<2x8x128xf32>
    %60 = tpu.matmul %50, %39, %cst_34 {dimension_numbers = #tpu.dot_dimension_numbers<[2], [1], [1], [2], [0, 0, 0, 1, 1, 2], [0], [0]>} : vector<2x8x8xf32>, vector<2x8x128xf32>, vector<2x8x128xf32> -> vector<2x8x128xf32>
    "tpu.trace_stop"() : () -> ()
    %61 = arith.addf %59, %60 : vector<2x8x128xf32>
    %c0_35 = arith.constant 0 : index
    %c0_36 = arith.constant 0 : index
    %c0_37 = arith.constant 0 : index
    %62 = vector.load %arg17[%c0_35, %c0_36, %c0_37] : memref<2x8x128xf32, #tpu.memory_space<vmem>>, vector<2x8x128xf32>
    tpu.vector_store %arg17[%c0_35, %c0_36, %c0_37], %61 {strides = array<i32>} : memref<2x8x128xf32, #tpu.memory_space<vmem>>, vector<2x8x128xf32>,
    %c0_38 = arith.constant 0 : index
    %c0_39 = arith.constant 0 : index
    %c0_40 = arith.constant 0 : index
    %63 = vector.load %arg15[%c0_38, %c0_39, %c0_40] : memref<2x8x1xf32, #tpu.memory_space<vmem>>, vector<2x8x1xf32>
    tpu.vector_store %arg15[%c0_38, %c0_39, %c0_40], %45 {strides = array<i32>} : memref<2x8x1xf32, #tpu.memory_space<vmem>>, vector<2x8x1xf32>,
    %c0_i32_41 = arith.constant 0 : i32
    %64 = arith.cmpi eq, %arg2, %c0_i32_41 : i32
    %65 = arith.extui %64 : i1 to i32
    %c0_i32_42 = arith.constant 0 : i32
    %66 = arith.cmpi ne, %65, %c0_i32_42 : i32
    scf.if %66 {
      %c0_43 = arith.constant 0 : index
      %c0_44 = arith.constant 0 : index
      %c0_45 = arith.constant 0 : index
      %67 = vector.load %arg16[%c0_43, %c0_44, %c0_45] : memref<2x8x1xf32, #tpu.memory_space<vmem>>, vector<2x8x1xf32>
      %68 = tpu.reciprocal %67 {approx = true} : vector<2x8x1xf32> -> vector<2x8x1xf32>
      %c0_46 = arith.constant 0 : index
      %c0_47 = arith.constant 0 : index
      %c0_48 = arith.constant 0 : index
      %69 = vector.load %arg17[%c0_46, %c0_47, %c0_48] : memref<2x8x128xf32, #tpu.memory_space<vmem>>, vector<2x8x128xf32>
      %70 = vector.broadcast %68 : vector<2x8x1xf32> to vector<2x8x128xf32>
      %71 = arith.mulf %69, %70 : vector<2x8x128xf32>
      %72 = tpu.transpose %71, [1, 0, 2] : vector<2x8x128xf32> -> vector<8x2x128xf32>
      %73 = vector.shape_cast %72 : vector<8x2x128xf32> to vector<8x256xf32>
      %c0_49 = arith.constant 0 : index
      %c0_50 = arith.constant 0 : index
      %74 = vector.load %arg11[%c0_49, %c0_50] : memref<256x256xf32, #tpu.memory_space<vmem>>, vector<256x256xf32>
      %cst_51 = arith.constant dense<0.000000e+00> : vector<8x256xf32>
      %75 = tpu.matmul %73, %74, %cst_51 {dimension_numbers = #tpu.dot_dimension_numbers<[1], [0], [0], [1], [0, 0, 1, 1], [], []>} : vector<8x256xf32>, vector<256x256xf32>, vector<8x256xf32> -> vector<8x256xf32>
      %c0_52 = arith.constant 0 : index
      %c0_53 = arith.constant 0 : index
      %76 = vector.load %arg12[%c0_52, %c0_53] : memref<1x256xf32, #tpu.memory_space<vmem>>, vector<1x256xf32>
      %77 = vector.broadcast %76 : vector<1x256xf32> to vector<8x256xf32>
      %78 = arith.addf %75, %77 : vector<8x256xf32>
      %c0_54 = arith.constant 0 : index
      %c0_55 = arith.constant 0 : index
      %c0_56 = arith.constant 0 : index
      %79 = vector.load %arg3[%c0_54, %c0_55, %c0_56] : memref<1x8x256xf32, #tpu.memory_space<vmem>>, vector<1x8x256xf32>
      %80 = vector.shape_cast %79 : vector<1x8x256xf32> to vector<8x256xf32>
      %81 = arith.addf %78, %80 : vector<8x256xf32>
      %c0_57 = arith.constant 0 : index
      %c0_58 = arith.constant 0 : index
      %c0_59 = arith.constant 0 : index
      %82 = vector.load %arg13[%c0_57, %c0_58, %c0_59] : memref<1x8x256xf32, #tpu.memory_space<vmem>>, vector<1x8x256xf32>
      %83 = vector.shape_cast %82 : vector<1x8x256xf32> to vector<8x256xf32>
      %84 = vector.shape_cast %81 : vector<8x256xf32> to vector<1x8x256xf32>
      tpu.vector_store %arg13[%c0_57, %c0_58, %c0_59], %84 {strides = array<i32>} : memref<1x8x256xf32, #tpu.memory_space<vmem>>, vector<1x8x256xf32>,
    } else {
    }
    return
  }
  func.func @transform_0(%arg0: i32, %arg1: i32, %arg2: i32) -> (i32, i32, i32) {
    %c0_i32 = arith.constant 0 : i32
    %c0_i32_0 = arith.constant 0 : i32
    return %arg0, %arg1, %c0_i32 : i32, i32, i32
  }
  func.func @transform_1(%arg0: i32, %arg1: i32, %arg2: i32) -> (i32, i32, i32) {
    %c0_i32 = arith.constant 0 : i32
    %c0_i32_0 = arith.constant 0 : i32
    return %arg0, %arg2, %c0_i32 : i32, i32, i32
  }
  func.func @transform_2(%arg0: i32, %arg1: i32, %arg2: i32) -> (i32, i32) {
    %c0_i32 = arith.constant 0 : i32
    %c0_i32_0 = arith.constant 0 : i32
    %c0_i32_1 = arith.constant 0 : i32
    return %c0_i32, %c0_i32_0 : i32, i32
  }
  func.func @transform_3(%arg0: i32, %arg1: i32, %arg2: i32) -> (i32, i32) {
    %c0_i32 = arith.constant 0 : i32
    %c0_i32_0 = arith.constant 0 : i32
    %c0_i32_1 = arith.constant 0 : i32
    return %c0_i32, %c0_i32_0 : i32, i32
  }
  func.func @transform_4(%arg0: i32, %arg1: i32, %arg2: i32) -> (i32, i32) {
    %c0_i32 = arith.constant 0 : i32
    %c0_i32_0 = arith.constant 0 : i32
    %c0_i32_1 = arith.constant 0 : i32
    return %c0_i32, %c0_i32_0 : i32, i32
  }
  func.func @transform_5(%arg0: i32, %arg1: i32, %arg2: i32) -> (i32, i32) {
    %c0_i32 = arith.constant 0 : i32
    %c0_i32_0 = arith.constant 0 : i32
    %c0_i32_1 = arith.constant 0 : i32
    return %c0_i32, %c0_i32_0 : i32, i32
  }
  func.func @transform_6(%arg0: i32, %arg1: i32, %arg2: i32) -> (i32, i32) {
    %c0_i32 = arith.constant 0 : i32
    %c0_i32_0 = arith.constant 0 : i32
    %c0_i32_1 = arith.constant 0 : i32
    return %c0_i32, %c0_i32_0 : i32, i32
  }
  func.func @transform_7(%arg0: i32, %arg1: i32, %arg2: i32) -> (i32, i32) {
    %c0_i32 = arith.constant 0 : i32
    %c0_i32_0 = arith.constant 0 : i32
    %c0_i32_1 = arith.constant 0 : i32
    return %c0_i32, %c0_i32_0 : i32, i32
  }
  func.func @transform_8(%arg0: i32, %arg1: i32, %arg2: i32) -> (i32, i32) {
    %c0_i32 = arith.constant 0 : i32
    %c0_i32_0 = arith.constant 0 : i32
    %c0_i32_1 = arith.constant 0 : i32
    return %c0_i32, %c0_i32_0 : i32, i32
  }
  func.func @transform_9(%arg0: i32, %arg1: i32, %arg2: i32) -> (i32, i32) {
    %c0_i32 = arith.constant 0 : i32
    %c0_i32_0 = arith.constant 0 : i32
    %c0_i32_1 = arith.constant 0 : i32
    return %c0_i32, %c0_i32_0 : i32, i32
  }
  func.func @transform_10(%arg0: i32, %arg1: i32, %arg2: i32) -> (i32, i32, i32) {
    %c0_i32 = arith.constant 0 : i32
    %c0_i32_0 = arith.constant 0 : i32
    return %arg0, %arg1, %c0_i32 : i32, i32, i32
  }
}

module attributes {stable_mosaic.version = 11 : i64} {
  func.func @kernel(%arg0: i32, %arg1: i32, %arg2: i32, %arg3: memref<1x8x256xf32, #tpu.memory_space<vmem>>, %arg4: memref<1x8x256xf32, #tpu.memory_space<vmem>>, %arg5: memref<1x256xf32, #tpu.memory_space<vmem>>, %arg6: memref<1x256xf32, #tpu.memory_space<vmem>>, %arg7: memref<256x256xf32, #tpu.memory_space<vmem>>, %arg8: memref<1x256xf32, #tpu.memory_space<vmem>>, %arg9: memref<256x512xf32, #tpu.memory_space<vmem>>, %arg10: memref<1x512xf32, #tpu.memory_space<vmem>>, %arg11: memref<256x256xf32, #tpu.memory_space<vmem>>, %arg12: memref<1x256xf32, #tpu.memory_space<vmem>>, %arg13: memref<1x8x256xf32, #tpu.memory_space<vmem>>, %arg14: memref<2x8x128xf32, #tpu.memory_space<vmem>>, %arg15: memref<2x8x1xf32, #tpu.memory_space<vmem>>, %arg16: memref<2x8x1xf32, #tpu.memory_space<vmem>>, %arg17: memref<2x8x128xf32, #tpu.memory_space<vmem>>) attributes {dimension_semantics = [#tpu.dimension_semantics<parallel>, #tpu.dimension_semantics<parallel>, #tpu.dimension_semantics<arbitrary>], iteration_bounds = array<i64: 2, 1, 1>, scalar_prefetch = 0 : i64, scratch_operands = 4 : i64, tpu.core_type = #tpu.core_type<tc>, window_params = [{transform_indices = @transform_0, window_bounds = array<i64: 1, 8, 256>}, {transform_indices = @transform_1, window_bounds = array<i64: 1, 8, 256>}, {pipeline_mode = #tpu.pipeline_mode<synchronous>, transform_indices = @transform_2, window_bounds = array<i64: 1, 256>}, {pipeline_mode = #tpu.pipeline_mode<synchronous>, transform_indices = @transform_3, window_bounds = array<i64: 1, 256>}, {pipeline_mode = #tpu.pipeline_mode<synchronous>, transform_indices = @transform_4, window_bounds = array<i64: 256, 256>}, {pipeline_mode = #tpu.pipeline_mode<synchronous>, transform_indices = @transform_5, window_bounds = array<i64: 1, 256>}, {pipeline_mode = #tpu.pipeline_mode<synchronous>, transform_indices = @transform_6, window_bounds = array<i64: 256, 512>}, {pipeline_mode = #tpu.pipeline_mode<synchronous>, transform_indices = @transform_7, window_bounds = array<i64: 1, 512>}, {pipeline_mode = #tpu.pipeline_mode<synchronous>, transform_indices = @transform_8, window_bounds = array<i64: 256, 256>}, {pipeline_mode = #tpu.pipeline_mode<synchronous>, transform_indices = @transform_9, window_bounds = array<i64: 1, 256>}, {transform_indices = @transform_10, window_bounds = array<i64: 1, 8, 256>}]} {
    %c0_i32 = arith.constant 0 : i32
    %0 = arith.cmpi eq, %arg2, %c0_i32 : i32
    %1 = arith.extui %0 : i1 to i32
    %c0_i32_0 = arith.constant 0 : i32
    %2 = arith.cmpi ne, %1, %c0_i32_0 : i32
    scf.if %2 {
      %c0_43 = arith.constant 0 : index
      %c0_44 = arith.constant 0 : index
      %c0_45 = arith.constant 0 : index
      %67 = vector.load %arg3[%c0_43, %c0_44, %c0_45] : memref<1x8x256xf32, #tpu.memory_space<vmem>>, vector<1x8x256xf32>
      %68 = vector.shape_cast %67 : vector<1x8x256xf32> to vector<8x256xf32>
      %c0_46 = arith.constant 0 : index
      %c0_47 = arith.constant 0 : index
      %69 = vector.load %arg5[%c0_46, %c0_47] : memref<1x256xf32, #tpu.memory_space<vmem>>, vector<1x256xf32>
      %c0_48 = arith.constant 0 : index
      %c0_49 = arith.constant 0 : index
      %70 = vector.load %arg6[%c0_48, %c0_49] : memref<1x256xf32, #tpu.memory_space<vmem>>, vector<1x256xf32>
      %cst_50 = arith.constant dense<0.000000e+00> : vector<8xf32>
      %71 = vector.multi_reduction <add>, %68, %cst_50 [1] : vector<8x256xf32> to vector<8xf32>
      %72 = vector.shape_cast %71 : vector<8xf32> to vector<8x1xf32>
      %cst_51 = arith.constant 2.560000e+02 : f32
      %73 = vector.broadcast %cst_51 : f32 to vector<8x1xf32>
      %74 = arith.divf %72, %73 : vector<8x1xf32>
      %75 = vector.broadcast %74 : vector<8x1xf32> to vector<8x256xf32>
      %76 = arith.subf %68, %75 : vector<8x256xf32>
      %77 = arith.mulf %76, %76 : vector<8x256xf32>
      %cst_52 = arith.constant dense<0.000000e+00> : vector<8xf32>
      %78 = vector.multi_reduction <add>, %77, %cst_52 [1] : vector<8x256xf32> to vector<8xf32>
      %79 = vector.shape_cast %78 : vector<8xf32> to vector<8x1xf32>
      %cst_53 = arith.constant 2.560000e+02 : f32
      %80 = vector.broadcast %cst_53 : f32 to vector<8x1xf32>
      %81 = arith.divf %79, %80 : vector<8x1xf32>
      %82 = vector.broadcast %74 : vector<8x1xf32> to vector<8x256xf32>
      %83 = arith.subf %68, %82 : vector<8x256xf32>
      %cst_54 = arith.constant 9.99999974E-6 : f32
      %84 = vector.broadcast %cst_54 : f32 to vector<8x1xf32>
      %85 = arith.addf %81, %84 : vector<8x1xf32>
      %86 = math.rsqrt %85 : vector<8x1xf32>
      %87 = vector.broadcast %86 : vector<8x1xf32> to vector<8x256xf32>
      %88 = arith.mulf %83, %87 : vector<8x256xf32>
      %89 = vector.broadcast %69 : vector<1x256xf32> to vector<8x256xf32>
      %90 = arith.mulf %88, %89 : vector<8x256xf32>
      %91 = vector.broadcast %70 : vector<1x256xf32> to vector<8x256xf32>
      %92 = arith.addf %90, %91 : vector<8x256xf32>
      %c0_55 = arith.constant 0 : index
      %c0_56 = arith.constant 0 : index
      %93 = vector.load %arg7[%c0_55, %c0_56] : memref<256x256xf32, #tpu.memory_space<vmem>>, vector<256x256xf32>
      %cst_57 = arith.constant dense<0.000000e+00> : vector<8x256xf32>
      %94 = tpu.matmul %92, %93, %cst_57 {dimension_numbers = #tpu.dot_dimension_numbers<[1], [0], [0], [1], [0, 0, 1, 1], [], []>} : vector<8x256xf32>, vector<256x256xf32>, vector<8x256xf32> -> vector<8x256xf32>
      %c0_58 = arith.constant 0 : index
      %c0_59 = arith.constant 0 : index
      %95 = vector.load %arg8[%c0_58, %c0_59] : memref<1x256xf32, #tpu.memory_space<vmem>>, vector<1x256xf32>
      %96 = vector.broadcast %95 : vector<1x256xf32> to vector<8x256xf32>
      %97 = arith.addf %94, %96 : vector<8x256xf32>
      %cst_60 = arith.constant 0.0883883461 : f32
      %98 = vector.broadcast %cst_60 : f32 to vector<8x256xf32>
      %99 = arith.mulf %97, %98 : vector<8x256xf32>
      %100 = vector.shape_cast %99 : vector<8x256xf32> to vector<8x2x128xf32>
      %101 = tpu.transpose %100, [1, 0, 2] : vector<8x2x128xf32> -> vector<2x8x128xf32>
      %c0_61 = arith.constant 0 : index
      %c0_62 = arith.constant 0 : index
      %c0_63 = arith.constant 0 : index
      %102 = vector.load %arg14[%c0_61, %c0_62, %c0_63] : memref<2x8x128xf32, #tpu.memory_space<vmem>>, vector<2x8x128xf32>
      tpu.vector_store %arg14[%c0_61, %c0_62, %c0_63], %101 {strides = array<i32>} : memref<2x8x128xf32, #tpu.memory_space<vmem>>, vector<2x8x128xf32>,
      %cst_64 = arith.constant 0xFF800000 : f32
      %103 = vector.broadcast %cst_64 : f32 to vector<2x8x1xf32>
      %c0_65 = arith.constant 0 : index
      %c0_66 = arith.constant 0 : index
      %c0_67 = arith.constant 0 : index
      %104 = vector.load %arg15[%c0_65, %c0_66, %c0_67] : memref<2x8x1xf32, #tpu.memory_space<vmem>>, vector<2x8x1xf32>
      tpu.vector_store %arg15[%c0_65, %c0_66, %c0_67], %103 {strides = array<i32>} : memref<2x8x1xf32, #tpu.memory_space<vmem>>, vector<2x8x1xf32>,
      %cst_68 = arith.constant 0.000000e+00 : f32
      %105 = vector.broadcast %cst_68 : f32 to vector<2x8x1xf32>
      %c0_69 = arith.constant 0 : index
      %c0_70 = arith.constant 0 : index
      %c0_71 = arith.constant 0 : index
      %106 = vector.load %arg16[%c0_69, %c0_70, %c0_71] : memref<2x8x1xf32, #tpu.memory_space<vmem>>, vector<2x8x1xf32>
      tpu.vector_store %arg16[%c0_69, %c0_70, %c0_71], %105 {strides = array<i32>} : memref<2x8x1xf32, #tpu.memory_space<vmem>>, vector<2x8x1xf32>,
      %cst_72 = arith.constant 0.000000e+00 : f32
      %107 = vector.broadcast %cst_72 : f32 to vector<2x8x128xf32>
      %c0_73 = arith.constant 0 : index
      %c0_74 = arith.constant 0 : index
      %c0_75 = arith.constant 0 : index
      %108 = vector.load %arg17[%c0_73, %c0_74, %c0_75] : memref<2x8x128xf32, #tpu.memory_space<vmem>>, vector<2x8x128xf32>
      tpu.vector_store %arg17[%c0_73, %c0_74, %c0_75], %107 {strides = array<i32>} : memref<2x8x128xf32, #tpu.memory_space<vmem>>, vector<2x8x128xf32>,
    } else {
    }
    %c0 = arith.constant 0 : index
    %c0_1 = arith.constant 0 : index
    %c0_2 = arith.constant 0 : index
    %3 = vector.load %arg4[%c0, %c0_1, %c0_2] : memref<1x8x256xf32, #tpu.memory_space<vmem>>, vector<1x8x256xf32>
    %4 = vector.shape_cast %3 : vector<1x8x256xf32> to vector<8x256xf32>
    %c0_3 = arith.constant 0 : index
    %c0_4 = arith.constant 0 : index
    %5 = vector.load %arg5[%c0_3, %c0_4] : memref<1x256xf32, #tpu.memory_space<vmem>>, vector<1x256xf32>
    %c0_5 = arith.constant 0 : index
    %c0_6 = arith.constant 0 : index
    %6 = vector.load %arg6[%c0_5, %c0_6] : memref<1x256xf32, #tpu.memory_space<vmem>>, vector<1x256xf32>
    %cst = arith.constant dense<0.000000e+00> : vector<8xf32>
    %7 = vector.multi_reduction <add>, %4, %cst [1] : vector<8x256xf32> to vector<8xf32>
    %8 = vector.shape_cast %7 : vector<8xf32> to vector<8x1xf32>
    %cst_7 = arith.constant 2.560000e+02 : f32
    %9 = vector.broadcast %cst_7 : f32 to vector<8x1xf32>
    %10 = arith.divf %8, %9 : vector<8x1xf32>
    %11 = vector.broadcast %10 : vector<8x1xf32> to vector<8x256xf32>
    %12 = arith.subf %4, %11 : vector<8x256xf32>
    %13 = arith.mulf %12, %12 : vector<8x256xf32>
    %cst_8 = arith.constant dense<0.000000e+00> : vector<8xf32>
    %14 = vector.multi_reduction <add>, %13, %cst_8 [1] : vector<8x256xf32> to vector<8xf32>
    %15 = vector.shape_cast %14 : vector<8xf32> to vector<8x1xf32>
    %cst_9 = arith.constant 2.560000e+02 : f32
    %16 = vector.broadcast %cst_9 : f32 to vector<8x1xf32>
    %17 = arith.divf %15, %16 : vector<8x1xf32>
    %18 = vector.broadcast %10 : vector<8x1xf32> to vector<8x256xf32>
    %19 = arith.subf %4, %18 : vector<8x256xf32>
    %cst_10 = arith.constant 9.99999974E-6 : f32
    %20 = vector.broadcast %cst_10 : f32 to vector<8x1xf32>
    %21 = arith.addf %17, %20 : vector<8x1xf32>
    %22 = math.rsqrt %21 : vector<8x1xf32>
    %23 = vector.broadcast %22 : vector<8x1xf32> to vector<8x256xf32>
    %24 = arith.mulf %19, %23 : vector<8x256xf32>
    %25 = vector.broadcast %5 : vector<1x256xf32> to vector<8x256xf32>
    %26 = arith.mulf %24, %25 : vector<8x256xf32>
    %27 = vector.broadcast %6 : vector<1x256xf32> to vector<8x256xf32>
    %28 = arith.addf %26, %27 : vector<8x256xf32>
    %c0_11 = arith.constant 0 : index
    %c0_12 = arith.constant 0 : index
    %29 = vector.load %arg9[%c0_11, %c0_12] : memref<256x512xf32, #tpu.memory_space<vmem>>, vector<256x512xf32>
    %cst_13 = arith.constant dense<0.000000e+00> : vector<8x512xf32>
    %30 = tpu.matmul %28, %29, %cst_13 {dimension_numbers = #tpu.dot_dimension_numbers<[1], [0], [0], [1], [0, 0, 1, 1], [], []>} : vector<8x256xf32>, vector<256x512xf32>, vector<8x512xf32> -> vector<8x512xf32>
    %c0_14 = arith.constant 0 : index
    %c0_15 = arith.constant 0 : index
    %31 = vector.load %arg10[%c0_14, %c0_15] : memref<1x512xf32, #tpu.memory_space<vmem>>, vector<1x512xf32>
    %32 = vector.broadcast %31 : vector<1x512xf32> to vector<8x512xf32>
    %33 = arith.addf %30, %32 : vector<8x512xf32>
    %34 = vector.extract_strided_slice %33 {offsets = [0, 0], sizes = [8, 256], strides = [1, 1]} : vector<8x512xf32> to vector<8x256xf32>
    %35 = vector.shape_cast %34 : vector<8x256xf32> to vector<8x2x128xf32>
    %36 = tpu.transpose %35, [1, 0, 2] : vector<8x2x128xf32> -> vector<2x8x128xf32>
    %37 = vector.extract_strided_slice %33 {offsets = [0, 256], sizes = [8, 256], strides = [1, 1]} : vector<8x512xf32> to vector<8x256xf32>
    %38 = vector.shape_cast %37 : vector<8x256xf32> to vector<8x2x128xf32>
    %39 = tpu.transpose %38, [1, 0, 2] : vector<8x2x128xf32> -> vector<2x8x128xf32>
    %c0_16 = arith.constant 0 : index
    %c0_17 = arith.constant 0 : index
    %c0_18 = arith.constant 0 : index
    %40 = vector.load %arg14[%c0_16, %c0_17, %c0_18] : memref<2x8x128xf32, #tpu.memory_space<vmem>>, vector<2x8x128xf32>
    "tpu.trace_start"() <{level = 10 : i32, message = "hqd,hkd->hqk"}> : () -> ()
    %cst_19 = arith.constant dense<0.000000e+00> : vector<2x8x8xf32>
    %41 = tpu.matmul %40, %36, %cst_19 {dimension_numbers = #tpu.dot_dimension_numbers<[2], [2], [1], [1], [0, 0, 0, 1, 1, 1], [0], [0]>} : vector<2x8x128xf32>, vector<2x8x128xf32>, vector<2x8x8xf32> -> vector<2x8x8xf32>
    "tpu.trace_stop"() : () -> ()
    %c0_20 = arith.constant 0 : index
    %c0_21 = arith.constant 0 : index
    %c0_22 = arith.constant 0 : index
    %42 = vector.load %arg15[%c0_20, %c0_21, %c0_22] : memref<2x8x1xf32, #tpu.memory_space<vmem>>, vector<2x8x1xf32>
    %cst_23 = arith.constant dense<0xFF800000> : vector<2x8xf32>
    %43 = vector.multi_reduction <maximumf>, %41, %cst_23 [2] : vector<2x8x8xf32> to vector<2x8xf32>
    %44 = vector.shape_cast %43 : vector<2x8xf32> to vector<2x8x1xf32>
    %45 = arith.maximumf %42, %44 : vector<2x8x1xf32>
    %46 = arith.subf %42, %45 : vector<2x8x1xf32>
    %47 = math.exp %46 : vector<2x8x1xf32>
    %48 = vector.broadcast %45 : vector<2x8x1xf32> to vector<2x8x8xf32>
    %49 = arith.subf %41, %48 : vector<2x8x8xf32>
    %50 = math.exp %49 : vector<2x8x8xf32>
    %c0_24 = arith.constant 0 : index
    %c0_25 = arith.constant 0 : index
    %c0_26 = arith.constant 0 : index
    %51 = vector.load %arg16[%c0_24, %c0_25, %c0_26] : memref<2x8x1xf32, #tpu.memory_space<vmem>>, vector<2x8x1xf32>
    %52 = arith.mulf %47, %51 : vector<2x8x1xf32>
    %cst_27 = arith.constant dense<0.000000e+00> : vector<2x8xf32>
    %53 = vector.multi_reduction <add>, %50, %cst_27 [2] : vector<2x8x8xf32> to vector<2x8xf32>
    %54 = vector.shape_cast %53 : vector<2x8xf32> to vector<2x8x1xf32>
    %55 = arith.addf %52, %54 : vector<2x8x1xf32>
    %c0_28 = arith.constant 0 : index
    %c0_29 = arith.constant 0 : index
    %c0_30 = arith.constant 0 : index
    %56 = vector.load %arg16[%c0_28, %c0_29, %c0_30] : memref<2x8x1xf32, #tpu.memory_space<vmem>>, vector<2x8x1xf32>
    tpu.vector_store %arg16[%c0_28, %c0_29, %c0_30], %55 {strides = array<i32>} : memref<2x8x1xf32, #tpu.memory_space<vmem>>, vector<2x8x1xf32>,
    %c0_31 = arith.constant 0 : index
    %c0_32 = arith.constant 0 : index
    %c0_33 = arith.constant 0 : index
    %57 = vector.load %arg17[%c0_31, %c0_32, %c0_33] : memref<2x8x128xf32, #tpu.memory_space<vmem>>, vector<2x8x128xf32>
    %58 = vector.broadcast %47 : vector<2x8x1xf32> to vector<2x8x128xf32>
    %59 = arith.mulf %58, %57 : vector<2x8x128xf32>
    "tpu.trace_start"() <{level = 10 : i32, message = "hqk,hkd->hqd"}> : () -> ()
    %cst_34 = arith.constant dense<0.000000e+00> : vector<2x8x128xf32>
    %60 = tpu.matmul %50, %39, %cst_34 {dimension_numbers = #tpu.dot_dimension_numbers<[2], [1], [1], [2], [0, 0, 0, 1, 1, 2], [0], [0]>} : vector<2x8x8xf32>, vector<2x8x128xf32>, vector<2x8x128xf32> -> vector<2x8x128xf32>
    "tpu.trace_stop"() : () -> ()
    %61 = arith.addf %59, %60 : vector<2x8x128xf32>
    %c0_35 = arith.constant 0 : index
    %c0_36 = arith.constant 0 : index
    %c0_37 = arith.constant 0 : index
    %62 = vector.load %arg17[%c0_35, %c0_36, %c0_37] : memref<2x8x128xf32, #tpu.memory_space<vmem>>, vector<2x8x128xf32>
    tpu.vector_store %arg17[%c0_35, %c0_36, %c0_37], %61 {strides = array<i32>} : memref<2x8x128xf32, #tpu.memory_space<vmem>>, vector<2x8x128xf32>,
    %c0_38 = arith.constant 0 : index
    %c0_39 = arith.constant 0 : index
    %c0_40 = arith.constant 0 : index
    %63 = vector.load %arg15[%c0_38, %c0_39, %c0_40] : memref<2x8x1xf32, #tpu.memory_space<vmem>>, vector<2x8x1xf32>
    tpu.vector_store %arg15[%c0_38, %c0_39, %c0_40], %45 {strides = array<i32>} : memref<2x8x1xf32, #tpu.memory_space<vmem>>, vector<2x8x1xf32>,
    %c0_i32_41 = arith.constant 0 : i32
    %64 = arith.cmpi eq, %arg2, %c0_i32_41 : i32
    %65 = arith.extui %64 : i1 to i32
    %c0_i32_42 = arith.constant 0 : i32
    %66 = arith.cmpi ne, %65, %c0_i32_42 : i32
    scf.if %66 {
      %c0_43 = arith.constant 0 : index
      %c0_44 = arith.constant 0 : index
      %c0_45 = arith.constant 0 : index
      %67 = vector.load %arg16[%c0_43, %c0_44, %c0_45] : memref<2x8x1xf32, #tpu.memory_space<vmem>>, vector<2x8x1xf32>
      %68 = tpu.reciprocal %67 {approx = true} : vector<2x8x1xf32> -> vector<2x8x1xf32>
      %c0_46 = arith.constant 0 : index
      %c0_47 = arith.constant 0 : index
      %c0_48 = arith.constant 0 : index
      %69 = vector.load %arg17[%c0_46, %c0_47, %c0_48] : memref<2x8x128xf32, #tpu.memory_space<vmem>>, vector<2x8x128xf32>
      %70 = vector.broadcast %68 : vector<2x8x1xf32> to vector<2x8x128xf32>
      %71 = arith.mulf %69, %70 : vector<2x8x128xf32>
      %72 = tpu.transpose %71, [1, 0, 2] : vector<2x8x128xf32> -> vector<8x2x128xf32>
      %73 = vector.shape_cast %72 : vector<8x2x128xf32> to vector<8x256xf32>
      %c0_49 = arith.constant 0 : index
      %c0_50 = arith.constant 0 : index
      %74 = vector.load %arg11[%c0_49, %c0_50] : memref<256x256xf32, #tpu.memory_space<vmem>>, vector<256x256xf32>
      %cst_51 = arith.constant dense<0.000000e+00> : vector<8x256xf32>
      %75 = tpu.matmul %73, %74, %cst_51 {dimension_numbers = #tpu.dot_dimension_numbers<[1], [0], [0], [1], [0, 0, 1, 1], [], []>} : vector<8x256xf32>, vector<256x256xf32>, vector<8x256xf32> -> vector<8x256xf32>
      %c0_52 = arith.constant 0 : index
      %c0_53 = arith.constant 0 : index
      %76 = vector.load %arg12[%c0_52, %c0_53] : memref<1x256xf32, #tpu.memory_space<vmem>>, vector<1x256xf32>
      %77 = vector.broadcast %76 : vector<1x256xf32> to vector<8x256xf32>
      %78 = arith.addf %75, %77 : vector<8x256xf32>
      %c0_54 = arith.constant 0 : index
      %c0_55 = arith.constant 0 : index
      %c0_56 = arith.constant 0 : index
      %79 = vector.load %arg3[%c0_54, %c0_55, %c0_56] : memref<1x8x256xf32, #tpu.memory_space<vmem>>, vector<1x8x256xf32>
      %80 = vector.shape_cast %79 : vector<1x8x256xf32> to vector<8x256xf32>
      %81 = arith.addf %78, %80 : vector<8x256xf32>
      %c0_57 = arith.constant 0 : index
      %c0_58 = arith.constant 0 : index
      %c0_59 = arith.constant 0 : index
      %82 = vector.load %arg13[%c0_57, %c0_58, %c0_59] : memref<1x8x256xf32, #tpu.memory_space<vmem>>, vector<1x8x256xf32>
      %83 = vector.shape_cast %82 : vector<1x8x256xf32> to vector<8x256xf32>
      %84 = vector.shape_cast %81 : vector<8x256xf32> to vector<1x8x256xf32>
      tpu.vector_store %arg13[%c0_57, %c0_58, %c0_59], %84 {strides = array<i32>} : memref<1x8x256xf32, #tpu.memory_space<vmem>>, vector<1x8x256xf32>,
    } else {
    }
    return
  }
  func.func @transform_0(%arg0: i32, %arg1: i32, %arg2: i32) -> (i32, i32, i32) {
    %c0_i32 = arith.constant 0 : i32
    %c0_i32_0 = arith.constant 0 : i32
    return %arg0, %arg1, %c0_i32 : i32, i32, i32
  }
  func.func @transform_1(%arg0: i32, %arg1: i32, %arg2: i32) -> (i32, i32, i32) {
    %c0_i32 = arith.constant 0 : i32
    %c0_i32_0 = arith.constant 0 : i32
    return %arg0, %arg2, %c0_i32 : i32, i32, i32
  }
  func.func @transform_2(%arg0: i32, %arg1: i32, %arg2: i32) -> (i32, i32) {
    %c0_i32 = arith.constant 0 : i32
    %c0_i32_0 = arith.constant 0 : i32
    %c0_i32_1 = arith.constant 0 : i32
    return %c0_i32, %c0_i32_0 : i32, i32
  }
  func.func @transform_3(%arg0: i32, %arg1: i32, %arg2: i32) -> (i32, i32) {
    %c0_i32 = arith.constant 0 : i32
    %c0_i32_0 = arith.constant 0 : i32
    %c0_i32_1 = arith.constant 0 : i32
    return %c0_i32, %c0_i32_0 : i32, i32
  }
  func.func @transform_4(%arg0: i32, %arg1: i32, %arg2: i32) -> (i32, i32) {
    %c0_i32 = arith.constant 0 : i32
    %c0_i32_0 = arith.constant 0 : i32
    %c0_i32_1 = arith.constant 0 : i32
    return %c0_i32, %c0_i32_0 : i32, i32
  }
  func.func @transform_5(%arg0: i32, %arg1: i32, %arg2: i32) -> (i32, i32) {
    %c0_i32 = arith.constant 0 : i32
    %c0_i32_0 = arith.constant 0 : i32
    %c0_i32_1 = arith.constant 0 : i32
    return %c0_i32, %c0_i32_0 : i32, i32
  }
  func.func @transform_6(%arg0: i32, %arg1: i32, %arg2: i32) -> (i32, i32) {
    %c0_i32 = arith.constant 0 : i32
    %c0_i32_0 = arith.constant 0 : i32
    %c0_i32_1 = arith.constant 0 : i32
    return %c0_i32, %c0_i32_0 : i32, i32
  }
  func.func @transform_7(%arg0: i32, %arg1: i32, %arg2: i32) -> (i32, i32) {
    %c0_i32 = arith.constant 0 : i32
    %c0_i32_0 = arith.constant 0 : i32
    %c0_i32_1 = arith.constant 0 : i32
    return %c0_i32, %c0_i32_0 : i32, i32
  }
  func.func @transform_8(%arg0: i32, %arg1: i32, %arg2: i32) -> (i32, i32) {
    %c0_i32 = arith.constant 0 : i32
    %c0_i32_0 = arith.constant 0 : i32
    %c0_i32_1 = arith.constant 0 : i32
    return %c0_i32, %c0_i32_0 : i32, i32
  }
  func.func @transform_9(%arg0: i32, %arg1: i32, %arg2: i32) -> (i32, i32) {
    %c0_i32 = arith.constant 0 : i32
    %c0_i32_0 = arith.constant 0 : i32
    %c0_i32_1 = arith.constant 0 : i32
    return %c0_i32, %c0_i32_0 : i32, i32
  }
  func.func @transform_10(%arg0: i32, %arg1: i32, %arg2: i32) -> (i32, i32, i32) {
    %c0_i32 = arith.constant 0 : i32
    %c0_i32_0 = arith.constant 0 : i32
    return %arg0, %arg1, %c0_i32 : i32, i32, i32
  }
}

</mosaic_0001>

<bundles_post_ra>
// kernel: tpu_custom_call.1
= control target key start
LH: loop header
LB: loop body
LE: loop exit
PB: predicated region body
PF: predicated region fallthrough
CT: control target
= control target key end

     0   :  { %s3467_s0 = inlined_call_operand.hbm [shape: f32[2,8,256], index: 0, kind: input, shape index: {}]   ;;  %s3468_s1 = inlined_call_operand.hbm [shape: f32[2,8,256], index: 1, kind: input, shape index: {}]   ;;  %s3469_s2 = inlined_call_operand.vmem [shape: f32[1,256], index: 2, kind: input, shape index: {}]   ;;  %s3470_s3 = inlined_call_operand.vmem [shape: f32[1,256], index: 3, kind: input, shape index: {}]   ;;  %s3471_s4 = inlined_call_operand.hbm [shape: f32[256,256], index: 4, kind: input, shape index: {}]   ;;  %s3472_s5 = inlined_call_operand.vmem [shape: f32[1,256], index: 5, kind: input, shape index: {}]   ;;  %s3473_s6 = inlined_call_operand.hbm [shape: f32[256,512], index: 6, kind: input, shape index: {}]   ;;  %s3474_s7 = inlined_call_operand.vmem [shape: f32[1,512], index: 7, kind: input, shape index: {}]   ;;  %s3475_s8 = inlined_call_operand.hbm [shape: f32[256,256], index: 8, kind: input, shape index: {}]   ;;  %s3476_s9 = inlined_call_operand.vmem [shape: f32[1,256], index: 9, kind: input, shape index: {}]   ;;  %s3477_s10 = inlined_call_operand.hbm [shape: f32[2,8,256], index: 10, kind: output, shape index: {}]  }
   0x1   :  { %3488 = sst [smem:[#allocation25_spill]] %s3471_s4 }
   0x2   :  { %3489 = sst [smem:[#allocation26_spill]] %s3473_s6 }
   0x3   :  { %3490 = sst [smem:[#allocation27_spill]] %s3475_s8 }
   0x4   :  { %3491 = sst [smem:[#allocation28_spill]] %s3476_s9 }
   0x5   :  { %3492 = sst [smem:[#allocation29_spill]] %s3477_s10 }
   0x6   :  { %15 = vsyncpa [#allocation7], 0 }
   0x7   :  { %17 = vsyncpa [#allocation7 + $0x1], 0 }
   0x8   :  { %18 = vsyncpa [#allocation10], 0 }
   0x9   :  { %20 = vsyncpa [#allocation10 + $0x1], 0 }
   0xa   :  { %21 = vsyncpa [#allocation13], 0 }
   0xb   :  { %22 = vsyncpa [#allocation8], 0 }
   0xc   :  { %24 = vsyncpa [#allocation8 + $0x1], 0  ;;  %s2945_s13 = smov 0   ;;  %s2947_s14 = smov 0  }
   0xd   :  { %s2949_s15 = smov 0   ;;  %s2951_s16 = smov 0  }
   0xe   :  { %s2953_s17 = smov 0   ;;  %s2955_s18 = smov 0  }
   0xf LB: > { %3493 = sst [smem:[#allocation21_spill]] %s2852_s13  ;;  %s2976_s19 = sadd.s32 4294967295, %s2872_s18   ;;  %s2872_s18 = sphi %s2955_s18, %s30_s18   ;;  %s2868_s17 = sphi %s2953_s17, %s3530_s17   ;;  %s2864_s16 = sphi %s2951_s16, %s3529_s16   ;;  %s2860_s15 = sphi %s2949_s15, %s3528_s15   ;;  %s2856_s14 = sphi %s2947_s14, %s3527_s14   ;;  %s2852_s13 = sphi %s2945_s13, %s3526_s13  }
  0x10   : > { %3494 = sst [smem:[#allocation22_spill]] %s2864_s16  ;;  %s2187_s20 = sadd.s32 4294967294, %s2872_s18  }
  0x11   : > { %p71_p0 = scmp.ne.s32.totalorder %s2856_s14, %s2852_s13  ;;  %p3479_p1 = scmp.eq.s32.totalorder %s2976_s19, 0 }
  0x12   : > { %p299_p3 = scmp.eq.s32.totalorder %s2187_s20, 1  ;;  %p2188_p5 = scmp.ge.s32.totalorder %s2872_s18, 1 }
  0x13   : > { %p2985_p4 = por %p3479_p1, %p71_p0  ;;  %p306_p7 = scmp.lt.s32.totalorder %s2872_s18, 3 }
  0x14   : > { %p2990_p6 = por %p299_p3, %p71_p0  ;;  %s2874_s24 = smov [#allocation11]  }
  0x15   : > { %s3495_s21 = scalar_select %p2985_p4, 1, 0 }
  0x16   : > { %s3496_s22 = scalar_select %p2990_p6, 1, 0 }
  0x17   : > { %p2995_p8 = pnand %p2188_p5, %p306_p7  ;;  %s324_s25 = sshll.u32 %s2874_s24, 4  ;;  %s2999_s25 = int_to_ptr.vmem [resolvable:$true] %s324_s25 }
  0x18   : > { %3497 = sst [smem:[#allocation23_spill]] %s3496_s22  ;;  %s2875_s27 = smov [#allocation12]  }
  0x19   : > { %s3498_s23 = scalar_select %p2995_p8, 1, 0 }
  0x1a   : > { %p2526_p9 = pneg %p2995_p8  ;;  %s340_s28 = sshll.u32 %s2875_s27, 4  ;;  %s3010_s28 = int_to_ptr.vmem [resolvable:$true] %s340_s28 }
  0x1b   : > { %s3500_s4 = sld [smem:[#allocation25_spill]] }
  0x1c   : > { %p3006_p11 = pnand %p2526_p9, %p3479_p1 }
  0x1e   : > { %p3020_p13 = pneg %p3006_p11 }
  0x21   : > { %s2634_s11 = scalar_lea.hbm %s3500_s4, 8192 }
  0x22   : > { %p2635_p12 = scmp.ne.s32.totalorder %s3500_s4, %s2634_s11  ;;  %p2641_p5 = scmp.lt.u32.totalorder %s2634_s11, %s3500_s4 }
  0x24   : > { %p2637_p0 = pnand %p3020_p13, %p2635_p12 }
  0x26   : > { %p2638_p3 = pneg %p2637_p0 }
  0x28   : > { %p2643_p7 = pnand %p2641_p5, %p2638_p3 }
  0x2a   : > { %2646 = shalt.err (!%p2643_p7)
}
  0x2b   : > { %s2647_s29 = scalar_lea.vmem %s2999_s25, 8192  ;;  %p2655_p2 = scmp.lt.s32.totalorder %s2999_s25, %s2999_s25 }
  0x2c   : > { %p2648_p9 = scmp.ne.s32.totalorder %s2999_s25, %s2647_s29  ;;  %p2656_p6 = scmp.lt.s32.totalorder %s2647_s29, %s2647_s29 }
  0x2e   : > { %p2650_p10 = pnand %p2648_p9, %p3020_p13  ;;  %p2657_p12 = por %p2656_p6, %p2655_p2 }
  0x30   : > { %p2651_p1 = pneg %p2650_p10 }
  0x32   : > { %p2658_p0 = pnand %p2657_p12, %p2651_p1 }
  0x34   : > { %2661 = shalt.err (!%p2658_p0)
}
  0x35   : > { %s3482_s30 = smov 256   ;;  %s3483_s22 = smov 16  }
  0x36   : > { %2529 = dma.hbm_to_vmem [thread:$0]  (!%p3006_p11), %s3500_s4, 8192, %s2999_s25, [#allocation10], %s3482_s30, %s3482_s30, %s3483_s22  }
  0x37   : > { %s3502_s6 = sld [smem:[#allocation26_spill]] }
  0x3d   : > { %s2662_s29 = scalar_lea.hbm %s3502_s6, 16384 }
  0x3e   : > { %p2663_p1 = scmp.ne.s32.totalorder %s3502_s6, %s2662_s29  ;;  %p2669_p10 = scmp.lt.u32.totalorder %s2662_s29, %s3502_s6 }
  0x40   : > { %p2665_p2 = pnand %p2663_p1, %p3020_p13 }
  0x42   : > { %p2666_p6 = pneg %p2665_p2 }
  0x44   : > { %p2671_p3 = pnand %p2669_p10, %p2666_p6 }
  0x46   : > { %2674 = shalt.err (!%p2671_p3)
}
  0x47   : > { %s2675_s25 = scalar_lea.vmem %s3010_s28, 16384  ;;  %p2683_p12 = scmp.lt.s32.totalorder %s3010_s28, %s3010_s28 }
  0x48   : > { %p2676_p5 = scmp.ne.s32.totalorder %s3010_s28, %s2675_s25  ;;  %p2684_p0 = scmp.lt.s32.totalorder %s2675_s25, %s2675_s25 }
  0x4a   : > { %p2678_p7 = pnand %p2676_p5, %p3020_p13  ;;  %p2685_p1 = por %p2684_p0, %p2683_p12 }
  0x4c   : > { %p2679_p9 = pneg %p2678_p7 }
  0x4e   : > { %p2686_p2 = pnand %p2685_p1, %p2679_p9 }
  0x50   : > { %2689 = shalt.err (!%p2686_p2)
}
  0x51   : > { %s2878_s10 = smov 512   ;;  %s2879_s9 = smov 32  }
  0x52   : > { %2532 = dma.hbm_to_vmem [thread:$0]  (!%p3006_p11), %s3502_s6, 16384, %s3010_s28, [#allocation13], %s2878_s10, %s2878_s10, %s2879_s9  }
  0x53   : > { %s2880_s11 = smov [#allocation14]   ;;  %s3503_s8 = sld [smem:[#allocation27_spill]] }
  0x54   : > { %s356_s12 = sshll.u32 %s2880_s11, 4  ;;  %s357_s12 = int_to_ptr.vmem [resolvable:$true] %s356_s12 }
  0x59   : > { %s2690_s29 = scalar_lea.hbm %s3503_s8, 8192 }
  0x5a   : > { %p2691_p6 = scmp.ne.s32.totalorder %s3503_s8, %s2690_s29  ;;  %p2697_p5 = scmp.lt.u32.totalorder %s2690_s29, %s3503_s8 }
  0x5c   : > { %p2693_p10 = pnand %p2691_p6, %p3020_p13 }
  0x5e   : > { %p2694_p3 = pneg %p2693_p10 }
  0x60   : > { %p2699_p7 = pnand %p2697_p5, %p2694_p3 }
  0x62   : > { %2702 = shalt.err (!%p2699_p7)
}
  0x63   : > { %s2703_s28 = scalar_lea.vmem %s357_s12, 8192  ;;  %p2711_p1 = scmp.lt.s32.totalorder %s357_s12, %s357_s12 }
  0x64   : > { %p2704_p9 = scmp.ne.s32.totalorder %s357_s12, %s2703_s28  ;;  %p2712_p2 = scmp.lt.s32.totalorder %s2703_s28, %s2703_s28 }
  0x66   : > { %p2706_p12 = pnand %p2704_p9, %p3020_p13  ;;  %p2713_p4 = por %p2712_p2, %p2711_p1 }
  0x68   : > { %p2707_p0 = pneg %p2706_p12 }
  0x6a   : > { %p2714_p8 = pnand %p2713_p4, %p2707_p0 }
  0x6c   : > { %2717 = shalt.err (!%p2714_p8)
}
  0x6d   : > { %s3504_s30 = smov 16   ;;  %s3505_s10 = smov 256  }
  0x6e   : > { %2535 = dma.hbm_to_vmem [thread:$0]  (!%p3006_p11), %s3503_s8, 8192, %s357_s12, [#allocation13], %s3505_s10, %s3505_s10, %s3504_s30  }
  0x6f   : > { %s49_s24 = sadd.s32 1, %s2868_s17  ;;  %s58_s26 = sadd.s32 1, %s2860_s15 }
  0x70   : > { %p51_p4 = scmp.ge.s32.totalorder %s49_s24, 2  ;;  %p65_p8 = scmp.ne.s32.totalorder %s2860_s15, %s2856_s14 }
  0x71   : > { %p66_p13 = scmp.eq.s32.totalorder %s2872_s18, 0  ;;  %p3508_p10 = scmp.eq.s32.totalorder %s2976_s19, 1 }
  0x72   : > { %s3532_s24 = smov (%p51_p4, %s49_s24), 0  ;;  %p2550_p11 = scmp.lt.s32.totalorder %s2872_s18, 2 }
  0x73   : > { %3506 = sst [smem:[#allocation24_spill]] %s3532_s24  ;;  %p3095_p6 = por %p66_p13, %p65_p8 }
  0x74   : > { %p3101_p3 = por %p3508_p10, %p65_p8  ;;  %s53_s16 = ssub.s32 %s2868_s17, %s3532_s24 }
  0x75   : > { %p56_p5 = scmp.eq.s32.totalorder %s53_s16, 0  ;;  %s373_s11 = sand.u32 1, %s2860_s15  }
  0x76   : > { %s3509_s13 = scalar_select %p3101_p3, 1, 0 }
  0x77   : > { %s3109_s12 = sshll.u32 %s373_s11, 4  ;;  %s2221_s27 = sshll.u32 %s2868_s17, 8 }
  0x78   : > { %s3112_s20 = scalar_select %p56_p5, %s2860_s15, %s58_s26  }
  0x79   : > { %s3118_s28 = scalar_lea.hbm %s3467_s0, %s2221_s27  ;;  %s377_s30 = scalar_lea.vmem [#allocation6], %s3109_s12 }
  0x7a   : > { %s387_s10 = sshll.u32 %s377_s30, 4  ;;  %p3125_p7 = pnand %p2550_p11, %p3095_p6  ;;  %s3121_s10 = int_to_ptr.vmem [resolvable:$true] %s387_s10 }
  0x7b   : > { %s3132_s16 = scalar_lea.hbm %s3468_s1, %s2221_s27  ;;  %s394_s29 = sand.u32 1, %s2872_s18  }
  0x7c   : > { %s374_s25 = scalar_lea.sflag [#allocation7], %s373_s11  ;;  %s2718_s6 = scalar_lea.hbm %s3118_s28, 256 }
  0x7d   : > { %p2719_p9 = scmp.ne.s32.totalorder %s3118_s28, %s2718_s6  ;;  %p2720_p12 = pneg %p3125_p7 }
  0x7e   : > { %s2723_s8 = scalar_lea.hbm %s3467_s0, 512  ;;  %p2724_p2 = scmp.lt.u32.totalorder %s3118_s28, %s3467_s0 }
  0x7f   : > { %p2721_p0 = pnand %p2720_p12, %p2719_p9  ;;  %p2725_p4 = scmp.lt.u32.totalorder %s2723_s8, %s2718_s6 }
  0x80   : > { %p2727_p13 = scmp.lt.u32.totalorder %s2718_s6, %s3118_s28 }
  0x81   : > { %p2722_p1 = pneg %p2721_p0  ;;  %p2726_p8 = por %p2725_p4, %p2724_p2 }
  0x83   : > { %p2728_p6 = por %p2727_p13, %p2726_p8 }
  0x85   : > { %p2729_p10 = pnand %p2728_p6, %p2722_p1 }
  0x87   : > { %2732 = shalt.err (!%p2729_p10)
}
  0x88   : > { %s2733_s11 = scalar_lea.vmem %s3121_s10, 256  ;;  %s2881_s27 = smov [#allocation6]  }
  0x89   : > { %p2734_p11 = scmp.ne.s32.totalorder %s3121_s10, %s2733_s11  ;;  %s2738_s26 = sshll.u32 %s2881_s27, 4  ;;  %s2739_s26 = int_to_ptr.vmem [resolvable:$false] %s2738_s26 }
  0x8a   : > { %s2740_s24 = scalar_lea.vmem %s2739_s26, 512  ;;  %p2741_p0 = scmp.lt.s32.totalorder %s3121_s10, %s2739_s26 }
  0x8b   : > { %p2736_p5 = pnand %p2734_p11, %p2720_p12  ;;  %p2742_p2 = scmp.lt.s32.totalorder %s2740_s24, %s2733_s11 }
  0x8d   : > { %p2737_p9 = pneg %p2736_p5  ;;  %p2743_p4 = por %p2742_p2, %p2741_p0 }
  0x8f   : > { %p2744_p8 = pnand %p2743_p4, %p2737_p9 }
  0x91   : > { %2747 = shalt.err (!%p2744_p8)
}
  0x92   : > { %2539 = dma.hbm_to_vmem [thread:$0]  (!%p3125_p7), %s3118_s28, 256, %s3121_s10, %s374_s25  }
  0x93   : > { %s398_s6 = scalar_lea.vmem [#allocation9], %s3109_s12  ;;  %s395_s9 = scalar_lea.sflag [#allocation10], %s394_s29 }
  0x94   : > { %s408_s8 = sshll.u32 %s398_s6, 4  ;;  %s2748_s30 = scalar_lea.hbm %s3132_s16, 256  ;;  %s409_s8 = int_to_ptr.vmem [resolvable:$true] %s408_s8 }
  0x95   : > { %p2749_p1 = scmp.ne.s32.totalorder %s3132_s16, %s2748_s30  ;;  %s2753_s27 = scalar_lea.hbm %s3468_s1, 512 }
  0x96   : > { %p2754_p10 = scmp.lt.u32.totalorder %s3132_s16, %s3468_s1  ;;  %p2755_p11 = scmp.lt.u32.totalorder %s2753_s27, %s2748_s30 }
  0x97   : > { %p2751_p13 = pnand %p2749_p1, %p2720_p12  ;;  %p2757_p9 = scmp.lt.u32.totalorder %s2748_s30, %s3132_s16 }
  0x98   : > { %p2756_p5 = por %p2755_p11, %p2754_p10 }
  0x99   : > { %p2752_p6 = pneg %p2751_p13 }
  0x9a   : > { %p2758_p0 = por %p2757_p9, %p2756_p5 }
  0x9c   : > { %p2759_p2 = pnand %p2758_p0, %p2752_p6 }
  0x9e   : > { %2762 = shalt.err (!%p2759_p2)
}
  0x9f   : > { %s2763_s12 = scalar_lea.vmem %s409_s8, 256  ;;  %s2882_s28 = smov [#allocation9]  }
  0xa0   : > { %p2764_p4 = scmp.ne.s32.totalorder %s409_s8, %s2763_s12  ;;  %s2768_s10 = sshll.u32 %s2882_s28, 4  ;;  %s2769_s10 = int_to_ptr.vmem [resolvable:$false] %s2768_s10 }
  0xa1   : > { %s2770_s29 = scalar_lea.vmem %s2769_s10, 512  ;;  %p2771_p13 = scmp.lt.s32.totalorder %s409_s8, %s2769_s10 }
  0xa2   : > { %p2766_p8 = pnand %p2764_p4, %p2720_p12  ;;  %p2772_p3 = scmp.lt.s32.totalorder %s2770_s29, %s2763_s12 }
  0xa4   : > { %p2767_p1 = pneg %p2766_p8  ;;  %p2773_p10 = por %p2772_p3, %p2771_p13 }
  0xa6   : > { %p2774_p11 = pnand %p2773_p10, %p2767_p1 }
  0xa8   : > { %2777 = shalt.err (!%p2774_p11)
}
  0xa9   : > { %2542 = dma.hbm_to_vmem [thread:$0]  (!%p3125_p7), %s3132_s16, 256, %s409_s8, %s395_s9  }
  0xaa   : > { %p3511_p6 = scmp.ne.s32.totalorder %s3498_s23, 0 }
  0xab   : > { %s3185_s25 = sand.u32 (!%p3511_p6), 1, %s2856_s14   ;;  %p3512_p3 = scmp.ne.s32.totalorder (!%p3511_p6), %s3495_s21, 0 }
  0xac   : > { %417 = sbr.rel (%p3511_p6) target bundleno = 1794 (0x702), region = 60  ;;  %s3188_s6 = sshll.u32 (!%p3511_p6), %s3185_s25, 4 }
  0xad   : > { %s420_s30 = scalar_lea.sflag (!%p3511_p6), [#allocation7], %s3185_s25  ;;  %s3192_s22 = scalar_lea.vmem (!%p3511_p6), [#allocation6], %s3188_s6 }
  0xb3   : > { %2831 = dma.done.wait (%p3512_p3), %s420_s30, 256  }
  0xb4   : > { %2833 = vsyncadd (%p3512_p3), %s420_s30, 4294967040  ;;  %s428_s23 = sand.u32 1, %s2976_s19   ;;  %s432_s16 = scalar_lea.vmem [#allocation9], %s3188_s6 }
  0xb5   : > { %s429_s4 = scalar_lea.sflag [#allocation10], %s428_s23 }
  0xb6   : > { %2835 = dma.done.wait (%p3512_p3), %s429_s4, 256  }
  0xb7   : > { %2837 = vsyncadd (%p3512_p3), %s429_s4, 4294967040  ;;  %p3513_p7 = scmp.eq.s32.totalorder %s2976_s19, 0 }
  0xb9   : > { %2839 = dma.done.wait (%p3513_p7), [#allocation10], 8192   ;;  %p3514_p12 = pmov %p3513_p7 }
  0xba   : > { %p3515_p5 = pmov %p3513_p7 }
  0xbb   : > { %2841 = vsyncadd (%p3514_p12), [#allocation10], 4294959104 }
  0xbc   : > { %2843 = dma.done.wait (%p3515_p5), [#allocation13], 24576   ;;  %p3516_p9 = pmov %p3515_p5 }
  0xbd   : > { %v3212_v0 = vld [vmem:[%s432_s16] sm:$0xff]  ;;  %v3214_v1 = vld [vmem:[%s432_s16 + $0x8] sm:$0xff]  ;;  %vm2884_vm0 = vmmov 0   ;;  %vm804_vm1 = vcmask 7168   ;;  %vm1526_vm2 = vcmask 64512   ;;  %s3517_s30 = sld [smem:[#allocation22_spill]] }
  0xbe   : > { %2845 = vsyncadd (%p3516_p9), [#allocation13], 4294942720  ;;  %v3217_v2 = vld [vmem:[%s3192_s22] sm:$0xff]  ;;  %v815_v3 = vadd.f32 %v3214_v1, %v3212_v0  ;;  %v3222_v4 = vld [vmem:[%s3192_s22 + $0x8] sm:$0xff]  ;;  %s3518_s16 = sld [smem:[#allocation28_spill]]  ;;  %s485_s21 = scalar_lea.vmem [#allocation15], %s3188_s6 }
  0xbf   : > { %v494_v5 = vadd.f32 %v3222_v4, %v3217_v2  ;;  %v859_v6 = vld [vmem:[#allocation12 + $0x8] sm:$0xff]  ;;  %v858_v8 = vld [vmem:[#allocation12] sm:$0xff]  ;;  %v540_v12 = vld [vmem:[#allocation11 + $0x18] sm:$0xff]  ;;  %s2045_s8 = sshll.u32 %s485_s21, 4  ;;  %s3519_s27 = sld [smem:[#allocation29_spill]]  ;;  %s3420_s8 = int_to_ptr.vmem [resolvable:$true] %s2045_s8 }
  0xc0   : > { %816 = vadd.xlane.f32.xlu0 %v815_v3  ;;  %v863_v7 = vld [vmem:[#allocation12 + $0x28] sm:$0xff]  ;;  %v862_v10 = vld [vmem:[#allocation12 + $0x20] sm:$0xff]  ;;  %v539_v16 = vld [vmem:[#allocation11 + $0x10] sm:$0xff]  ;;  %s2029_s24 = scalar_lea.sflag [#allocation8], %s3185_s25  ;;  %p3520_p2 = scmp.ne.s32.totalorder %s3509_s13, 0 }
  0xc1   : > { %v2316_v9 = vpack.c.bf16 %v863_v7, %v859_v6  ;;  %v538_v11 = vld [vmem:[#allocation11 + $0x8] sm:$0xff]  ;;  %v2318_v13 = vpack.c.bf16 %v862_v10, %v858_v8  ;;  %v537_v15 = vld [vmem:[#allocation11] sm:$0xff]  ;;  %v544_v25 = vld [vmem:[#allocation11 + $0x38] sm:$0xff]  ;;  %s2889_s6 = smov [#allocation15]  }
  0xc2   : > { %v2252_v14 = vpack.c.bf16 %v540_v12, %v538_v11  ;;  %v867_v17 = vld [vmem:[#allocation12 + $0x48] sm:$0xff]  ;;  %v2254_v18 = vpack.c.bf16 %v539_v16, %v537_v15  ;;  %v866_v20 = vld [vmem:[#allocation12 + $0x40] sm:$0xff]  ;;  %v543_v28 = vld [vmem:[#allocation11 + $0x30] sm:$0xff]  ;;  %s2782_s12 = sshll.u32 %s2889_s6, 4  ;;  %s2783_s12 = int_to_ptr.vmem [resolvable:$false] %s2782_s12 }
  0xc3   : > { %2317 = vmatprep.subr.bf16.mxu1 %v2316_v9  ;;  %v871_v19 = vld [vmem:[#allocation12 + $0x68] sm:$0xff]  ;;  %v870_v21 = vld [vmem:[#allocation12 + $0x60] sm:$0xff]  ;;  %v548_v36 = vld [vmem:[#allocation11 + $0x58] sm:$0xff]  ;;  %s2223_s19 = sshll.u32 %s3517_s30, 8  ;;  %s2784_s28 = scalar_lea.vmem %s2783_s12, 512 }
  0xc4   : > { %495 = vadd.xlane.f32.xlu0 %v494_v5  ;;  %2319 = vmatpush1.bf16.msra.mxu1 %v2318_v13  ;;  %v2320_v22 = vpack.c.bf16 %v871_v19, %v867_v17  ;;  %v2322_v23 = vpack.c.bf16 %v870_v21, %v866_v20  ;;  %v542_v24 = vld [vmem:[#allocation11 + $0x28] sm:$0xff]  ;;  %v541_v26 = vld [vmem:[#allocation11 + $0x20] sm:$0xff]  ;;  %v547_v38 = vld [vmem:[#allocation11 + $0x50] sm:$0xff]  ;;  %p2785_p1 = scmp.lt.s32.totalorder %s3420_s8, %s2783_s12 }
  0xc5   : > { %2253 = vmatprep.subr.bf16.mxu0 %v2252_v14  ;;  %v2256_v27 = vpack.c.bf16 %v544_v25, %v542_v24  ;;  %v875_v29 = vld [vmem:[#allocation12 + $0x88] sm:$0xff]  ;;  %v2258_v31 = vpack.c.bf16 %v543_v28, %v541_v26  ;;  %v874_v33 = vld [vmem:[#allocation12 + $0x80] sm:$0xff]  ;;  %v552_v48 = vld [vmem:[#allocation11 + $0x78] sm:$0xff]  ;;  %s3418_s26 = scalar_lea.hbm %s3519_s27, %s2223_s19 }
  0xc6   : > { %2255 = vmatpush1.bf16.msra.mxu0 %v2254_v18  ;;  %v879_v30 = vld [vmem:[#allocation12 + $0xa8] sm:$0xff]  ;;  %2321 = vmatprep.subr.bf16.mxu1 %v2320_v22  ;;  %v878_v34 = vld [vmem:[#allocation12 + $0xa0] sm:$0xff]  ;;  %v551_v51 = vld [vmem:[#allocation11 + $0x70] sm:$0xff] }
  0xc7   : > { %v2324_v32 = vpack.c.bf16 %v879_v30, %v875_v29  ;;  %v546_v35 = vld [vmem:[#allocation11 + $0x48] sm:$0xff]  ;;  %2257 = vmatprep.subr.bf16.mxu0 %v2256_v27  ;;  %v545_v37 = vld [vmem:[#allocation11 + $0x40] sm:$0xff]  ;;  %v2326_v39 = vpack.c.bf16 %v878_v34, %v874_v33  ;;  %v556_v56 = vld [vmem:[#allocation11 + $0x98] sm:$0xff] }
  0xc8   : > { %2323 = vmatpush1.bf16.msra.mxu1 %v2322_v23  ;;  %v2260_v40 = vpack.c.bf16 %v548_v36, %v546_v35  ;;  %v883_v41 = vld [vmem:[#allocation12 + $0xc8] sm:$0xff]  ;;  %v882_v43 = vld [vmem:[#allocation12 + $0xc0] sm:$0xff]  ;;  %v2262_v44 = vpack.c.bf16 %v547_v38, %v545_v37  ;;  %v555_v63 = vld [vmem:[#allocation11 + $0x90] sm:$0xff] }
  0xc9   : > { %v887_v42 = vld [vmem:[#allocation12 + $0xe8] sm:$0xff]  ;;  %2325 = vmatprep.subr.bf16.mxu1 %v2324_v32  ;;  %v886_v46 = vld [vmem:[#allocation12 + $0xe0] sm:$0xff]  ;;  %v560_v7 = vld [vmem:[#allocation11 + $0xb8] sm:$0xff] }
  0xca   : > { %2259 = vmatpush1.bf16.msra.mxu0 %v2258_v31  ;;  %v2328_v45 = vpack.c.bf16 %v887_v42, %v883_v41  ;;  %v550_v47 = vld [vmem:[#allocation11 + $0x68] sm:$0xff]  ;;  %v549_v50 = vld [vmem:[#allocation11 + $0x60] sm:$0xff]  ;;  %v2330_v54 = vpack.c.bf16 %v886_v46, %v882_v43  ;;  %v559_v15 = vld [vmem:[#allocation11 + $0xb0] sm:$0xff] }
  0xcb   : > { %2261 = vmatprep.subr.bf16.mxu0 %v2260_v40  ;;  %v2264_v49 = vpack.c.bf16 %v552_v48, %v550_v47  ;;  %v891_v52 = vld [vmem:[#allocation12 + $0x108] sm:$0xff]  ;;  %v2266_v57 = vpack.c.bf16 %v551_v51, %v549_v50  ;;  %v890_v59 = vld [vmem:[#allocation12 + $0x100] sm:$0xff]  ;;  %v564_v19 = vld [vmem:[#allocation11 + $0xd8] sm:$0xff] }
  0xcc   : > { %v895_v53 = vld [vmem:[#allocation12 + $0x128] sm:$0xff]  ;;  %2327 = vmatpush1.bf16.msra.mxu1 %v2326_v39  ;;  %v894_v60 = vld [vmem:[#allocation12 + $0x120] sm:$0xff]  ;;  %v563_v27 = vld [vmem:[#allocation11 + $0xd0] sm:$0xff] }
  0xcd   : > { %v554_v55 = vld [vmem:[#allocation11 + $0x88] sm:$0xff]  ;;  %2329 = vmatprep.subr.bf16.mxu1 %v2328_v45  ;;  %v2332_v58 = vpack.c.bf16 %v895_v53, %v891_v52  ;;  %v553_v61 = vld [vmem:[#allocation11 + $0x80] sm:$0xff]  ;;  %v2334_v8 = vpack.c.bf16 %v894_v60, %v890_v59  ;;  %v568_v31 = vld [vmem:[#allocation11 + $0xf8] sm:$0xff] }
  0xce   : > { %2263 = vmatpush1.bf16.msra.mxu0 %v2262_v44  ;;  %v2268_v62 = vpack.c.bf16 %v556_v56, %v554_v55  ;;  %v899_v3 = vld [vmem:[#allocation12 + $0x148] sm:$0xff]  ;;  %v2270_v9 = vpack.c.bf16 %v555_v63, %v553_v61  ;;  %v898_v11 = vld [vmem:[#allocation12 + $0x140] sm:$0xff]  ;;  %v567_v39 = vld [vmem:[#allocation11 + $0xf0] sm:$0xff] }
  0xcf   : > { %2265 = vmatprep.subr.bf16.mxu0 %v2264_v49  ;;  %v903_v5 = vld [vmem:[#allocation12 + $0x168] sm:$0xff]  ;;  %v902_v12 = vld [vmem:[#allocation12 + $0x160] sm:$0xff]  ;;  %v572_v43 = vld [vmem:[#allocation11 + $0x118] sm:$0xff] }
  0xd0   : > { %v558_v6 = vld [vmem:[#allocation11 + $0xa8] sm:$0xff]  ;;  %2331 = vmatpush1.bf16.msra.mxu1 %v2330_v54  ;;  %v2336_v10 = vpack.c.bf16 %v903_v5, %v899_v3  ;;  %v557_v13 = vld [vmem:[#allocation11 + $0xa0] sm:$0xff]  ;;  %v2338_v20 = vpack.c.bf16 %v902_v12, %v898_v11  ;;  %v571_v51 = vld [vmem:[#allocation11 + $0x110] sm:$0xff] }
  0xd1   : > { %2333 = vmatprep.subr.bf16.mxu1 %v2332_v58  ;;  %v2272_v14 = vpack.c.bf16 %v560_v7, %v558_v6  ;;  %v907_v16 = vld [vmem:[#allocation12 + $0x188] sm:$0xff]  ;;  %v2274_v21 = vpack.c.bf16 %v559_v15, %v557_v13  ;;  %v906_v23 = vld [vmem:[#allocation12 + $0x180] sm:$0xff]  ;;  %v576_v55 = vld [vmem:[#allocation11 + $0x138] sm:$0xff] }
  0xd2   : > { %2267 = vmatpush1.bf16.msra.mxu0 %v2266_v57  ;;  %v911_v17 = vld [vmem:[#allocation12 + $0x1a8] sm:$0xff]  ;;  %v910_v24 = vld [vmem:[#allocation12 + $0x1a0] sm:$0xff]  ;;  %v575_v63 = vld [vmem:[#allocation11 + $0x130] sm:$0xff] }
  0xd3   : > { %2269 = vmatprep.subr.bf16.mxu0 %v2268_v62  ;;  %v562_v18 = vld [vmem:[#allocation11 + $0xc8] sm:$0xff]  ;;  %v2340_v22 = vpack.c.bf16 %v911_v17, %v907_v16  ;;  %v561_v25 = vld [vmem:[#allocation11 + $0xc0] sm:$0xff]  ;;  %v2342_v32 = vpack.c.bf16 %v910_v24, %v906_v23 }
  0xd4   : > { %2335 = vmatpush1.bf16.msra.mxu1 %v2334_v8  ;;  %v2276_v26 = vpack.c.bf16 %v564_v19, %v562_v18  ;;  %v915_v28 = vld [vmem:[#allocation12 + $0x1c8] sm:$0xff]  ;;  %v2278_v33 = vpack.c.bf16 %v563_v27, %v561_v25  ;;  %v914_v35 = vld [vmem:[#allocation12 + $0x1c0] sm:$0xff]  ;;  %v580_v25 = vld [vmem:[#allocation11 + $0x158] sm:$0xff] }
  0xd5   : > { %2337 = vmatprep.subr.bf16.mxu1 %v2336_v10  ;;  %v919_v29 = vld [vmem:[#allocation12 + $0x1e8] sm:$0xff]  ;;  %v918_v36 = vld [vmem:[#allocation12 + $0x1e0] sm:$0xff] }
  0xd6   : > { %2271 = vmatpush1.bf16.msra.mxu0 %v2270_v9  ;;  %v566_v30 = vld [vmem:[#allocation11 + $0xe8] sm:$0xff]  ;;  %v2344_v34 = vpack.c.bf16 %v919_v29, %v915_v28  ;;  %v565_v37 = vld [vmem:[#allocation11 + $0xe0] sm:$0xff]  ;;  %v2346_v44 = vpack.c.bf16 %v918_v36, %v914_v35  ;;  %v579_v28 = vld [vmem:[#allocation11 + $0x150] sm:$0xff] }
  0xd7   : > { %2273 = vmatprep.subr.bf16.mxu0 %v2272_v14  ;;  %v2280_v38 = vpack.c.bf16 %v568_v31, %v566_v30  ;;  %v923_v40 = vld [vmem:[#allocation12 + $0x208] sm:$0xff]  ;;  %v2282_v45 = vpack.c.bf16 %v567_v39, %v565_v37  ;;  %v922_v47 = vld [vmem:[#allocation12 + $0x200] sm:$0xff]  ;;  %v584_v35 = vld [vmem:[#allocation11 + $0x178] sm:$0xff] }
  0xd8   : > { %2339 = vmatpush1.bf16.msra.mxu1 %v2338_v20  ;;  %v927_v41 = vld [vmem:[#allocation12 + $0x228] sm:$0xff]  ;;  %v926_v48 = vld [vmem:[#allocation12 + $0x220] sm:$0xff] }
  0xd9   : > { %2341 = vmatprep.subr.bf16.mxu1 %v2340_v22  ;;  %v570_v42 = vld [vmem:[#allocation11 + $0x108] sm:$0xff]  ;;  %v2348_v46 = vpack.c.bf16 %v927_v41, %v923_v40  ;;  %v569_v49 = vld [vmem:[#allocation11 + $0x100] sm:$0xff]  ;;  %v2350_v56 = vpack.c.bf16 %v926_v48, %v922_v47  ;;  %v588_v47 = vld [vmem:[#allocation11 + $0x198] sm:$0xff] }
  0xda   : > { %2275 = vmatpush1.bf16.msra.mxu0 %v2274_v21  ;;  %v2284_v50 = vpack.c.bf16 %v572_v43, %v570_v42  ;;  %v931_v52 = vld [vmem:[#allocation12 + $0x248] sm:$0xff]  ;;  %v2286_v57 = vpack.c.bf16 %v571_v51, %v569_v49  ;;  %v930_v59 = vld [vmem:[#allocation12 + $0x240] sm:$0xff] }
  0xdb   : > { %2277 = vmatprep.subr.bf16.mxu0 %v2276_v26  ;;  %v935_v53 = vld [vmem:[#allocation12 + $0x268] sm:$0xff]  ;;  %v934_v60 = vld [vmem:[#allocation12 + $0x260] sm:$0xff] }
  0xdc   : > { %2343 = vmatpush1.bf16.msra.mxu1 %v2342_v32  ;;  %v574_v54 = vld [vmem:[#allocation11 + $0x128] sm:$0xff]  ;;  %v2352_v58 = vpack.c.bf16 %v935_v53, %v931_v52  ;;  %v573_v61 = vld [vmem:[#allocation11 + $0x120] sm:$0xff]  ;;  %v2354_v6 = vpack.c.bf16 %v934_v60, %v930_v59  ;;  %v592_v59 = vld [vmem:[#allocation11 + $0x1b8] sm:$0xff] }
  0xdd   : > { %2345 = vmatprep.subr.bf16.mxu1 %v2344_v34  ;;  %v2288_v62 = vpack.c.bf16 %v576_v55, %v574_v54  ;;  %v939_v3 = vld [vmem:[#allocation12 + $0x288] sm:$0xff]  ;;  %v2290_v7 = vpack.c.bf16 %v575_v63, %v573_v61  ;;  %v938_v9 = vld [vmem:[#allocation12 + $0x280] sm:$0xff] }
  0xde   : > { %2279 = vmatpush1.bf16.msra.mxu0 %v2278_v33  ;;  %v943_v5 = vld [vmem:[#allocation12 + $0x2a8] sm:$0xff]  ;;  %v942_v10 = vld [vmem:[#allocation12 + $0x2a0] sm:$0xff] }
  0xdf   : > { %2281 = vmatprep.subr.bf16.mxu0 %v2280_v38  ;;  %v2356_v8 = vpack.c.bf16 %v943_v5, %v939_v3  ;;  %v2358_v11 = vpack.c.bf16 %v942_v10, %v938_v9  ;;  %v578_v24 = vld [vmem:[#allocation11 + $0x148] sm:$0xff]  ;;  %v577_v27 = vld [vmem:[#allocation11 + $0x140] sm:$0xff]  ;;  %v583_v38 = vld [vmem:[#allocation11 + $0x170] sm:$0xff] }
  0xe0   : > { %2347 = vmatpush1.bf16.msra.mxu1 %v2346_v44  ;;  %v2292_v26 = vpack.c.bf16 %v580_v25, %v578_v24  ;;  %v2294_v29 = vpack.c.bf16 %v579_v28, %v577_v27  ;;  %v951_v30 = vld [vmem:[#allocation12 + $0x2e8] sm:$0xff]  ;;  %v950_v31 = vld [vmem:[#allocation12 + $0x2e0] sm:$0xff]  ;;  %v600_v24 = vld [vmem:[#allocation11 + $0x1f8] sm:$0xff] }
  0xe1   : > { %2349 = vmatprep.subr.bf16.mxu1 %v2348_v46  ;;  %v582_v34 = vld [vmem:[#allocation11 + $0x168] sm:$0xff]  ;;  %v581_v37 = vld [vmem:[#allocation11 + $0x160] sm:$0xff]  ;;  %v599_v28 = vld [vmem:[#allocation11 + $0x1f0] sm:$0xff] }
  0xe2   : > { %2283 = vmatpush1.bf16.msra.mxu0 %v2282_v45  ;;  %v2296_v36 = vpack.c.bf16 %v584_v35, %v582_v34  ;;  %v955_v39 = vld [vmem:[#allocation12 + $0x308] sm:$0xff]  ;;  %v2298_v40 = vpack.c.bf16 %v583_v38, %v581_v37  ;;  %v954_v42 = vld [vmem:[#allocation12 + $0x300] sm:$0xff]  ;;  %v512_v34 = vlaneseq }
  0xe3   : > { %2285 = vmatprep.subr.bf16.mxu0 %v2284_v50  ;;  %v959_v41 = vld [vmem:[#allocation12 + $0x328] sm:$0xff]  ;;  %v958_v43 = vld [vmem:[#allocation12 + $0x320] sm:$0xff]  ;;  %v587_v50 = vld [vmem:[#allocation11 + $0x190] sm:$0xff] }
  0xe4   : > { %2351 = vmatpush1.bf16.msra.mxu1 %v2350_v56  ;;  %v2364_v44 = vpack.c.bf16 %v959_v41, %v955_v39  ;;  %v2366_v45 = vpack.c.bf16 %v958_v43, %v954_v42  ;;  %v586_v46 = vld [vmem:[#allocation11 + $0x188] sm:$0xff]  ;;  %v585_v49 = vld [vmem:[#allocation11 + $0x180] sm:$0xff]  ;;  %v3247_v38 = vshrl.u32 %v512_v34, 7 }
  0xe5   : > { %2353 = vmatprep.subr.bf16.mxu1 %v2352_v58  ;;  %v2300_v48 = vpack.c.bf16 %v588_v47, %v586_v46  ;;  %v963_v51 = vld [vmem:[#allocation12 + $0x348] sm:$0xff]  ;;  %v2302_v52 = vpack.c.bf16 %v587_v50, %v585_v49  ;;  %v962_v54 = vld [vmem:[#allocation12 + $0x340] sm:$0xff] }
  0xe6   : > { %2287 = vmatpush1.bf16.msra.mxu0 %v2286_v57  ;;  %v967_v53 = vld [vmem:[#allocation12 + $0x368] sm:$0xff]  ;;  %v966_v55 = vld [vmem:[#allocation12 + $0x360] sm:$0xff]  ;;  %v3253_v41 = vsub.s32 1, %v3247_v38 }
  0xe7   : > { %2289 = vmatprep.subr.bf16.mxu0 %v2288_v62  ;;  %v2368_v56 = vpack.c.bf16 %v967_v53, %v963_v51  ;;  %v2370_v57 = vpack.c.bf16 %v966_v55, %v962_v54  ;;  %v590_v58 = vld [vmem:[#allocation11 + $0x1a8] sm:$0xff]  ;;  %v589_v60 = vld [vmem:[#allocation11 + $0x1a0] sm:$0xff]  ;;  %v591_v62 = vld [vmem:[#allocation11 + $0x1b0] sm:$0xff] }
  0xe8   : > { %2355 = vmatpush1.bf16.msra.mxu1 %v2354_v6  ;;  %v2304_v61 = vpack.c.bf16 %v592_v59, %v590_v58  ;;  %v971_v63 = vld [vmem:[#allocation12 + $0x388] sm:$0xff]  ;;  %v2306_v5 = vpack.c.bf16 %v591_v62, %v589_v60  ;;  %v597_v27 = vld [vmem:[#allocation11 + $0x1e0] sm:$0xff]  ;;  %v860_v62 = vld [vmem:[#allocation12 + $0x10] sm:$0xff] }
  0xe9   : > { %2357 = vmatprep.subr.bf16.mxu1 %v2356_v8  ;;  %v975_v3 = vld [vmem:[#allocation12 + $0x3a8] sm:$0xff]  ;;  %v974_v8 = vld [vmem:[#allocation12 + $0x3a0] sm:$0xff] }
  0xea   : > { %2291 = vmatpush1.bf16.msra.mxu0 %v2290_v7  ;;  %v2372_v6 = vpack.c.bf16 %v975_v3, %v971_v63  ;;  %v970_v7 = vld [vmem:[#allocation12 + $0x380] sm:$0xff]  ;;  %v594_v9 = vld [vmem:[#allocation11 + $0x1c8] sm:$0xff]  ;;  %v864_v63 = vld [vmem:[#allocation12 + $0x30] sm:$0xff] }
  0xeb   : > { %2293 = vmatprep.subr.bf16.mxu0 %v2292_v26  ;;  %v2374_v10 = vpack.c.bf16 %v974_v8, %v970_v7  ;;  %v813_v42 = vld [vmem:[%s3469_s2] sm:$0x3]  ;;  %v873_v7 = vld [vmem:[#allocation12 + $0x78] sm:$0xff] }
  0xec   : > { %2359 = vmatpush1.bf16.msra.mxu1 %v2358_v11  ;;  %v596_v11 = vld [vmem:[#allocation11 + $0x1d8] sm:$0xff]  ;;  %v814_v43 = vld [vmem:[%s3470_s3] sm:$0x3] }
  0xed   : > { %v492_v47 = vld [vmem:[%s3469_s2] sm:$0x3]  ;;  %v853_v50 = vrot.slane %v814_v43, %v3253_v41 }
  0xee   : > { %2295 = vmatpush1.bf16.msra.mxu0 %v2294_v29  ;;  %v861_v29 = vld [vmem:[#allocation12 + $0x18] sm:$0xff] }
  0xef   : > { %2297 = vmatprep.subr.bf16.mxu0 %v2296_v36 }
  0xf2   : > { %2299 = vmatpush1.bf16.msra.mxu0 %v2298_v40  ;;  %v3250_v40 = vsub.s32 0, %v3247_v38 }
  0xf3   : > { %2301 = vmatprep.subr.bf16.mxu0 %v2300_v48 }
  0xf4   : > { %v849_v49 = vrot.slane %v814_v43, %v3250_v40  ;;  %v515_v55 = vrot.slane %v492_v47, %v3250_v40 }
  0xf6   : > { %2303 = vmatpush1.bf16.msra.mxu0 %v2302_v52  ;;  %v493_v52 = vld [vmem:[%s3470_s3] sm:$0x3] }
  0xf7   : > { %2305 = vmatprep.subr.bf16.mxu0 %v2304_v61  ;;  %v528_v58 = vrot.slane %v493_v52, %v3250_v40 }
  0xfa   : > { %2307 = vmatpush1.bf16.msra.mxu0 %v2306_v5 }
 0x14d   : > { %v817_v12 = vpop.xlane.xlu0 %816 }
 0x14e   : > { %v819_v13 = vmul.f32 0.00390625, %v817_v12  ;;  %v593_v12 = vld [vmem:[#allocation11 + $0x1c0] sm:$0xff] }
 0x150   : > { %v3227_v14 = vsub.f32 %v3212_v0, %v819_v13  ;;  %v3230_v15 = vsub.f32 %v3214_v1, %v819_v13  ;;  %v595_v13 = vld [vmem:[#allocation11 + $0x1d0] sm:$0xff] }
 0x151   : > { %v496_v16 = vpop.xlane.xlu0 %495 }
 0x152   : > { %v498_v17 = vmul.f32 0.00390625, %v496_v16  ;;  %v822_v18 = vmul.f32 %v3227_v14, %v3227_v14  ;;  %v823_v19 = vmul.f32 %v3230_v15, %v3230_v15  ;;  %v2308_v16 = vpack.c.bf16 %v596_v11, %v594_v9 }
 0x154   : > { %v3237_v20 = vsub.f32 %v3217_v2, %v498_v17  ;;  %v3240_v21 = vsub.f32 %v3222_v4, %v498_v17  ;;  %v824_v22 = vadd.f32 %v823_v19, %v822_v18  ;;  %v947_v2 = vld [vmem:[#allocation12 + $0x2c8] sm:$0xff]  ;;  %v946_v4 = vld [vmem:[#allocation12 + $0x2c0] sm:$0xff]  ;;  %2309 = vmatprep.subr.bf16.mxu0 %v2308_v16  ;;  %v877_v16 = vld [vmem:[#allocation12 + $0x98] sm:$0xff] }
 0x155   : > { %v2360_v32 = vpack.c.bf16 %v951_v30, %v947_v2  ;;  %v2362_v33 = vpack.c.bf16 %v950_v31, %v946_v4  ;;  %v979_v17 = vld [vmem:[#allocation12 + $0x3c8] sm:$0xff]  ;;  %v978_v19 = vld [vmem:[#allocation12 + $0x3c0] sm:$0xff]  ;;  %v2314_v2 = vpack.c.bf16 %v599_v28, %v597_v27  ;;  %v865_v30 = vld [vmem:[#allocation12 + $0x38] sm:$0xff]  ;;  %v2883_v31 = vmov 0.0  }
 0x156   : > { %825 = vadd.xlane.f32.xlu1 %v824_v22  ;;  %v501_v0 = vmul.f32 %v3237_v20, %v3237_v20  ;;  %v502_v1 = vmul.f32 %v3240_v21, %v3240_v21  ;;  %v983_v18 = vld [vmem:[#allocation12 + $0x3e8] sm:$0xff]  ;;  %v2310_v22 = vpack.c.bf16 %v595_v13, %v593_v12  ;;  %v2380_v4 = vpack.c.bf16 %v865_v30, %v861_v29  ;;  %v868_v12 = vld [vmem:[#allocation12 + $0x50] sm:$0xff]  ;;  %v897_v27 = vld [vmem:[#allocation12 + $0x138] sm:$0xff] }
 0x157   : > { %2361 = vmatprep.subr.bf16.mxu1 %v2360_v32  ;;  %v872_v13 = vld [vmem:[#allocation12 + $0x70] sm:$0xff]  ;;  %807 = vst.msk [vmem:[#allocation4] sm:$0xff] %vm804_vm1, %v2883_v31  ;;  %808 = vst.msk [vmem:[#allocation4 + $0x8] sm:$0xff] %vm804_vm1, %v2883_v31 }
 0x158   : > { %v503_v23 = vadd.f32 %v502_v1, %v501_v0  ;;  %2363 = vmatpush1.bf16.msra.mxu1 %v2362_v33  ;;  %v2376_v0 = vpack.c.bf16 %v983_v18, %v979_v17  ;;  %v982_v1 = vld [vmem:[#allocation12 + $0x3e0] sm:$0xff]  ;;  %2311 = vmatpush1.bf16.msra.mxu0 %v2310_v22  ;;  %v876_v18 = vld [vmem:[#allocation12 + $0x90] sm:$0xff]  ;;  %v885_v22 = vld [vmem:[#allocation12 + $0xd8] sm:$0xff] }
 0x159   : > { %2365 = vmatprep.subr.bf16.mxu1 %v2364_v44  ;;  %v2378_v26 = vpack.c.bf16 %v982_v1, %v978_v19  ;;  %v836_v44 = vrot.slane %v813_v42, %v3250_v40  ;;  %v880_v19 = vld [vmem:[#allocation12 + $0xb0] sm:$0xff] }
 0x15a   : > { %504 = vadd.xlane.f32.xlu1 %v503_v23  ;;  %v598_v23 = vld [vmem:[#allocation11 + $0x1e8] sm:$0xff]  ;;  %v2390_v1 = vpack.c.bf16 %v880_v19, %v876_v18  ;;  %v892_v29 = vld [vmem:[#allocation12 + $0x110] sm:$0xff] }
 0x15b   : > { %v2312_v25 = vpack.c.bf16 %v600_v24, %v598_v23  ;;  %v884_v24 = vld [vmem:[#allocation12 + $0xd0] sm:$0xff] }
 0x15c   : > { %2367 = vmatpush1.bf16.msra.mxu1 %v2366_v45  ;;  %v840_v45 = vrot.slane %v813_v42, %v3253_v41  ;;  %v896_v30 = vld [vmem:[#allocation12 + $0x130] sm:$0xff] }
 0x15d   : > { %2369 = vmatprep.subr.bf16.mxu1 %v2368_v56  ;;  %2313 = vmatprep.subr.bf16.mxu0 %v2312_v25  ;;  %v519_v56 = vrot.slane %v492_v47, %v3253_v41  ;;  %v888_v25 = vld [vmem:[#allocation12 + $0xf0] sm:$0xff]  ;;  %v921_v47 = vld [vmem:[#allocation12 + $0x1f8] sm:$0xff] }
 0x15e   : > { %2315 = vmatpush1.bf16.msra.mxu0 %v2314_v2  ;;  %v2394_v28 = vpack.c.bf16 %v888_v25, %v884_v24  ;;  %v956_v19 = vld [vmem:[#allocation12 + $0x310] sm:$0xff] }
 0x15f   : > { %2381 = vmatprep.subr.bf16.mxu0 %v2380_v4  ;;  %v901_v4 = vld [vmem:[#allocation12 + $0x158] sm:$0xff]  ;;  %v964_v25 = vld [vmem:[#allocation12 + $0x350] sm:$0xff] }
 0x160   : > { %2371 = vmatpush1.bf16.msra.mxu1 %v2370_v57 }
 0x161   : > { %2373 = vmatprep.subr.bf16.mxu1 %v2372_v6  ;;  %v869_v6 = vld [vmem:[#allocation12 + $0x58] sm:$0xff] }
 0x162   : > { %v2384_v11 = vpack.c.bf16 %v873_v7, %v869_v6  ;;  %v940_v7 = vld [vmem:[#allocation12 + $0x290] sm:$0xff] }
 0x164   : > { %2375 = vmatpush1.bf16.msra.mxu1 %v2374_v10  ;;  %v2382_v10 = vpack.c.bf16 %v864_v63, %v860_v62  ;;  %v936_v62 = vld [vmem:[#allocation12 + $0x270] sm:$0xff]  ;;  %v941_v63 = vld [vmem:[#allocation12 + $0x298] sm:$0xff] }
 0x165   : > { %2377 = vmatprep.subr.bf16.mxu1 %v2376_v0  ;;  %v889_v0 = vld [vmem:[#allocation12 + $0xf8] sm:$0xff] }
 0x166   : > { %v2392_v23 = vpack.c.bf16 %v889_v0, %v885_v22  ;;  %v960_v22 = vld [vmem:[#allocation12 + $0x330] sm:$0xff]  ;;  %v965_v0 = vld [vmem:[#allocation12 + $0x358] sm:$0xff] }
 0x168   : > { %2379 = vmatpush1.bf16.msra.mxu1 %v2378_v26  ;;  %v893_v26 = vld [vmem:[#allocation12 + $0x118] sm:$0xff] }
 0x169   : > { %2242 = vmatprep.subr.mxu1 %v2883_v31  ;;  %v2396_v2 = vpack.c.bf16 %v897_v27, %v893_v26  ;;  %v968_v26 = vld [vmem:[#allocation12 + $0x370] sm:$0xff]  ;;  %v973_v27 = vld [vmem:[#allocation12 + $0x398] sm:$0xff] }
 0x1e3   : > { %v826_v32 = vpop.xlane.xlu1 %825 }
 0x1e4   : > { %v827_v33 = vmul.f32 0.00390625, %v826_v32  ;;  %v905_v32 = vld [vmem:[#allocation12 + $0x178] sm:$0xff] }
 0x1e5   : > { %v2400_v34 = vpack.c.bf16 %v905_v32, %v901_v4  ;;  %v976_v4 = vld [vmem:[#allocation12 + $0x3b0] sm:$0xff]  ;;  %v981_v32 = vld [vmem:[#allocation12 + $0x3d8] sm:$0xff] }
 0x1e6   : > { %v828_v35 = vadd.f32 1e-05, %v827_v33  ;;  %v2398_v33 = vpack.c.bf16 %v896_v30, %v892_v29  ;;  %v972_v30 = vld [vmem:[#allocation12 + $0x390] sm:$0xff] }
 0x1e7   : > { %v505_v36 = vpop.xlane.xlu1 %504 }
 0x1e8   : > { %2618 = vrsqrt.f32 %v828_v35  ;;  %v506_v37 = vmul.f32 0.00390625, %v505_v36  ;;  %v900_v35 = vld [vmem:[#allocation12 + $0x150] sm:$0xff] }
 0x1e9   : > { %v904_v36 = vld [vmem:[#allocation12 + $0x170] sm:$0xff] }
 0x1ea   : > { %v507_v39 = vadd.f32 1e-05, %v506_v37  ;;  %v909_v37 = vld [vmem:[#allocation12 + $0x198] sm:$0xff]  ;;  %v2402_v42 = vpack.c.bf16 %v904_v36, %v900_v35  ;;  %v980_v36 = vld [vmem:[#allocation12 + $0x3d0] sm:$0xff] }
 0x1ec   : > { %2620 = vrsqrt.f32 %v507_v39  ;;  %v913_v39 = vld [vmem:[#allocation12 + $0x1b8] sm:$0xff] }
 0x1ed   : > { %v2404_v43 = vpack.c.bf16 %v913_v39, %v909_v37  ;;  %v984_v37 = vld [vmem:[#allocation12 + $0x3f0] sm:$0xff] }
 0x1ee   : > { %v2442_v39 = vpack.c.bf16 %v984_v37, %v980_v36 }
 0x1f2   : > { %v2619_v46 = vpop.eup %2618 }
 0x1f3   : > { %v831_v48 = vmul.f32 %v2619_v46, %v3230_v15  ;;  %v830_v51 = vmul.f32 %v2619_v46, %v3227_v14  ;;  %v532_v15 = vrot.slane %v493_v52, %v3253_v41  ;;  %v917_v46 = vld [vmem:[#allocation12 + $0x1d8] sm:$0xff] }
 0x1f4   : > { %v925_v52 = vld [vmem:[#allocation12 + $0x218] sm:$0xff] }
 0x1f5   : > { %v844_v53 = vmul.f32 %v840_v45, %v831_v48  ;;  %v843_v54 = vmul.f32 %v836_v44, %v830_v51  ;;  %v908_v44 = vld [vmem:[#allocation12 + $0x190] sm:$0xff] }
 0x1f6   : > { %v2621_v57 = vpop.eup %2620  ;;  %v912_v45 = vld [vmem:[#allocation12 + $0x1b0] sm:$0xff] }
 0x1f7   : > { %v857_v59 = vadd.f32 %v853_v50, %v844_v53  ;;  %v3277_v60 = vadd.f32 %v849_v49, %v843_v54  ;;  %v510_v14 = vmul.f32 %v2621_v57, %v3240_v21  ;;  %v509_v61 = vmul.f32 %v2621_v57, %v3237_v20  ;;  %v881_v21 = vld [vmem:[#allocation12 + $0xb8] sm:$0xff]  ;;  %v916_v50 = vld [vmem:[#allocation12 + $0x1d0] sm:$0xff] }
 0x1f8   : > { %v2386_v20 = vpack.c.bf16 %v872_v13, %v868_v12  ;;  %v2388_v17 = vpack.c.bf16 %v881_v21, %v877_v16  ;;  %v2406_v48 = vpack.c.bf16 %v912_v45, %v908_v44  ;;  %v2408_v49 = vpack.c.bf16 %v921_v47, %v917_v46  ;;  %v920_v51 = vld [vmem:[#allocation12 + $0x1f0] sm:$0xff]  ;;  %v929_v53 = vld [vmem:[#allocation12 + $0x238] sm:$0xff]  ;;  %v3291_v44 = vld [vmem:[%s3474_s7] sm:$0xf] }
 0x1f9   : > { %1072 = vmatprep.mubr.f32.mxu1 %v857_v59  ;;  %v523_v3 = vmul.f32 %v519_v56, %v510_v14  ;;  %v522_v5 = vmul.f32 %v515_v55, %v509_v61  ;;  %v2410_v54 = vpack.c.bf16 %v920_v51, %v916_v50  ;;  %v2412_v55 = vpack.c.bf16 %v929_v53, %v925_v52  ;;  %v924_v56 = vld [vmem:[#allocation12 + $0x210] sm:$0xff]  ;;  %v957_v21 = vld [vmem:[#allocation12 + $0x318] sm:$0xff] }
 0x1fa   : > { %1073 = vmatmul.mubr.f32.vlgmr.msra.gmra.mrb[0].mxu1 %v3277_v60  ;;  %v928_v57 = vld [vmem:[#allocation12 + $0x230] sm:$0xff]  ;;  %v2886_v46 = vmov 1934713408  }
 0x1fb   : > { %v536_v8 = vadd.f32 %v532_v15, %v523_v3  ;;  %v535_v9 = vadd.f32 %v528_v58, %v522_v5  ;;  %v933_v58 = vld [vmem:[#allocation12 + $0x258] sm:$0xff]  ;;  %v932_v61 = vld [vmem:[#allocation12 + $0x250] sm:$0xff]  ;;  %2244 = vmatprep.mubr.msk.f32.mxu1 %vm2884_vm0, %v2883_v31  ;;  %v719_v47 = vunpack.c.l.s4 %v2886_v46 }
 0x1fc   : > { %v937_v15 = vld [vmem:[#allocation12 + $0x278] sm:$0xff]  ;;  %v2418_v5 = vpack.c.bf16 %v936_v62, %v932_v61  ;;  %v948_v13 = vld [vmem:[#allocation12 + $0x2d0] sm:$0xff] }
 0x1fd   : > { %677 = vmatprep.mubr.f32.mxu0 %v536_v8  ;;  %v2416_v14 = vpack.c.bf16 %v937_v15, %v933_v58  ;;  %v945_v3 = vld [vmem:[#allocation12 + $0x2b8] sm:$0xff]  ;;  %v944_v8 = vld [vmem:[#allocation12 + $0x2b0] sm:$0xff]  ;;  %v720_v51 = vunpack.c.0.s8 %v719_v47 }
 0x1fe   : > { %678 = vmatmul.mubr.f32.vlgmr.msra.gmra.mrb[0].mxu0 %v535_v9  ;;  %v2420_v6 = vpack.c.bf16 %v945_v3, %v941_v63  ;;  %v949_v9 = vld [vmem:[#allocation12 + $0x2d8] sm:$0xff]  ;;  %v952_v16 = vld [vmem:[#allocation12 + $0x2f0] sm:$0xff] }
 0x1ff   : > { %2383 = vmatpush1.bf16.msra.mxu0 %v2382_v10  ;;  %1143 = vmatprep.mubr.f32.mxu0 %v857_v59  ;;  %v2414_v59 = vpack.c.bf16 %v928_v57, %v924_v56  ;;  %v953_v10 = vld [vmem:[#allocation12 + $0x2f8] sm:$0xff] }
 0x200   : > { %2385 = vmatprep.subr.bf16.mxu0 %v2384_v11  ;;  %v2422_v11 = vpack.c.bf16 %v944_v8, %v940_v7  ;;  %v2424_v12 = vpack.c.bf16 %v953_v10, %v949_v9 }
 0x203   : > { %2387 = vmatpush1.bf16.msra.mxu0 %v2386_v20  ;;  %v961_v20 = vld [vmem:[#allocation12 + $0x338] sm:$0xff] }
 0x204   : > { %2389 = vmatprep.subr.bf16.mxu0 %v2388_v17  ;;  %v2426_v17 = vpack.c.bf16 %v952_v16, %v948_v13  ;;  %v2428_v18 = vpack.c.bf16 %v961_v20, %v957_v21 }
 0x207   : > { %2391 = vmatpush1.bf16.msra.mxu0 %v2390_v1  ;;  %v969_v1 = vld [vmem:[#allocation12 + $0x378] sm:$0xff] }
 0x208   : > { %2393 = vmatprep.subr.bf16.mxu0 %v2392_v23  ;;  %v2430_v23 = vpack.c.bf16 %v960_v22, %v956_v19  ;;  %v2432_v24 = vpack.c.bf16 %v969_v1, %v965_v0 }
 0x20b   : > { %2395 = vmatpush1.bf16.msra.mxu0 %v2394_v28  ;;  %v977_v28 = vld [vmem:[#allocation12 + $0x3b8] sm:$0xff] }
 0x20c   : > { %2397 = vmatprep.subr.bf16.mxu0 %v2396_v2  ;;  %v2434_v2 = vpack.c.bf16 %v968_v26, %v964_v25  ;;  %v2436_v29 = vpack.c.bf16 %v977_v28, %v973_v27 }
 0x20f   : > { %2399 = vmatpush1.bf16.msra.mxu0 %v2398_v33  ;;  %v985_v33 = vld [vmem:[#allocation12 + $0x3f8] sm:$0xff] }
 0x210   : > { %2401 = vmatprep.subr.bf16.mxu0 %v2400_v34  ;;  %v2438_v34 = vpack.c.bf16 %v976_v4, %v972_v30  ;;  %v2440_v35 = vpack.c.bf16 %v985_v33, %v981_v32 }
 0x213   : > { %2403 = vmatpush1.bf16.msra.mxu0 %v2402_v42  ;;  %v2885_v42 = vmov 1983009808  }
 0x214   : > { %2405 = vmatprep.subr.bf16.mxu0 %v2404_v43  ;;  %v688_v43 = vunpack.c.l.s4 %v2885_v42 }
 0x216   : > { %v689_v45 = vunpack.c.0.s8 %v688_v43 }
 0x217   : > { %2407 = vmatpush1.bf16.msra.mxu0 %v2406_v48  ;;  %v995_v48 = vrot.slane %v3291_v44, %v3253_v41 }
 0x218   : > { %2409 = vmatprep.subr.bf16.mxu0 %v2408_v49  ;;  %v601_v49 = vld [vmem:[%s3472_s5] sm:$0x3]  ;;  %v3301_v50 = vsub.s32 %v689_v45, %v3247_v38 }
 0x219   : > { %v610_v57 = vrot.slane %v601_v49, %v3253_v41 }
 0x21b   : > { %2411 = vmatpush1.bf16.msra.mxu0 %v2410_v54 }
 0x21c   : > { %2413 = vmatprep.subr.bf16.mxu0 %v2412_v55  ;;  %v606_v55 = vrot.slane %v601_v49, %v3250_v40 }
 0x21f   : > { %2415 = vmatpush1.bf16.msra.mxu0 %v2414_v59  ;;  %v3308_v59 = vsub.s32 %v720_v51, %v3247_v38 }
 0x220   : > { %2417 = vmatprep.subr.bf16.mxu0 %v2416_v14 }
 0x223   : > { %2419 = vmatpush1.bf16.msra.mxu0 %v2418_v5 }
 0x224   : > { %2421 = vmatprep.subr.bf16.mxu0 %v2420_v6 }
 0x227   : > { %2423 = vmatpush1.bf16.msra.mxu0 %v2422_v11 }
 0x228   : > { %2425 = vmatprep.subr.bf16.mxu0 %v2424_v12 }
 0x22b   : > { %2427 = vmatpush1.bf16.msra.mxu0 %v2426_v17 }
 0x22c   : > { %2429 = vmatprep.subr.bf16.mxu0 %v2428_v18 }
 0x22f   : > { %2431 = vmatpush1.bf16.msra.mxu0 %v2430_v23 }
 0x230   : > { %2433 = vmatprep.subr.bf16.mxu0 %v2432_v24 }
 0x233   : > { %2435 = vmatpush1.bf16.msra.mxu0 %v2434_v2 }
 0x234   : > { %2437 = vmatprep.subr.bf16.mxu0 %v2436_v29 }
 0x237   : > { %2439 = vmatpush1.bf16.msra.mxu0 %v2438_v34 }
 0x238   : > { %2441 = vmatprep.subr.bf16.mxu0 %v2440_v35 }
 0x23b   : > { %2443 = vmatpush1.bf16.msra.mxu0 %v2442_v39 }
 0x23c   : > { %2232 = vmatprep.subr.mxu0 %v2883_v31 }
 0x23e   : > { %1144 = vmatmul.mubr.f32.vlgmr.msra.gmra.mrb[2].mxu0 %v3277_v60  ;;  %v991_v60 = vrot.slane %v3291_v44, %v3250_v40 }
 0x23f   : > { %2234 = vmatprep.mubr.msk.f32.mxu0 %vm2884_vm0, %v2883_v31 }
 0x2cd   : > { %v1074_v52 = vpop.f32.mrb[0].mxu1 }
 0x2ce   : > { %v1075_v53 = vadd.f32 %v1074_v52, %v991_v60  ;;  %v1076_v54 = vpop.f32.mrb[1].mxu1 }
 0x2cf   : > { %v1077_v56 = vadd.f32 %v1076_v54, %v995_v48 }
 0x2d0   : > { %v1150_v58 = vcombine.high %v1075_v53, %v2883_v31  ;;  %v1157_v15 = vrot.slane %v1075_v53, %v3301_v50 }
 0x2d1   : > { %v1165_v14 = vcombine.high %v1077_v56, %v2883_v31  ;;  %v1172_v61 = vrot.slane %v1077_v56, %v3301_v50  ;;  %v679_v62 = vpop.f32.mrb[0].mxu0 }
 0x2d2   : > { %v1164_v63 = vrot.slane %v1150_v58, %v3301_v50  ;;  %v680_v3 = vadd.f32 %v679_v62, %v606_v55  ;;  %v681_v5 = vpop.f32.mrb[1].mxu0 }
 0x2d3   : > { %v1179_v6 = vrot.slane %v1165_v14, %v3301_v50  ;;  %v1180_v7 = vcombine.low %v1157_v15, %v1172_v61  ;;  %v1181_v8 = vcombine.high %v1157_v15, %v1172_v61  ;;  %v682_v9 = vadd.f32 %v681_v5, %v610_v57 }
 0x2d4   : > { %v684_v10 = vmul.f32 0.088388346, %v680_v3  ;;  %v1002_v3 = vsub.s32 3, %v3247_v38 }
 0x2d5   : > { %v1188_v11 = vrot.slane %v1180_v7, %v3308_v59  ;;  %v1195_v12 = vrot.slane %v1181_v8, %v3308_v59  ;;  %v1196_v13 = vcombine.low %v1164_v63, %v1179_v6  ;;  %v1197_v16 = vcombine.high %v1164_v63, %v1179_v6 }
 0x2d6   : > { %v686_v21 = vcombine.high %v684_v10, %v2883_v31  ;;  %v693_v20 = vrot.slane %v684_v10, %v3301_v50  ;;  %v685_v17 = vmul.f32 0.088388346, %v682_v9  ;;  %v998_v63 = vsub.s32 2, %v3247_v38 }
 0x2d7   : > { %v1204_v18 = vrot.slane %v1196_v13, %v3308_v59  ;;  %v1211_v19 = vrot.slane %v1197_v16, %v3308_v59  ;;  %v1216_v22 = vcombine.low %v1188_v11, %v1195_v12  ;;  %v2208_v0 = vcombine.high %v1188_v11, %v1195_v12 }
 0x2d8   : > { %v700_v1 = vrot.slane %v686_v21, %v3301_v50  ;;  %v701_v23 = vcombine.high %v685_v17, %v2883_v31  ;;  %v708_v24 = vrot.slane %v685_v17, %v3301_v50  ;;  %v999_v5 = vrot.slane %v3291_v44, %v998_v63 }
 0x2d9   : > { %v1223_v25 = vrot.slane %v1216_v22, %v3301_v50  ;;  %v1231_v26 = vrot.slane %v2208_v0, %v3301_v50  ;;  %v1232_v27 = vcombine.low %v1204_v18, %v1211_v19  ;;  %v2209_v28 = vcombine.high %v1204_v18, %v1211_v19 }
 0x2da   : > { %v715_v2 = vrot.slane %v701_v23, %v3301_v50  ;;  %v716_v29 = vcombine.low %v693_v20, %v708_v24  ;;  %v717_v30 = vcombine.high %v693_v20, %v708_v24  ;;  %v1003_v6 = vrot.slane %v3291_v44, %v1002_v3 }
 0x2db   : > { %v1239_v4 = vrot.slane %v1232_v27, %v3301_v50  ;;  %v1247_v32 = vrot.slane %v2209_v28, %v3301_v50  ;;  %v1248_v33 = vcombine.low %v1223_v25, %v1231_v26 }
 0x2dc   : > { %v724_v34 = vrot.slane %v716_v29, %v3308_v59  ;;  %v731_v35 = vrot.slane %v717_v30, %v3308_v59  ;;  %v732_v36 = vcombine.low %v700_v1, %v715_v2  ;;  %v733_v37 = vcombine.high %v700_v1, %v715_v2 }
 0x2dd   : > { %v1256_v39 = vcombine.low %v1239_v4, %v1247_v32  ;;  %v1255_v47 = vrot.slane %v1248_v33, %v3308_v59 }
 0x2de   : > { %v740_v42 = vrot.slane %v732_v36, %v3308_v59  ;;  %v747_v43 = vrot.slane %v733_v37, %v3308_v59  ;;  %v752_v45 = vcombine.low %v724_v34, %v731_v35  ;;  %v2206_v46 = vcombine.high %v724_v34, %v731_v35 }
 0x2df   : > { %v1263_v60 = vrot.slane %v1256_v39, %v3308_v59  ;;  %v2887_v36 = vmov -inf  }
 0x2e0   : > { %v759_v48 = vrot.slane %v752_v45, %v3301_v50  ;;  %v767_v49 = vrot.slane %v2206_v46, %v3301_v50  ;;  %v768_v51 = vcombine.low %v740_v42, %v747_v43  ;;  %v2207_v52 = vcombine.high %v740_v42, %v747_v43  ;;  %805 = vst.msk [vmem:[#allocation3] sm:$0xff] %vm804_vm1, %v2887_v36 }
 0x2e1   : > { %v1264_v53 = vcombine.low %v1255_v47, %v1263_v60  ;;  %v1265_v54 = vcombine.high %v1255_v47, %v1263_v60  ;;  %806 = vst.msk [vmem:[#allocation3 + $0x8] sm:$0xff] %vm804_vm1, %v2887_v36  ;;  %v2888_v47 = vmov 0   ;;  %v1896_v36 = vld [vmem:[#allocation14 + $0xa8] sm:$0xff] }
 0x2e2   : > { %v775_v55 = vrot.slane %v768_v51, %v3301_v50  ;;  %v783_v56 = vrot.slane %v2207_v52, %v3301_v50  ;;  %v784_v57 = vcombine.low %v759_v48, %v767_v49  ;;  %2616 = vset.pattern.permute.xlu0 %v2888_v47  ;;  %2617 = vset.pattern.permute.xlu1 %v2888_v47  ;;  %v1902_v47 = vld [vmem:[#allocation14 + $0xd8] sm:$0xff] }
 0x2e3   : > { %2233 = vmatpush3.xpose.msra.mxu0 %v1264_v53 }
 0x2e4   : > { %2237 = vmatprep.subr.mxu0 %v2883_v31  ;;  %v792_v58 = vcombine.low %v775_v55, %v783_v56  ;;  %v791_v15 = vrot.slane %v784_v57, %v3308_v59 }
 0x2e6   : > { %v799_v14 = vrot.slane %v792_v58, %v3308_v59 }
 0x2e7   : > { %v1524_v60 = vld [vmem:[#allocation3] sm:$0xff] }
 0x2e8   : > { %v800_v61 = vcombine.low %v791_v15, %v799_v14  ;;  %v801_v62 = vcombine.high %v791_v15, %v799_v14  ;;  %v1525_v51 = vld [vmem:[#allocation3 + $0x8] sm:$0xff] }
 0x2ea   : > { %2235 = vmatmul.mubr.f32.vlgmr.msra.gmra.mrb[4].mxu0 %v800_v61 }
 0x2eb   : > { %2238 = vmatpush3.xpose.msra.mxu0 %v1265_v54  ;;  %2239 = vmatprep.mubr.msk.f32.mxu0 %vm2884_vm0, %v2883_v31 }
 0x2ee   : > { %2240 = vmatmul.mubr.f32.vlgmr.msra.gmra.mrb[6].mxu0 %v801_v62 }
 0x311   : > { %v1145_v7 = vpop.f32.mrb[2].mxu0 }
 0x312   : > { %v1146_v8 = vadd.f32 %v1145_v7, %v999_v5  ;;  %v1147_v9 = vpop.f32.mrb[3].mxu0 }
 0x313   : > { %v1148_v10 = vadd.f32 %v1147_v9, %v1003_v6 }
 0x314   : > { %v1266_v11 = vcombine.high %v1146_v8, %v2883_v31  ;;  %v1273_v12 = vrot.slane %v1146_v8, %v3301_v50 }
 0x315   : > { %v1281_v13 = vcombine.high %v1148_v10, %v2883_v31  ;;  %v1288_v16 = vrot.slane %v1148_v10, %v3301_v50  ;;  %v1876_v10 = vld [vmem:[#allocation14 + $0x8] sm:$0xff] }
 0x316   : > { %v1280_v21 = vrot.slane %v1266_v11, %v3301_v50  ;;  %v1878_v11 = vld [vmem:[#allocation14 + $0x18] sm:$0xff] }
 0x317   : > { %v1295_v38 = vrot.slane %v1281_v13, %v3301_v50  ;;  %v1296_v20 = vcombine.low %v1273_v12, %v1288_v16  ;;  %v1297_v17 = vcombine.high %v1273_v12, %v1288_v16  ;;  %v1875_v12 = vld [vmem:[#allocation14] sm:$0xff]  ;;  %v2444_v13 = vpack.c.bf16 %v1878_v11, %v1876_v10  ;;  %v1877_v16 = vld [vmem:[#allocation14 + $0x10] sm:$0xff] }
 0x318   : > { %v1911_v10 = vld [vmem:[#allocation14 + $0x120] sm:$0xff]  ;;  %v1913_v11 = vld [vmem:[#allocation14 + $0x130] sm:$0xff] }
 0x319   : > { %v1304_v44 = vrot.slane %v1296_v20, %v3308_v59  ;;  %v1311_v18 = vrot.slane %v1297_v17, %v3308_v59  ;;  %v1312_v19 = vcombine.low %v1280_v21, %v1295_v38  ;;  %v1313_v22 = vcombine.high %v1280_v21, %v1295_v38  ;;  %v1880_v21 = vld [vmem:[#allocation14 + $0x28] sm:$0xff]  ;;  %v1882_v38 = vld [vmem:[#allocation14 + $0x38] sm:$0xff] }
 0x31a   : > { %v2446_v20 = vpack.c.bf16 %v1877_v16, %v1875_v12  ;;  %v2448_v17 = vpack.c.bf16 %v1882_v38, %v1880_v21  ;;  %v2482_v12 = vpack.c.bf16 %v1913_v11, %v1911_v10  ;;  %v1558_v38 = vld [vmem:[#allocation4 + $0x8] sm:$0xff] }
 0x31b   : > { %v1320_v0 = vrot.slane %v1312_v19, %v3308_v59  ;;  %v1327_v1 = vrot.slane %v1313_v22, %v3308_v59  ;;  %v1332_v23 = vcombine.low %v1304_v44, %v1311_v18  ;;  %v2210_v24 = vcombine.high %v1304_v44, %v1311_v18  ;;  %v1879_v44 = vld [vmem:[#allocation14 + $0x20] sm:$0xff]  ;;  %v1881_v18 = vld [vmem:[#allocation14 + $0x30] sm:$0xff]  ;;  %v1884_v19 = vld [vmem:[#allocation14 + $0x48] sm:$0xff] }
 0x31c   : > { %v1886_v22 = vld [vmem:[#allocation14 + $0x58] sm:$0xff] }
 0x31d   : > { %v1339_v25 = vrot.slane %v1332_v23, %v3301_v50  ;;  %v1347_v26 = vrot.slane %v2210_v24, %v3301_v50  ;;  %v1348_v27 = vcombine.low %v1320_v0, %v1327_v1  ;;  %v2211_v28 = vcombine.high %v1320_v0, %v1327_v1  ;;  %v1883_v23 = vld [vmem:[#allocation14 + $0x40] sm:$0xff]  ;;  %v1885_v24 = vld [vmem:[#allocation14 + $0x50] sm:$0xff] }
 0x31e   : > { %v2450_v0 = vpack.c.bf16 %v1881_v18, %v1879_v44  ;;  %v2452_v1 = vpack.c.bf16 %v1886_v22, %v1884_v19 }
 0x31f   : > { %v1355_v2 = vrot.slane %v1348_v27, %v3301_v50  ;;  %v1363_v29 = vrot.slane %v2211_v28, %v3301_v50  ;;  %v1364_v30 = vcombine.low %v1339_v25, %v1347_v26  ;;  %v1888_v25 = vld [vmem:[#allocation14 + $0x68] sm:$0xff]  ;;  %v1890_v26 = vld [vmem:[#allocation14 + $0x78] sm:$0xff]  ;;  %v2454_v27 = vpack.c.bf16 %v1885_v24, %v1883_v23  ;;  %v1915_v24 = vld [vmem:[#allocation14 + $0x140] sm:$0xff] }
 0x320   : > { %v2456_v28 = vpack.c.bf16 %v1890_v26, %v1888_v25  ;;  %v1918_v23 = vld [vmem:[#allocation14 + $0x158] sm:$0xff]  ;;  %v1917_v25 = vld [vmem:[#allocation14 + $0x150] sm:$0xff] }
 0x321   : > { %v1372_v4 = vcombine.low %v1355_v2, %v1363_v29  ;;  %v1371_v32 = vrot.slane %v1364_v30, %v3308_v59  ;;  %v1887_v2 = vld [vmem:[#allocation14 + $0x60] sm:$0xff]  ;;  %v1889_v29 = vld [vmem:[#allocation14 + $0x70] sm:$0xff]  ;;  %v1892_v30 = vld [vmem:[#allocation14 + $0x88] sm:$0xff]  ;;  %v2486_v26 = vpack.c.bf16 %v1917_v25, %v1915_v24 }
 0x323   : > { %v1379_v33 = vrot.slane %v1372_v4, %v3308_v59  ;;  %v1894_v4 = vld [vmem:[#allocation14 + $0x98] sm:$0xff] }
 0x325   : > { %v1380_v34 = vcombine.low %v1371_v32, %v1379_v33  ;;  %v1381_v35 = vcombine.high %v1371_v32, %v1379_v33  ;;  %v2458_v32 = vpack.c.bf16 %v1889_v29, %v1887_v2  ;;  %v2460_v33 = vpack.c.bf16 %v1894_v4, %v1892_v30  ;;  %v1919_v29 = vld [vmem:[#allocation14 + $0x160] sm:$0xff]  ;;  %v1921_v30 = vld [vmem:[#allocation14 + $0x170] sm:$0xff] }
 0x326   : > { %v2490_v4 = vpack.c.bf16 %v1921_v30, %v1919_v29 }
 0x327   : > { %2243 = vmatpush3.msra.mxu1 %v1380_v34  ;;  %v1891_v34 = vld [vmem:[#allocation14 + $0x80] sm:$0xff] }
 0x328   : > { %2247 = vmatprep.subr.mxu1 %v2883_v31 }
 0x3bd   : > { %v1450_v37 = vpop.f32.mrb[4].mxu0 }
 0x3be   : > { %v2236_v39 = vpop.f32.mrb[5].mxu0  ;;  %v1527_v42 = vsel %vm1526_vm2, %v1450_v37, -inf }
 0x3bf   : > { %1528 = vmax.xlane.f32.xlu0 %v1527_v42 }
 0x3c1   : > { %v1520_v43 = vpop.f32.mrb[6].mxu0 }
 0x3c2   : > { %v2241_v45 = vpop.f32.mrb[7].mxu0  ;;  %v1530_v46 = vsel %vm1526_vm2, %v1520_v43, -inf }
 0x3c3   : > { %1531 = vmax.xlane.f32.xlu1 %v1530_v46  ;;  %v1897_v45 = vld [vmem:[#allocation14 + $0xb0] sm:$0xff]  ;;  %v1900_v46 = vld [vmem:[#allocation14 + $0xc8] sm:$0xff] }
 0x44c   : > { %v1529_v48 = vpop.xlane.xlu0 %1528 }
 0x44d   : > { %v1533_v49 = vmax.f32 %v1524_v60, %v1529_v48  ;;  %v2468_v48 = vpack.c.bf16 %v1902_v47, %v1900_v46  ;;  %v1929_v46 = vld [vmem:[#allocation14 + $0x1b0] sm:$0xff] }
 0x44f   : > { %v1535_v52 = vsub.f32 %v1524_v60, %v1533_v49  ;;  %1736 = vst.msk [vmem:[#allocation3] sm:$0xff] %vm804_vm1, %v1533_v49  ;;  %1543 = vperm.xlu0 %2616, %v1533_v49   ;;  %v1899_v49 = vld [vmem:[#allocation14 + $0xc0] sm:$0xff] }
 0x450   : > { %v1532_v53 = vpop.xlane.xlu1 %1531 }
 0x451   : > { %v1534_v54 = vmax.f32 %v1525_v51, %v1532_v53  ;;  %v1537_v5 = vmul.f32 1.442695, %v1535_v52  ;;  %v1904_v52 = vld [vmem:[#allocation14 + $0xe8] sm:$0xff]  ;;  %v1906_v53 = vld [vmem:[#allocation14 + $0xf8] sm:$0xff] }
 0x453   : > { %v1536_v55 = vsub.f32 %v1525_v51, %v1534_v54  ;;  %1737 = vst.msk [vmem:[#allocation3 + $0x8] sm:$0xff] %vm804_vm1, %v1534_v54  ;;  %1548 = vperm.xlu1 %2617, %v1534_v54   ;;  %v1901_v51 = vld [vmem:[#allocation14 + $0xd0] sm:$0xff] }
 0x454   : > { %v2470_v54 = vpack.c.bf16 %v1901_v51, %v1899_v49  ;;  %v1931_v49 = vld [vmem:[#allocation14 + $0x1c0] sm:$0xff] }
 0x455   : > { %v1539_v7 = vmul.f32 1.442695, %v1536_v55  ;;  %v2472_v55 = vpack.c.bf16 %v1906_v53, %v1904_v52  ;;  %v1933_v52 = vld [vmem:[#allocation14 + $0x1d0] sm:$0xff]  ;;  %v1936_v53 = vld [vmem:[#allocation14 + $0x1e8] sm:$0xff] }
 0x4ce   : > { %v1544_v56 = vpop.permute.xlu0 %1543 }
 0x4cf   : > { %v1551_v57 = vsub.f32 %v1450_v37, %v1544_v56  ;;  %v1898_v37 = vld [vmem:[#allocation14 + $0xb8] sm:$0xff]  ;;  %v1903_v56 = vld [vmem:[#allocation14 + $0xe0] sm:$0xff] }
 0x4d0   : > { %v2464_v42 = vpack.c.bf16 %v1898_v37, %v1896_v36  ;;  %v1925_v36 = vld [vmem:[#allocation14 + $0x190] sm:$0xff] }
 0x4d1   : > { %v1553_v58 = vmul.f32 1.442695, %v1551_v57  ;;  %v1905_v57 = vld [vmem:[#allocation14 + $0xf0] sm:$0xff] }
 0x4d2   : > { %v1549_v15 = vpop.permute.xlu1 %1548 }
 0x4d3   : > { %2622 = vpow2.f32 %v1553_v58  ;;  %v1552_v14 = vsub.f32 %v1520_v43, %v1549_v15  ;;  %v1895_v43 = vld [vmem:[#allocation14 + $0xa0] sm:$0xff]  ;;  %v1908_v58 = vld [vmem:[#allocation14 + $0x108] sm:$0xff]  ;;  %v1910_v15 = vld [vmem:[#allocation14 + $0x118] sm:$0xff] }
 0x4d4   : > { %v2466_v60 = vpack.c.bf16 %v1897_v45, %v1895_v43  ;;  %v1927_v45 = vld [vmem:[#allocation14 + $0x1a0] sm:$0xff] }
 0x4d5   : > { %v1555_v61 = vmul.f32 1.442695, %v1552_v14  ;;  %v2474_v14 = vpack.c.bf16 %v1905_v57, %v1903_v56  ;;  %v2498_v47 = vpack.c.bf16 %v1929_v46, %v1927_v45  ;;  %v1935_v57 = vld [vmem:[#allocation14 + $0x1e0] sm:$0xff] }
 0x4d6   : > { %v2022_v45 = vld [vmem:[%s3192_s22] sm:$0xff] }
 0x4d7   : > { %2624 = vpow2.f32 %v1555_v61  ;;  %v2476_v61 = vpack.c.bf16 %v1910_v15, %v1908_v58  ;;  %v1937_v58 = vld [vmem:[#allocation14 + $0x1f0] sm:$0xff] }
 0x4d8   : > { %2626 = vpow2.f32 %v1537_v5  ;;  %v1914_v5 = vld [vmem:[#allocation14 + $0x138] sm:$0xff]  ;;  %v2506_v15 = vpack.c.bf16 %v1937_v58, %v1935_v57 }
 0x4d9   : > { %2628 = vpow2.f32 %v1539_v7 }
 0x4dd   : > { %v2623_v62 = vpop.eup %2622 }
 0x4de   : > { %2245 = vmatmul.mubr.msk.f32.vlgmr.msra.gmra.mrb[2].mxu1 %vm1526_vm2, %v2623_v62  ;;  %v1561_v63 = vsel %vm1526_vm2, %v2623_v62, 0.0  ;;  %v1907_v62 = vld [vmem:[#allocation14 + $0x100] sm:$0xff] }
 0x4df   : > { %2248 = vmatpush3.msra.mxu1 %v1381_v35  ;;  %1562 = vadd.xlane.f32.xlu1 %v1561_v63  ;;  %v1893_v35 = vld [vmem:[#allocation14 + $0x90] sm:$0xff] }
 0x4e0   : > { %2249 = vmatprep.mubr.msk.f32.mxu1 %vm2884_vm0, %v2883_v31  ;;  %2445 = vmatprep.subr.bf16.mxu1 %v2444_v13  ;;  %v2462_v39 = vpack.c.bf16 %v1893_v35, %v1891_v34  ;;  %v1909_v63 = vld [vmem:[#allocation14 + $0x110] sm:$0xff]  ;;  %v1923_v35 = vld [vmem:[#allocation14 + $0x180] sm:$0xff] }
 0x4e1   : > { %v2625_v3 = vpop.eup %2624  ;;  %v1557_v13 = vld [vmem:[#allocation4] sm:$0xff]  ;;  %v2494_v37 = vpack.c.bf16 %v1925_v36, %v1923_v35 }
 0x4e2   : > { %2250 = vmatmul.mubr.msk.f32.vlgmr.msra.gmra.mrb[4].mxu1 %vm1526_vm2, %v2625_v3  ;;  %v1564_v6 = vsel %vm1526_vm2, %v2625_v3, 0.0  ;;  %v3380_v8 = vpop.eup %2626  ;;  %v1912_v3 = vld [vmem:[#allocation14 + $0x128] sm:$0xff] }
 0x4e3   : > { %1565 = vadd.xlane.f32.xlu0 %v1564_v6  ;;  %v3383_v9 = vpop.eup %2628  ;;  %2447 = vmatpush1.bf16.msra.mxu1 %v2446_v20  ;;  %v2478_v6 = vpack.c.bf16 %v1909_v63, %v1907_v62  ;;  %v2480_v7 = vpack.c.bf16 %v1914_v5, %v1912_v3  ;;  %v1559_v16 = vmul.f32 %v3380_v8, %v1557_v13 }
 0x4e4   : > { %2449 = vmatprep.subr.bf16.mxu1 %v2448_v17  ;;  %v1560_v17 = vmul.f32 %v3383_v9, %v1558_v38 }
 0x4e7   : > { %2451 = vmatpush1.bf16.msra.mxu1 %v2450_v0 }
 0x4e8   : > { %2453 = vmatprep.subr.bf16.mxu1 %v2452_v1  ;;  %v1916_v1 = vld [vmem:[#allocation14 + $0x148] sm:$0xff] }
 0x4eb   : > { %2455 = vmatpush1.bf16.msra.mxu1 %v2454_v27 }
 0x4ec   : > { %2457 = vmatprep.subr.bf16.mxu1 %v2456_v28  ;;  %v1922_v28 = vld [vmem:[#allocation14 + $0x178] sm:$0xff] }
 0x4ef   : > { %2459 = vmatpush1.bf16.msra.mxu1 %v2458_v32  ;;  %v1924_v32 = vld [vmem:[#allocation14 + $0x188] sm:$0xff] }
 0x4f0   : > { %1576 = vperm.xlu1 %2617, %v3380_v8   ;;  %2461 = vmatprep.subr.bf16.mxu1 %v2460_v33  ;;  %v2484_v8 = vpack.c.bf16 %v1918_v23, %v1916_v1  ;;  %v1926_v33 = vld [vmem:[#allocation14 + $0x198] sm:$0xff] }
 0x4f1   : > { %v2492_v34 = vpack.c.bf16 %v1926_v33, %v1924_v32 }
 0x4f3   : > { %2463 = vmatpush1.bf16.msra.mxu1 %v2462_v39  ;;  %v1928_v39 = vld [vmem:[#allocation14 + $0x1a8] sm:$0xff] }
 0x4f4   : > { %1581 = vperm.xlu1 %2617, %v3383_v9   ;;  %2465 = vmatprep.subr.bf16.mxu1 %v2464_v42  ;;  %v1920_v9 = vld [vmem:[#allocation14 + $0x168] sm:$0xff]  ;;  %v1930_v42 = vld [vmem:[#allocation14 + $0x1b8] sm:$0xff] }
 0x4f5   : > { %v2488_v2 = vpack.c.bf16 %v1922_v28, %v1920_v9  ;;  %v2496_v43 = vpack.c.bf16 %v1930_v42, %v1928_v39  ;;  %v1939_v39 = vld [vmem:[%s3518_s16] sm:$0x3] }
 0x4f6   : > { %v1944_v42 = vrot.slane %v1939_v39, %v3250_v40 }
 0x4f7   : > { %2467 = vmatpush1.bf16.msra.mxu1 %v2466_v60  ;;  %v1932_v60 = vld [vmem:[#allocation14 + $0x1c8] sm:$0xff] }
 0x4f8   : > { %2469 = vmatprep.subr.bf16.mxu1 %v2468_v48  ;;  %v1934_v48 = vld [vmem:[#allocation14 + $0x1d8] sm:$0xff] }
 0x4f9   : > { %v2500_v51 = vpack.c.bf16 %v1934_v48, %v1932_v60  ;;  %v2023_v60 = vld [vmem:[%s3192_s22 + $0x8] sm:$0xff]  ;;  %s2778_s22 = scalar_lea.vmem %s3420_s8, 256 }
 0x4fa   : > { %p2779_p0 = scmp.ne.s32.totalorder %s3420_s8, %s2778_s22  ;;  %p2786_p13 = scmp.lt.s32.totalorder %s2784_s28, %s2778_s22 }
 0x4fb   : > { %2471 = vmatpush1.bf16.msra.mxu1 %v2470_v54  ;;  %v1938_v54 = vld [vmem:[#allocation14 + $0x1f8] sm:$0xff] }
 0x4fc   : > { %2473 = vmatprep.subr.bf16.mxu1 %v2472_v55  ;;  %v2502_v55 = vpack.c.bf16 %v1933_v52, %v1931_v49  ;;  %v2504_v56 = vpack.c.bf16 %v1938_v54, %v1936_v53  ;;  %p2780_p4 = pnand %p2779_p0, %p3520_p2  ;;  %p2787_p10 = por %p2786_p13, %p2785_p1 }
 0x4fe   : > { %p2781_p8 = pneg %p2780_p4 }
 0x4ff   : > { %2475 = vmatpush1.bf16.msra.mxu1 %v2474_v14 }
 0x500   : > { %2477 = vmatprep.subr.bf16.mxu1 %v2476_v61  ;;  %p2788_p11 = pnand %p2787_p10, %p2781_p8 }
 0x503   : > { %2479 = vmatpush1.bf16.msra.mxu1 %v2478_v6 }
 0x504   : > { %2481 = vmatprep.subr.bf16.mxu1 %v2480_v7 }
 0x507   : > { %2483 = vmatpush1.bf16.msra.mxu1 %v2482_v12 }
 0x508   : > { %2485 = vmatprep.subr.bf16.mxu1 %v2484_v8 }
 0x50b   : > { %2487 = vmatpush1.bf16.msra.mxu1 %v2486_v26 }
 0x50c   : > { %2489 = vmatprep.subr.bf16.mxu1 %v2488_v2 }
 0x50f   : > { %2491 = vmatpush1.bf16.msra.mxu1 %v2490_v4 }
 0x510   : > { %2493 = vmatprep.subr.bf16.mxu1 %v2492_v34 }
 0x513   : > { %2495 = vmatpush1.bf16.msra.mxu1 %v2494_v37 }
 0x514   : > { %2497 = vmatprep.subr.bf16.mxu1 %v2496_v43 }
 0x517   : > { %2499 = vmatpush1.bf16.msra.mxu1 %v2498_v47 }
 0x518   : > { %2501 = vmatprep.subr.bf16.mxu1 %v2500_v51 }
 0x51b   : > { %2503 = vmatpush1.bf16.msra.mxu1 %v2502_v55 }
 0x51c   : > { %2505 = vmatprep.subr.bf16.mxu1 %v2504_v56 }
 0x51f   : > { %2507 = vmatpush1.bf16.msra.mxu1 %v2506_v15 }
 0x56c   : > { %v1563_v21 = vpop.xlane.xlu1 %1562 }
 0x56d   : > { %v1567_v20 = vadd.f32 %v1563_v21, %v1559_v16 }
 0x56f   : > { %1570 = vst.msk [vmem:[#allocation4] sm:$0xff] %vm804_vm1, %v1567_v20 }
 0x570   : > { %v1566_v44 = vpop.xlane.xlu0 %1565  ;;  %v1577_v3 = vpop.permute.xlu1 %1576 }
 0x571   : > { %v1568_v18 = vadd.f32 %v1566_v44, %v1560_v17  ;;  %v1584_v6 = vmul.f32 0.0, %v1577_v3 }
 0x573   : > { %1571 = vst.msk [vmem:[#allocation4 + $0x8] sm:$0xff] %vm804_vm1, %v1568_v18 }
 0x574   : > { %v1582_v5 = vpop.permute.xlu1 %1581 }
 0x575   : > { %v1585_v11 = vmul.f32 0.0, %v1582_v5 }
 0x576   : > { %v1741_v19 = vld [vmem:[#allocation4] sm:$0xff] }
 0x577   : > { %2630 = vrcp.f32 %v1741_v19 }
 0x57a   : > { %v1742_v22 = vld [vmem:[#allocation4 + $0x8] sm:$0xff] }
 0x57b   : > { %2632 = vrcp.f32 %v1742_v22 }
 0x581   : > { %v2631_v0 = vpop.eup %2630 }
 0x582   : > { %1749 = vperm.xlu1 %2617, %v2631_v0  }
 0x585   : > { %v2633_v27 = vpop.eup %2632 }
 0x586   : > { %1754 = vperm.xlu0 %2616, %v2633_v27  }
 0x5b1   : > { %v1655_v14 = vpop.f32.mrb[2].mxu1 }
 0x5b2   : > { %v2246_v61 = vpop.f32.mrb[3].mxu1  ;;  %v1732_v7 = vadd.f32 %v1655_v14, %v1584_v6 }
 0x5b5   : > { %v1728_v62 = vpop.f32.mrb[4].mxu1 }
 0x5b6   : > { %v2251_v63 = vpop.f32.mrb[5].mxu1  ;;  %v1733_v13 = vadd.f32 %v1728_v62, %v1585_v11 }
 0x601   : > { %v1750_v10 = vpop.permute.xlu1 %1749 }
 0x602   : > { %v1757_v12 = vmul.f32 %v1750_v10, %v1732_v7 }
 0x604   : > { %v1759_v21 = vcombine.high %v1757_v12, %v2883_v31  ;;  %v1766_v20 = vrot.slane %v1757_v12, %v3301_v50 }
 0x605   : > { %v1755_v16 = vpop.permute.xlu0 %1754 }
 0x606   : > { %v1758_v38 = vmul.f32 %v1755_v16, %v1733_v13  ;;  %v1773_v18 = vrot.slane %v1759_v21, %v3301_v50 }
 0x608   : > { %v1774_v17 = vcombine.high %v1758_v38, %v2883_v31  ;;  %v1781_v44 = vrot.slane %v1758_v38, %v3301_v50 }
 0x60a   : > { %v1788_v19 = vrot.slane %v1774_v17, %v3301_v50  ;;  %v1789_v22 = vcombine.low %v1766_v20, %v1781_v44  ;;  %v1790_v0 = vcombine.high %v1766_v20, %v1781_v44 }
 0x60c   : > { %v1797_v1 = vrot.slane %v1789_v22, %v3308_v59  ;;  %v1804_v23 = vrot.slane %v1790_v0, %v3308_v59  ;;  %v1805_v8 = vcombine.low %v1773_v18, %v1788_v19  ;;  %v1806_v24 = vcombine.high %v1773_v18, %v1788_v19 }
 0x60e   : > { %v1813_v25 = vrot.slane %v1805_v8, %v3308_v59  ;;  %v1820_v26 = vrot.slane %v1806_v24, %v3308_v59  ;;  %v1825_v27 = vcombine.low %v1797_v1, %v1804_v23  ;;  %v2214_v31 = vcombine.high %v1797_v1, %v1804_v23 }
 0x610   : > { %v1841_v9 = vcombine.low %v1813_v25, %v1820_v26  ;;  %v2215_v28 = vcombine.high %v1813_v25, %v1820_v26  ;;  %v1832_v2 = vrot.slane %v1825_v27, %v3301_v50  ;;  %v1840_v29 = vrot.slane %v2214_v31, %v3301_v50 }
 0x612   : > { %v1848_v30 = vrot.slane %v1841_v9, %v3301_v50  ;;  %v1856_v4 = vrot.slane %v2215_v28, %v3301_v50  ;;  %v1857_v32 = vcombine.low %v1832_v2, %v1840_v29  ;;  %v1948_v50 = vrot.slane %v1939_v39, %v3253_v41 }
 0x614   : > { %v1865_v33 = vcombine.low %v1848_v30, %v1856_v4  ;;  %v1864_v34 = vrot.slane %v1857_v32, %v3308_v59 }
 0x616   : > { %v1872_v35 = vrot.slane %v1865_v33, %v3308_v59 }
 0x618   : > { %v1874_v36 = vcombine.high %v1864_v34, %v1872_v35  ;;  %v1873_v37 = vcombine.low %v1864_v34, %v1872_v35 }
 0x61a   : > { %2015 = vmatprep.mubr.f32.mxu1 %v1874_v36 }
 0x61b   : > { %2016 = vmatmul.mubr.f32.vlgmr.msra.gmra.mrb[6].mxu1 %v1873_v37 }
 0x6ee   : > { %v2017_v43 = vpop.f32.mrb[6].mxu1 }
 0x6ef   : > { %v2018_v46 = vadd.f32 %v2017_v43, %v1944_v42  ;;  %v2019_v47 = vpop.f32.mrb[7].mxu1 }
 0x6f0   : > { %v2020_v59 = vadd.f32 %v2019_v47, %v1948_v50 }
 0x6f1   : > { %v2024_v48 = vadd.f32 %v2022_v45, %v2018_v46 }
 0x6f2   : > { %v2025_v49 = vadd.f32 %v2023_v60, %v2020_v59 }
 0x6f3   : > { %2026 = vst [vmem:[%s485_s21] sm:$0xff] %v2024_v48 }
 0x6f4   : > { %2027 = vst [vmem:[%s485_s21 + $0x8] sm:$0xff] %v2025_v49 }
 0x6f5   : > { %2791 = shalt.err (!%p2788_p11)
}
 0x6f6   : > { %s2792_s25 = scalar_lea.hbm %s3418_s26, 256  ;;  %s2796_s30 = scalar_lea.hbm %s3519_s27, 512 }
 0x6f7   : > { %p2793_p6 = scmp.ne.s32.totalorder %s3418_s26, %s2792_s25  ;;  %p2797_p12 = scmp.lt.u32.totalorder %s3418_s26, %s3519_s27 }
 0x6f8   : > { %p2798_p5 = scmp.lt.u32.totalorder %s2796_s30, %s2792_s25  ;;  %p2800_p0 = scmp.lt.u32.totalorder %s2792_s25, %s3418_s26 }
 0x6f9   : > { %p2794_p3 = pnand %p2793_p6, %p3520_p2 }
 0x6fa   : > { %p2799_p9 = por %p2798_p5, %p2797_p12 }
 0x6fb   : > { %p2795_p7 = pneg %p2794_p3 }
 0x6fc   : > { %p2801_p4 = por %p2800_p0, %p2799_p9 }
 0x6fe   : > { %p2802_p8 = pnand %p2801_p4, %p2795_p7 }
 0x700   : > { %2805 = shalt.err (!%p2802_p8)
}
 0x701   : > { %2524 = dma.vmem_to_hbm [thread:$0]  (%p3520_p2), %s3420_s8, 256, %s3418_s26, %s2029_s24  }
 0x702 PF: > { %s3521_s16 = sld [smem:[#allocation21_spill]]  ;;  %s3522_s19 = sld [smem:[#allocation23_spill]] }
 0x703   : > { %p3524_p13 = scmp.ge.s32.totalorder %s2872_s18, 2 }
 0x708   : > { %s2057_s21 = sand.u32 1, %s3521_s16   ;;  %p3523_p1 = scmp.ne.s32.totalorder %s3522_s19, 0 }
 0x709   : > { %s2058_s9 = scalar_lea.sflag [#allocation8], %s2057_s21 }
 0x70a   : > { %p2544_p10 = pnand %p3524_p13, %p3523_p1 }
 0x70c   : > { %2847 = dma.done.wait (!%p2544_p10), %s2058_s9, 256  }
 0x70d   : > { %2849 = vsyncadd (!%p2544_p10), %s2058_s9, 4294967040  ;;  %s30_s18 = sadd.s32 1, %s2872_s18   ;;  %s3525_s11 = sld [smem:[#allocation24_spill]] }
 0x70e   : > { %p27_p11 = scmp.ge.s32.totalorder %s30_s18, 4   ;;  %s3526_s13 = smov %s2856_s14 }
 0x70f   : > { %s3527_s14 = smov %s2860_s15  ;;  %s3528_s15 = smov %s3112_s20 }
 0x710   : > { %s3529_s16 = smov %s2868_s17  ;;  %29 = sbr.rel (!%p27_p11) target bundleno = 15 (0xf), region = 138 }
 0x713   : > { %s3530_s17 = smov %s3525_s11 }
 0x717   :  { %2063 = vsyncpa [#allocation7], 1 }
 0x718   :  { %2065 = vsyncpa [#allocation7 + $0x1], 1 }
 0x719   :  { %2066 = vsyncpa [#allocation10], 1 }
 0x71a   :  { %2068 = vsyncpa [#allocation10 + $0x1], 1 }
 0x71b   :  { %2069 = vsyncpa [#allocation13], 1 }
 0x71c   :  { %2070 = vsyncpa [#allocation8], 1 }
 0x71d   :  { %2072 = vsyncpa [#allocation8 + $0x1], 1 }

// kernel: tpu_custom_call.1
= control target key start
LH: loop header
LB: loop body
LE: loop exit
PB: predicated region body
PF: predicated region fallthrough
CT: control target
= control target key end

     0   :  { %s3467_s0 = inlined_call_operand.hbm [shape: f32[2,8,256], index: 0, kind: input, shape index: {}]   ;;  %s3468_s1 = inlined_call_operand.hbm [shape: f32[2,8,256], index: 1, kind: input, shape index: {}]   ;;  %s3469_s2 = inlined_call_operand.vmem [shape: f32[1,256], index: 2, kind: input, shape index: {}]   ;;  %s3470_s3 = inlined_call_operand.vmem [shape: f32[1,256], index: 3, kind: input, shape index: {}]   ;;  %s3471_s4 = inlined_call_operand.hbm [shape: f32[256,256], index: 4, kind: input, shape index: {}]   ;;  %s3472_s5 = inlined_call_operand.vmem [shape: f32[1,256], index: 5, kind: input, shape index: {}]   ;;  %s3473_s6 = inlined_call_operand.hbm [shape: f32[256,512], index: 6, kind: input, shape index: {}]   ;;  %s3474_s7 = inlined_call_operand.vmem [shape: f32[1,512], index: 7, kind: input, shape index: {}]   ;;  %s3475_s8 = inlined_call_operand.hbm [shape: f32[256,256], index: 8, kind: input, shape index: {}]   ;;  %s3476_s9 = inlined_call_operand.vmem [shape: f32[1,256], index: 9, kind: input, shape index: {}]   ;;  %s3477_s10 = inlined_call_operand.hbm [shape: f32[2,8,256], index: 10, kind: output, shape index: {}]  }
   0x1   :  { %3488 = sst [smem:[#allocation25_spill]] %s3471_s4 }
   0x2   :  { %3489 = sst [smem:[#allocation26_spill]] %s3473_s6 }
   0x3   :  { %3490 = sst [smem:[#allocation27_spill]] %s3475_s8 }
   0x4   :  { %3491 = sst [smem:[#allocation28_spill]] %s3476_s9 }
   0x5   :  { %3492 = sst [smem:[#allocation29_spill]] %s3477_s10 }
   0x6   :  { %15 = vsyncpa [#allocation7], 0 }
   0x7   :  { %17 = vsyncpa [#allocation7 + $0x1], 0 }
   0x8   :  { %18 = vsyncpa [#allocation10], 0 }
   0x9   :  { %20 = vsyncpa [#allocation10 + $0x1], 0 }
   0xa   :  { %21 = vsyncpa [#allocation13], 0 }
   0xb   :  { %22 = vsyncpa [#allocation8], 0 }
   0xc   :  { %24 = vsyncpa [#allocation8 + $0x1], 0  ;;  %s2945_s13 = smov 0   ;;  %s2947_s14 = smov 0  }
   0xd   :  { %s2949_s15 = smov 0   ;;  %s2951_s16 = smov 0  }
   0xe   :  { %s2953_s17 = smov 0   ;;  %s2955_s18 = smov 0  }
   0xf LB: > { %3493 = sst [smem:[#allocation21_spill]] %s2852_s13  ;;  %s2976_s19 = sadd.s32 4294967295, %s2872_s18   ;;  %s2872_s18 = sphi %s2955_s18, %s30_s18   ;;  %s2868_s17 = sphi %s2953_s17, %s3530_s17   ;;  %s2864_s16 = sphi %s2951_s16, %s3529_s16   ;;  %s2860_s15 = sphi %s2949_s15, %s3528_s15   ;;  %s2856_s14 = sphi %s2947_s14, %s3527_s14   ;;  %s2852_s13 = sphi %s2945_s13, %s3526_s13  }
  0x10   : > { %3494 = sst [smem:[#allocation22_spill]] %s2864_s16  ;;  %s2187_s20 = sadd.s32 4294967294, %s2872_s18  }
  0x11   : > { %p71_p0 = scmp.ne.s32.totalorder %s2856_s14, %s2852_s13  ;;  %p3479_p1 = scmp.eq.s32.totalorder %s2976_s19, 0 }
  0x12   : > { %p299_p3 = scmp.eq.s32.totalorder %s2187_s20, 1  ;;  %p2188_p5 = scmp.ge.s32.totalorder %s2872_s18, 1 }
  0x13   : > { %p2985_p4 = por %p3479_p1, %p71_p0  ;;  %p306_p7 = scmp.lt.s32.totalorder %s2872_s18, 3 }
  0x14   : > { %p2990_p6 = por %p299_p3, %p71_p0  ;;  %s2874_s24 = smov [#allocation11]  }
  0x15   : > { %s3495_s21 = scalar_select %p2985_p4, 1, 0 }
  0x16   : > { %s3496_s22 = scalar_select %p2990_p6, 1, 0 }
  0x17   : > { %p2995_p8 = pnand %p2188_p5, %p306_p7  ;;  %s324_s25 = sshll.u32 %s2874_s24, 4  ;;  %s2999_s25 = int_to_ptr.vmem [resolvable:$true] %s324_s25 }
  0x18   : > { %3497 = sst [smem:[#allocation23_spill]] %s3496_s22  ;;  %s2875_s27 = smov [#allocation12]  }
  0x19   : > { %s3498_s23 = scalar_select %p2995_p8, 1, 0 }
  0x1a   : > { %p2526_p9 = pneg %p2995_p8  ;;  %s340_s28 = sshll.u32 %s2875_s27, 4  ;;  %s3010_s28 = int_to_ptr.vmem [resolvable:$true] %s340_s28 }
  0x1b   : > { %s3500_s4 = sld [smem:[#allocation25_spill]] }
  0x1c   : > { %p3006_p11 = pnand %p2526_p9, %p3479_p1 }
  0x1e   : > { %p3020_p13 = pneg %p3006_p11 }
  0x21   : > { %s2634_s11 = scalar_lea.hbm %s3500_s4, 8192 }
  0x22   : > { %p2635_p12 = scmp.ne.s32.totalorder %s3500_s4, %s2634_s11  ;;  %p2641_p5 = scmp.lt.u32.totalorder %s2634_s11, %s3500_s4 }
  0x24   : > { %p2637_p0 = pnand %p3020_p13, %p2635_p12 }
  0x26   : > { %p2638_p3 = pneg %p2637_p0 }
  0x28   : > { %p2643_p7 = pnand %p2641_p5, %p2638_p3 }
  0x2a   : > { %2646 = shalt.err (!%p2643_p7)
}
  0x2b   : > { %s2647_s29 = scalar_lea.vmem %s2999_s25, 8192  ;;  %p2655_p2 = scmp.lt.s32.totalorder %s2999_s25, %s2999_s25 }
  0x2c   : > { %p2648_p9 = scmp.ne.s32.totalorder %s2999_s25, %s2647_s29  ;;  %p2656_p6 = scmp.lt.s32.totalorder %s2647_s29, %s2647_s29 }
  0x2e   : > { %p2650_p10 = pnand %p2648_p9, %p3020_p13  ;;  %p2657_p12 = por %p2656_p6, %p2655_p2 }
  0x30   : > { %p2651_p1 = pneg %p2650_p10 }
  0x32   : > { %p2658_p0 = pnand %p2657_p12, %p2651_p1 }
  0x34   : > { %2661 = shalt.err (!%p2658_p0)
}
  0x35   : > { %s3482_s30 = smov 256   ;;  %s3483_s22 = smov 16  }
  0x36   : > { %2529 = dma.hbm_to_vmem [thread:$0]  (!%p3006_p11), %s3500_s4, 8192, %s2999_s25, [#allocation10], %s3482_s30, %s3482_s30, %s3483_s22  }
  0x37   : > { %s3502_s6 = sld [smem:[#allocation26_spill]] }
  0x3d   : > { %s2662_s29 = scalar_lea.hbm %s3502_s6, 16384 }
  0x3e   : > { %p2663_p1 = scmp.ne.s32.totalorder %s3502_s6, %s2662_s29  ;;  %p2669_p10 = scmp.lt.u32.totalorder %s2662_s29, %s3502_s6 }
  0x40   : > { %p2665_p2 = pnand %p2663_p1, %p3020_p13 }
  0x42   : > { %p2666_p6 = pneg %p2665_p2 }
  0x44   : > { %p2671_p3 = pnand %p2669_p10, %p2666_p6 }
  0x46   : > { %2674 = shalt.err (!%p2671_p3)
}
  0x47   : > { %s2675_s25 = scalar_lea.vmem %s3010_s28, 16384  ;;  %p2683_p12 = scmp.lt.s32.totalorder %s3010_s28, %s3010_s28 }
  0x48   : > { %p2676_p5 = scmp.ne.s32.totalorder %s3010_s28, %s2675_s25  ;;  %p2684_p0 = scmp.lt.s32.totalorder %s2675_s25, %s2675_s25 }
  0x4a   : > { %p2678_p7 = pnand %p2676_p5, %p3020_p13  ;;  %p2685_p1 = por %p2684_p0, %p2683_p12 }
  0x4c   : > { %p2679_p9 = pneg %p2678_p7 }
  0x4e   : > { %p2686_p2 = pnand %p2685_p1, %p2679_p9 }
  0x50   : > { %2689 = shalt.err (!%p2686_p2)
}
  0x51   : > { %s2878_s10 = smov 512   ;;  %s2879_s9 = smov 32  }
  0x52   : > { %2532 = dma.hbm_to_vmem [thread:$0]  (!%p3006_p11), %s3502_s6, 16384, %s3010_s28, [#allocation13], %s2878_s10, %s2878_s10, %s2879_s9  }
  0x53   : > { %s2880_s11 = smov [#allocation14]   ;;  %s3503_s8 = sld [smem:[#allocation27_spill]] }
  0x54   : > { %s356_s12 = sshll.u32 %s2880_s11, 4  ;;  %s357_s12 = int_to_ptr.vmem [resolvable:$true] %s356_s12 }
  0x59   : > { %s2690_s29 = scalar_lea.hbm %s3503_s8, 8192 }
  0x5a   : > { %p2691_p6 = scmp.ne.s32.totalorder %s3503_s8, %s2690_s29  ;;  %p2697_p5 = scmp.lt.u32.totalorder %s2690_s29, %s3503_s8 }
  0x5c   : > { %p2693_p10 = pnand %p2691_p6, %p3020_p13 }
  0x5e   : > { %p2694_p3 = pneg %p2693_p10 }
  0x60   : > { %p2699_p7 = pnand %p2697_p5, %p2694_p3 }
  0x62   : > { %2702 = shalt.err (!%p2699_p7)
}
  0x63   : > { %s2703_s28 = scalar_lea.vmem %s357_s12, 8192  ;;  %p2711_p1 = scmp.lt.s32.totalorder %s357_s12, %s357_s12 }
  0x64   : > { %p2704_p9 = scmp.ne.s32.totalorder %s357_s12, %s2703_s28  ;;  %p2712_p2 = scmp.lt.s32.totalorder %s2703_s28, %s2703_s28 }
  0x66   : > { %p2706_p12 = pnand %p2704_p9, %p3020_p13  ;;  %p2713_p4 = por %p2712_p2, %p2711_p1 }
  0x68   : > { %p2707_p0 = pneg %p2706_p12 }
  0x6a   : > { %p2714_p8 = pnand %p2713_p4, %p2707_p0 }
  0x6c   : > { %2717 = shalt.err (!%p2714_p8)
}
  0x6d   : > { %s3504_s30 = smov 16   ;;  %s3505_s10 = smov 256  }
  0x6e   : > { %2535 = dma.hbm_to_vmem [thread:$0]  (!%p3006_p11), %s3503_s8, 8192, %s357_s12, [#allocation13], %s3505_s10, %s3505_s10, %s3504_s30  }
  0x6f   : > { %s49_s24 = sadd.s32 1, %s2868_s17  ;;  %s58_s26 = sadd.s32 1, %s2860_s15 }
  0x70   : > { %p51_p4 = scmp.ge.s32.totalorder %s49_s24, 2  ;;  %p65_p8 = scmp.ne.s32.totalorder %s2860_s15, %s2856_s14 }
  0x71   : > { %p66_p13 = scmp.eq.s32.totalorder %s2872_s18, 0  ;;  %p3508_p10 = scmp.eq.s32.totalorder %s2976_s19, 1 }
  0x72   : > { %s3532_s24 = smov (%p51_p4, %s49_s24), 0  ;;  %p2550_p11 = scmp.lt.s32.totalorder %s2872_s18, 2 }
  0x73   : > { %3506 = sst [smem:[#allocation24_spill]] %s3532_s24  ;;  %p3095_p6 = por %p66_p13, %p65_p8 }
  0x74   : > { %p3101_p3 = por %p3508_p10, %p65_p8  ;;  %s53_s16 = ssub.s32 %s2868_s17, %s3532_s24 }
  0x75   : > { %p56_p5 = scmp.eq.s32.totalorder %s53_s16, 0  ;;  %s373_s11 = sand.u32 1, %s2860_s15  }
  0x76   : > { %s3509_s13 = scalar_select %p3101_p3, 1, 0 }
  0x77   : > { %s3109_s12 = sshll.u32 %s373_s11, 4  ;;  %s2221_s27 = sshll.u32 %s2868_s17, 8 }
  0x78   : > { %s3112_s20 = scalar_select %p56_p5, %s2860_s15, %s58_s26  }
  0x79   : > { %s3118_s28 = scalar_lea.hbm %s3467_s0, %s2221_s27  ;;  %s377_s30 = scalar_lea.vmem [#allocation6], %s3109_s12 }
  0x7a   : > { %s387_s10 = sshll.u32 %s377_s30, 4  ;;  %p3125_p7 = pnand %p2550_p11, %p3095_p6  ;;  %s3121_s10 = int_to_ptr.vmem [resolvable:$true] %s387_s10 }
  0x7b   : > { %s3132_s16 = scalar_lea.hbm %s3468_s1, %s2221_s27  ;;  %s394_s29 = sand.u32 1, %s2872_s18  }
  0x7c   : > { %s374_s25 = scalar_lea.sflag [#allocation7], %s373_s11  ;;  %s2718_s6 = scalar_lea.hbm %s3118_s28, 256 }
  0x7d   : > { %p2719_p9 = scmp.ne.s32.totalorder %s3118_s28, %s2718_s6  ;;  %p2720_p12 = pneg %p3125_p7 }
  0x7e   : > { %s2723_s8 = scalar_lea.hbm %s3467_s0, 512  ;;  %p2724_p2 = scmp.lt.u32.totalorder %s3118_s28, %s3467_s0 }
  0x7f   : > { %p2721_p0 = pnand %p2720_p12, %p2719_p9  ;;  %p2725_p4 = scmp.lt.u32.totalorder %s2723_s8, %s2718_s6 }
  0x80   : > { %p2727_p13 = scmp.lt.u32.totalorder %s2718_s6, %s3118_s28 }
  0x81   : > { %p2722_p1 = pneg %p2721_p0  ;;  %p2726_p8 = por %p2725_p4, %p2724_p2 }
  0x83   : > { %p2728_p6 = por %p2727_p13, %p2726_p8 }
  0x85   : > { %p2729_p10 = pnand %p2728_p6, %p2722_p1 }
  0x87   : > { %2732 = shalt.err (!%p2729_p10)
}
  0x88   : > { %s2733_s11 = scalar_lea.vmem %s3121_s10, 256  ;;  %s2881_s27 = smov [#allocation6]  }
  0x89   : > { %p2734_p11 = scmp.ne.s32.totalorder %s3121_s10, %s2733_s11  ;;  %s2738_s26 = sshll.u32 %s2881_s27, 4  ;;  %s2739_s26 = int_to_ptr.vmem [resolvable:$false] %s2738_s26 }
  0x8a   : > { %s2740_s24 = scalar_lea.vmem %s2739_s26, 512  ;;  %p2741_p0 = scmp.lt.s32.totalorder %s3121_s10, %s2739_s26 }
  0x8b   : > { %p2736_p5 = pnand %p2734_p11, %p2720_p12  ;;  %p2742_p2 = scmp.lt.s32.totalorder %s2740_s24, %s2733_s11 }
  0x8d   : > { %p2737_p9 = pneg %p2736_p5  ;;  %p2743_p4 = por %p2742_p2, %p2741_p0 }
  0x8f   : > { %p2744_p8 = pnand %p2743_p4, %p2737_p9 }
  0x91   : > { %2747 = shalt.err (!%p2744_p8)
}
  0x92   : > { %2539 = dma.hbm_to_vmem [thread:$0]  (!%p3125_p7), %s3118_s28, 256, %s3121_s10, %s374_s25  }
  0x93   : > { %s398_s6 = scalar_lea.vmem [#allocation9], %s3109_s12  ;;  %s395_s9 = scalar_lea.sflag [#allocation10], %s394_s29 }
  0x94   : > { %s408_s8 = sshll.u32 %s398_s6, 4  ;;  %s2748_s30 = scalar_lea.hbm %s3132_s16, 256  ;;  %s409_s8 = int_to_ptr.vmem [resolvable:$true] %s408_s8 }
  0x95   : > { %p2749_p1 = scmp.ne.s32.totalorder %s3132_s16, %s2748_s30  ;;  %s2753_s27 = scalar_lea.hbm %s3468_s1, 512 }
  0x96   : > { %p2754_p10 = scmp.lt.u32.totalorder %s3132_s16, %s3468_s1  ;;  %p2755_p11 = scmp.lt.u32.totalorder %s2753_s27, %s2748_s30 }
  0x97   : > { %p2751_p13 = pnand %p2749_p1, %p2720_p12  ;;  %p2757_p9 = scmp.lt.u32.totalorder %s2748_s30, %s3132_s16 }
  0x98   : > { %p2756_p5 = por %p2755_p11, %p2754_p10 }
  0x99   : > { %p2752_p6 = pneg %p2751_p13 }
  0x9a   : > { %p2758_p0 = por %p2757_p9, %p2756_p5 }
  0x9c   : > { %p2759_p2 = pnand %p2758_p0, %p2752_p6 }
  0x9e   : > { %2762 = shalt.err (!%p2759_p2)
}
  0x9f   : > { %s2763_s12 = scalar_lea.vmem %s409_s8, 256  ;;  %s2882_s28 = smov [#allocation9]  }
  0xa0   : > { %p2764_p4 = scmp.ne.s32.totalorder %s409_s8, %s2763_s12  ;;  %s2768_s10 = sshll.u32 %s2882_s28, 4  ;;  %s2769_s10 = int_to_ptr.vmem [resolvable:$false] %s2768_s10 }
  0xa1   : > { %s2770_s29 = scalar_lea.vmem %s2769_s10, 512  ;;  %p2771_p13 = scmp.lt.s32.totalorder %s409_s8, %s2769_s10 }
  0xa2   : > { %p2766_p8 = pnand %p2764_p4, %p2720_p12  ;;  %p2772_p3 = scmp.lt.s32.totalorder %s2770_s29, %s2763_s12 }
  0xa4   : > { %p2767_p1 = pneg %p2766_p8  ;;  %p2773_p10 = por %p2772_p3, %p2771_p13 }
  0xa6   : > { %p2774_p11 = pnand %p2773_p10, %p2767_p1 }
  0xa8   : > { %2777 = shalt.err (!%p2774_p11)
}
  0xa9   : > { %2542 = dma.hbm_to_vmem [thread:$0]  (!%p3125_p7), %s3132_s16, 256, %s409_s8, %s395_s9  }
  0xaa   : > { %p3511_p6 = scmp.ne.s32.totalorder %s3498_s23, 0 }
  0xab   : > { %s3185_s25 = sand.u32 (!%p3511_p6), 1, %s2856_s14   ;;  %p3512_p3 = scmp.ne.s32.totalorder (!%p3511_p6), %s3495_s21, 0 }
  0xac   : > { %417 = sbr.rel (%p3511_p6) target bundleno = 1794 (0x702), region = 60  ;;  %s3188_s6 = sshll.u32 (!%p3511_p6), %s3185_s25, 4 }
  0xad   : > { %s420_s30 = scalar_lea.sflag (!%p3511_p6), [#allocation7], %s3185_s25  ;;  %s3192_s22 = scalar_lea.vmem (!%p3511_p6), [#allocation6], %s3188_s6 }
  0xb3   : > { %2831 = dma.done.wait (%p3512_p3), %s420_s30, 256  }
  0xb4   : > { %2833 = vsyncadd (%p3512_p3), %s420_s30, 4294967040  ;;  %s428_s23 = sand.u32 1, %s2976_s19   ;;  %s432_s16 = scalar_lea.vmem [#allocation9], %s3188_s6 }
  0xb5   : > { %s429_s4 = scalar_lea.sflag [#allocation10], %s428_s23 }
  0xb6   : > { %2835 = dma.done.wait (%p3512_p3), %s429_s4, 256  }
  0xb7   : > { %2837 = vsyncadd (%p3512_p3), %s429_s4, 4294967040  ;;  %p3513_p7 = scmp.eq.s32.totalorder %s2976_s19, 0 }
  0xb9   : > { %2839 = dma.done.wait (%p3513_p7), [#allocation10], 8192   ;;  %p3514_p12 = pmov %p3513_p7 }
  0xba   : > { %p3515_p5 = pmov %p3513_p7 }
  0xbb   : > { %2841 = vsyncadd (%p3514_p12), [#allocation10], 4294959104 }
  0xbc   : > { %2843 = dma.done.wait (%p3515_p5), [#allocation13], 24576   ;;  %p3516_p9 = pmov %p3515_p5 }
  0xbd   : > { %v3212_v0 = vld [vmem:[%s432_s16] sm:$0xff]  ;;  %v3214_v1 = vld [vmem:[%s432_s16 + $0x8] sm:$0xff]  ;;  %vm2884_vm0 = vmmov 0   ;;  %vm804_vm1 = vcmask 7168   ;;  %vm1526_vm2 = vcmask 64512   ;;  %s3517_s30 = sld [smem:[#allocation22_spill]] }
  0xbe   : > { %2845 = vsyncadd (%p3516_p9), [#allocation13], 4294942720  ;;  %v3217_v2 = vld [vmem:[%s3192_s22] sm:$0xff]  ;;  %v815_v3 = vadd.f32 %v3214_v1, %v3212_v0  ;;  %v3222_v4 = vld [vmem:[%s3192_s22 + $0x8] sm:$0xff]  ;;  %s3518_s16 = sld [smem:[#allocation28_spill]]  ;;  %s485_s21 = scalar_lea.vmem [#allocation15], %s3188_s6 }
  0xbf   : > { %v494_v5 = vadd.f32 %v3222_v4, %v3217_v2  ;;  %v859_v6 = vld [vmem:[#allocation12 + $0x8] sm:$0xff]  ;;  %v858_v8 = vld [vmem:[#allocation12] sm:$0xff]  ;;  %v540_v12 = vld [vmem:[#allocation11 + $0x18] sm:$0xff]  ;;  %s2045_s8 = sshll.u32 %s485_s21, 4  ;;  %s3519_s27 = sld [smem:[#allocation29_spill]]  ;;  %s3420_s8 = int_to_ptr.vmem [resolvable:$true] %s2045_s8 }
  0xc0   : > { %816 = vadd.xlane.f32.xlu0 %v815_v3  ;;  %v863_v7 = vld [vmem:[#allocation12 + $0x28] sm:$0xff]  ;;  %v862_v10 = vld [vmem:[#allocation12 + $0x20] sm:$0xff]  ;;  %v539_v16 = vld [vmem:[#allocation11 + $0x10] sm:$0xff]  ;;  %s2029_s24 = scalar_lea.sflag [#allocation8], %s3185_s25  ;;  %p3520_p2 = scmp.ne.s32.totalorder %s3509_s13, 0 }
  0xc1   : > { %v2316_v9 = vpack.c.bf16 %v863_v7, %v859_v6  ;;  %v538_v11 = vld [vmem:[#allocation11 + $0x8] sm:$0xff]  ;;  %v2318_v13 = vpack.c.bf16 %v862_v10, %v858_v8  ;;  %v537_v15 = vld [vmem:[#allocation11] sm:$0xff]  ;;  %v544_v25 = vld [vmem:[#allocation11 + $0x38] sm:$0xff]  ;;  %s2889_s6 = smov [#allocation15]  }
  0xc2   : > { %v2252_v14 = vpack.c.bf16 %v540_v12, %v538_v11  ;;  %v867_v17 = vld [vmem:[#allocation12 + $0x48] sm:$0xff]  ;;  %v2254_v18 = vpack.c.bf16 %v539_v16, %v537_v15  ;;  %v866_v20 = vld [vmem:[#allocation12 + $0x40] sm:$0xff]  ;;  %v543_v28 = vld [vmem:[#allocation11 + $0x30] sm:$0xff]  ;;  %s2782_s12 = sshll.u32 %s2889_s6, 4  ;;  %s2783_s12 = int_to_ptr.vmem [resolvable:$false] %s2782_s12 }
  0xc3   : > { %2317 = vmatprep.subr.bf16.mxu1 %v2316_v9  ;;  %v871_v19 = vld [vmem:[#allocation12 + $0x68] sm:$0xff]  ;;  %v870_v21 = vld [vmem:[#allocation12 + $0x60] sm:$0xff]  ;;  %v548_v36 = vld [vmem:[#allocation11 + $0x58] sm:$0xff]  ;;  %s2223_s19 = sshll.u32 %s3517_s30, 8  ;;  %s2784_s28 = scalar_lea.vmem %s2783_s12, 512 }
  0xc4   : > { %495 = vadd.xlane.f32.xlu0 %v494_v5  ;;  %2319 = vmatpush1.bf16.msra.mxu1 %v2318_v13  ;;  %v2320_v22 = vpack.c.bf16 %v871_v19, %v867_v17  ;;  %v2322_v23 = vpack.c.bf16 %v870_v21, %v866_v20  ;;  %v542_v24 = vld [vmem:[#allocation11 + $0x28] sm:$0xff]  ;;  %v541_v26 = vld [vmem:[#allocation11 + $0x20] sm:$0xff]  ;;  %v547_v38 = vld [vmem:[#allocation11 + $0x50] sm:$0xff]  ;;  %p2785_p1 = scmp.lt.s32.totalorder %s3420_s8, %s2783_s12 }
  0xc5   : > { %2253 = vmatprep.subr.bf16.mxu0 %v2252_v14  ;;  %v2256_v27 = vpack.c.bf16 %v544_v25, %v542_v24  ;;  %v875_v29 = vld [vmem:[#allocation12 + $0x88] sm:$0xff]  ;;  %v2258_v31 = vpack.c.bf16 %v543_v28, %v541_v26  ;;  %v874_v33 = vld [vmem:[#allocation12 + $0x80] sm:$0xff]  ;;  %v552_v48 = vld [vmem:[#allocation11 + $0x78] sm:$0xff]  ;;  %s3418_s26 = scalar_lea.hbm %s3519_s27, %s2223_s19 }
  0xc6   : > { %2255 = vmatpush1.bf16.msra.mxu0 %v2254_v18  ;;  %v879_v30 = vld [vmem:[#allocation12 + $0xa8] sm:$0xff]  ;;  %2321 = vmatprep.subr.bf16.mxu1 %v2320_v22  ;;  %v878_v34 = vld [vmem:[#allocation12 + $0xa0] sm:$0xff]  ;;  %v551_v51 = vld [vmem:[#allocation11 + $0x70] sm:$0xff] }
  0xc7   : > { %v2324_v32 = vpack.c.bf16 %v879_v30, %v875_v29  ;;  %v546_v35 = vld [vmem:[#allocation11 + $0x48] sm:$0xff]  ;;  %2257 = vmatprep.subr.bf16.mxu0 %v2256_v27  ;;  %v545_v37 = vld [vmem:[#allocation11 + $0x40] sm:$0xff]  ;;  %v2326_v39 = vpack.c.bf16 %v878_v34, %v874_v33  ;;  %v556_v56 = vld [vmem:[#allocation11 + $0x98] sm:$0xff] }
  0xc8   : > { %2323 = vmatpush1.bf16.msra.mxu1 %v2322_v23  ;;  %v2260_v40 = vpack.c.bf16 %v548_v36, %v546_v35  ;;  %v883_v41 = vld [vmem:[#allocation12 + $0xc8] sm:$0xff]  ;;  %v882_v43 = vld [vmem:[#allocation12 + $0xc0] sm:$0xff]  ;;  %v2262_v44 = vpack.c.bf16 %v547_v38, %v545_v37  ;;  %v555_v63 = vld [vmem:[#allocation11 + $0x90] sm:$0xff] }
  0xc9   : > { %v887_v42 = vld [vmem:[#allocation12 + $0xe8] sm:$0xff]  ;;  %2325 = vmatprep.subr.bf16.mxu1 %v2324_v32  ;;  %v886_v46 = vld [vmem:[#allocation12 + $0xe0] sm:$0xff]  ;;  %v560_v7 = vld [vmem:[#allocation11 + $0xb8] sm:$0xff] }
  0xca   : > { %2259 = vmatpush1.bf16.msra.mxu0 %v2258_v31  ;;  %v2328_v45 = vpack.c.bf16 %v887_v42, %v883_v41  ;;  %v550_v47 = vld [vmem:[#allocation11 + $0x68] sm:$0xff]  ;;  %v549_v50 = vld [vmem:[#allocation11 + $0x60] sm:$0xff]  ;;  %v2330_v54 = vpack.c.bf16 %v886_v46, %v882_v43  ;;  %v559_v15 = vld [vmem:[#allocation11 + $0xb0] sm:$0xff] }
  0xcb   : > { %2261 = vmatprep.subr.bf16.mxu0 %v2260_v40  ;;  %v2264_v49 = vpack.c.bf16 %v552_v48, %v550_v47  ;;  %v891_v52 = vld [vmem:[#allocation12 + $0x108] sm:$0xff]  ;;  %v2266_v57 = vpack.c.bf16 %v551_v51, %v549_v50  ;;  %v890_v59 = vld [vmem:[#allocation12 + $0x100] sm:$0xff]  ;;  %v564_v19 = vld [vmem:[#allocation11 + $0xd8] sm:$0xff] }
  0xcc   : > { %v895_v53 = vld [vmem:[#allocation12 + $0x128] sm:$0xff]  ;;  %2327 = vmatpush1.bf16.msra.mxu1 %v2326_v39  ;;  %v894_v60 = vld [vmem:[#allocation12 + $0x120] sm:$0xff]  ;;  %v563_v27 = vld [vmem:[#allocation11 + $0xd0] sm:$0xff] }
  0xcd   : > { %v554_v55 = vld [vmem:[#allocation11 + $0x88] sm:$0xff]  ;;  %2329 = vmatprep.subr.bf16.mxu1 %v2328_v45  ;;  %v2332_v58 = vpack.c.bf16 %v895_v53, %v891_v52  ;;  %v553_v61 = vld [vmem:[#allocation11 + $0x80] sm:$0xff]  ;;  %v2334_v8 = vpack.c.bf16 %v894_v60, %v890_v59  ;;  %v568_v31 = vld [vmem:[#allocation11 + $0xf8] sm:$0xff] }
  0xce   : > { %2263 = vmatpush1.bf16.msra.mxu0 %v2262_v44  ;;  %v2268_v62 = vpack.c.bf16 %v556_v56, %v554_v55  ;;  %v899_v3 = vld [vmem:[#allocation12 + $0x148] sm:$0xff]  ;;  %v2270_v9 = vpack.c.bf16 %v555_v63, %v553_v61  ;;  %v898_v11 = vld [vmem:[#allocation12 + $0x140] sm:$0xff]  ;;  %v567_v39 = vld [vmem:[#allocation11 + $0xf0] sm:$0xff] }
  0xcf   : > { %2265 = vmatprep.subr.bf16.mxu0 %v2264_v49  ;;  %v903_v5 = vld [vmem:[#allocation12 + $0x168] sm:$0xff]  ;;  %v902_v12 = vld [vmem:[#allocation12 + $0x160] sm:$0xff]  ;;  %v572_v43 = vld [vmem:[#allocation11 + $0x118] sm:$0xff] }
  0xd0   : > { %v558_v6 = vld [vmem:[#allocation11 + $0xa8] sm:$0xff]  ;;  %2331 = vmatpush1.bf16.msra.mxu1 %v2330_v54  ;;  %v2336_v10 = vpack.c.bf16 %v903_v5, %v899_v3  ;;  %v557_v13 = vld [vmem:[#allocation11 + $0xa0] sm:$0xff]  ;;  %v2338_v20 = vpack.c.bf16 %v902_v12, %v898_v11  ;;  %v571_v51 = vld [vmem:[#allocation11 + $0x110] sm:$0xff] }
  0xd1   : > { %2333 = vmatprep.subr.bf16.mxu1 %v2332_v58  ;;  %v2272_v14 = vpack.c.bf16 %v560_v7, %v558_v6  ;;  %v907_v16 = vld [vmem:[#allocation12 + $0x188] sm:$0xff]  ;;  %v2274_v21 = vpack.c.bf16 %v559_v15, %v557_v13  ;;  %v906_v23 = vld [vmem:[#allocation12 + $0x180] sm:$0xff]  ;;  %v576_v55 = vld [vmem:[#allocation11 + $0x138] sm:$0xff] }
  0xd2   : > { %2267 = vmatpush1.bf16.msra.mxu0 %v2266_v57  ;;  %v911_v17 = vld [vmem:[#allocation12 + $0x1a8] sm:$0xff]  ;;  %v910_v24 = vld [vmem:[#allocation12 + $0x1a0] sm:$0xff]  ;;  %v575_v63 = vld [vmem:[#allocation11 + $0x130] sm:$0xff] }
  0xd3   : > { %2269 = vmatprep.subr.bf16.mxu0 %v2268_v62  ;;  %v562_v18 = vld [vmem:[#allocation11 + $0xc8] sm:$0xff]  ;;  %v2340_v22 = vpack.c.bf16 %v911_v17, %v907_v16  ;;  %v561_v25 = vld [vmem:[#allocation11 + $0xc0] sm:$0xff]  ;;  %v2342_v32 = vpack.c.bf16 %v910_v24, %v906_v23 }
  0xd4   : > { %2335 = vmatpush1.bf16.msra.mxu1 %v2334_v8  ;;  %v2276_v26 = vpack.c.bf16 %v564_v19, %v562_v18  ;;  %v915_v28 = vld [vmem:[#allocation12 + $0x1c8] sm:$0xff]  ;;  %v2278_v33 = vpack.c.bf16 %v563_v27, %v561_v25  ;;  %v914_v35 = vld [vmem:[#allocation12 + $0x1c0] sm:$0xff]  ;;  %v580_v25 = vld [vmem:[#allocation11 + $0x158] sm:$0xff] }
  0xd5   : > { %2337 = vmatprep.subr.bf16.mxu1 %v2336_v10  ;;  %v919_v29 = vld [vmem:[#allocation12 + $0x1e8] sm:$0xff]  ;;  %v918_v36 = vld [vmem:[#allocation12 + $0x1e0] sm:$0xff] }
  0xd6   : > { %2271 = vmatpush1.bf16.msra.mxu0 %v2270_v9  ;;  %v566_v30 = vld [vmem:[#allocation11 + $0xe8] sm:$0xff]  ;;  %v2344_v34 = vpack.c.bf16 %v919_v29, %v915_v28  ;;  %v565_v37 = vld [vmem:[#allocation11 + $0xe0] sm:$0xff]  ;;  %v2346_v44 = vpack.c.bf16 %v918_v36, %v914_v35  ;;  %v579_v28 = vld [vmem:[#allocation11 + $0x150] sm:$0xff] }
  0xd7   : > { %2273 = vmatprep.subr.bf16.mxu0 %v2272_v14  ;;  %v2280_v38 = vpack.c.bf16 %v568_v31, %v566_v30  ;;  %v923_v40 = vld [vmem:[#allocation12 + $0x208] sm:$0xff]  ;;  %v2282_v45 = vpack.c.bf16 %v567_v39, %v565_v37  ;;  %v922_v47 = vld [vmem:[#allocation12 + $0x200] sm:$0xff]  ;;  %v584_v35 = vld [vmem:[#allocation11 + $0x178] sm:$0xff] }
  0xd8   : > { %2339 = vmatpush1.bf16.msra.mxu1 %v2338_v20  ;;  %v927_v41 = vld [vmem:[#allocation12 + $0x228] sm:$0xff]  ;;  %v926_v48 = vld [vmem:[#allocation12 + $0x220] sm:$0xff] }
  0xd9   : > { %2341 = vmatprep.subr.bf16.mxu1 %v2340_v22  ;;  %v570_v42 = vld [vmem:[#allocation11 + $0x108] sm:$0xff]  ;;  %v2348_v46 = vpack.c.bf16 %v927_v41, %v923_v40  ;;  %v569_v49 = vld [vmem:[#allocation11 + $0x100] sm:$0xff]  ;;  %v2350_v56 = vpack.c.bf16 %v926_v48, %v922_v47  ;;  %v588_v47 = vld [vmem:[#allocation11 + $0x198] sm:$0xff] }
  0xda   : > { %2275 = vmatpush1.bf16.msra.mxu0 %v2274_v21  ;;  %v2284_v50 = vpack.c.bf16 %v572_v43, %v570_v42  ;;  %v931_v52 = vld [vmem:[#allocation12 + $0x248] sm:$0xff]  ;;  %v2286_v57 = vpack.c.bf16 %v571_v51, %v569_v49  ;;  %v930_v59 = vld [vmem:[#allocation12 + $0x240] sm:$0xff] }
  0xdb   : > { %2277 = vmatprep.subr.bf16.mxu0 %v2276_v26  ;;  %v935_v53 = vld [vmem:[#allocation12 + $0x268] sm:$0xff]  ;;  %v934_v60 = vld [vmem:[#allocation12 + $0x260] sm:$0xff] }
  0xdc   : > { %2343 = vmatpush1.bf16.msra.mxu1 %v2342_v32  ;;  %v574_v54 = vld [vmem:[#allocation11 + $0x128] sm:$0xff]  ;;  %v2352_v58 = vpack.c.bf16 %v935_v53, %v931_v52  ;;  %v573_v61 = vld [vmem:[#allocation11 + $0x120] sm:$0xff]  ;;  %v2354_v6 = vpack.c.bf16 %v934_v60, %v930_v59  ;;  %v592_v59 = vld [vmem:[#allocation11 + $0x1b8] sm:$0xff] }
  0xdd   : > { %2345 = vmatprep.subr.bf16.mxu1 %v2344_v34  ;;  %v2288_v62 = vpack.c.bf16 %v576_v55, %v574_v54  ;;  %v939_v3 = vld [vmem:[#allocation12 + $0x288] sm:$0xff]  ;;  %v2290_v7 = vpack.c.bf16 %v575_v63, %v573_v61  ;;  %v938_v9 = vld [vmem:[#allocation12 + $0x280] sm:$0xff] }
  0xde   : > { %2279 = vmatpush1.bf16.msra.mxu0 %v2278_v33  ;;  %v943_v5 = vld [vmem:[#allocation12 + $0x2a8] sm:$0xff]  ;;  %v942_v10 = vld [vmem:[#allocation12 + $0x2a0] sm:$0xff] }
  0xdf   : > { %2281 = vmatprep.subr.bf16.mxu0 %v2280_v38  ;;  %v2356_v8 = vpack.c.bf16 %v943_v5, %v939_v3  ;;  %v2358_v11 = vpack.c.bf16 %v942_v10, %v938_v9  ;;  %v578_v24 = vld [vmem:[#allocation11 + $0x148] sm:$0xff]  ;;  %v577_v27 = vld [vmem:[#allocation11 + $0x140] sm:$0xff]  ;;  %v583_v38 = vld [vmem:[#allocation11 + $0x170] sm:$0xff] }
  0xe0   : > { %2347 = vmatpush1.bf16.msra.mxu1 %v2346_v44  ;;  %v2292_v26 = vpack.c.bf16 %v580_v25, %v578_v24  ;;  %v2294_v29 = vpack.c.bf16 %v579_v28, %v577_v27  ;;  %v951_v30 = vld [vmem:[#allocation12 + $0x2e8] sm:$0xff]  ;;  %v950_v31 = vld [vmem:[#allocation12 + $0x2e0] sm:$0xff]  ;;  %v600_v24 = vld [vmem:[#allocation11 + $0x1f8] sm:$0xff] }
  0xe1   : > { %2349 = vmatprep.subr.bf16.mxu1 %v2348_v46  ;;  %v582_v34 = vld [vmem:[#allocation11 + $0x168] sm:$0xff]  ;;  %v581_v37 = vld [vmem:[#allocation11 + $0x160] sm:$0xff]  ;;  %v599_v28 = vld [vmem:[#allocation11 + $0x1f0] sm:$0xff] }
  0xe2   : > { %2283 = vmatpush1.bf16.msra.mxu0 %v2282_v45  ;;  %v2296_v36 = vpack.c.bf16 %v584_v35, %v582_v34  ;;  %v955_v39 = vld [vmem:[#allocation12 + $0x308] sm:$0xff]  ;;  %v2298_v40 = vpack.c.bf16 %v583_v38, %v581_v37  ;;  %v954_v42 = vld [vmem:[#allocation12 + $0x300] sm:$0xff]  ;;  %v512_v34 = vlaneseq }
  0xe3   : > { %2285 = vmatprep.subr.bf16.mxu0 %v2284_v50  ;;  %v959_v41 = vld [vmem:[#allocation12 + $0x328] sm:$0xff]  ;;  %v958_v43 = vld [vmem:[#allocation12 + $0x320] sm:$0xff]  ;;  %v587_v50 = vld [vmem:[#allocation11 + $0x190] sm:$0xff] }
  0xe4   : > { %2351 = vmatpush1.bf16.msra.mxu1 %v2350_v56  ;;  %v2364_v44 = vpack.c.bf16 %v959_v41, %v955_v39  ;;  %v2366_v45 = vpack.c.bf16 %v958_v43, %v954_v42  ;;  %v586_v46 = vld [vmem:[#allocation11 + $0x188] sm:$0xff]  ;;  %v585_v49 = vld [vmem:[#allocation11 + $0x180] sm:$0xff]  ;;  %v3247_v38 = vshrl.u32 %v512_v34, 7 }
  0xe5   : > { %2353 = vmatprep.subr.bf16.mxu1 %v2352_v58  ;;  %v2300_v48 = vpack.c.bf16 %v588_v47, %v586_v46  ;;  %v963_v51 = vld [vmem:[#allocation12 + $0x348] sm:$0xff]  ;;  %v2302_v52 = vpack.c.bf16 %v587_v50, %v585_v49  ;;  %v962_v54 = vld [vmem:[#allocation12 + $0x340] sm:$0xff] }
  0xe6   : > { %2287 = vmatpush1.bf16.msra.mxu0 %v2286_v57  ;;  %v967_v53 = vld [vmem:[#allocation12 + $0x368] sm:$0xff]  ;;  %v966_v55 = vld [vmem:[#allocation12 + $0x360] sm:$0xff]  ;;  %v3253_v41 = vsub.s32 1, %v3247_v38 }
  0xe7   : > { %2289 = vmatprep.subr.bf16.mxu0 %v2288_v62  ;;  %v2368_v56 = vpack.c.bf16 %v967_v53, %v963_v51  ;;  %v2370_v57 = vpack.c.bf16 %v966_v55, %v962_v54  ;;  %v590_v58 = vld [vmem:[#allocation11 + $0x1a8] sm:$0xff]  ;;  %v589_v60 = vld [vmem:[#allocation11 + $0x1a0] sm:$0xff]  ;;  %v591_v62 = vld [vmem:[#allocation11 + $0x1b0] sm:$0xff] }
  0xe8   : > { %2355 = vmatpush1.bf16.msra.mxu1 %v2354_v6  ;;  %v2304_v61 = vpack.c.bf16 %v592_v59, %v590_v58  ;;  %v971_v63 = vld [vmem:[#allocation12 + $0x388] sm:$0xff]  ;;  %v2306_v5 = vpack.c.bf16 %v591_v62, %v589_v60  ;;  %v597_v27 = vld [vmem:[#allocation11 + $0x1e0] sm:$0xff]  ;;  %v860_v62 = vld [vmem:[#allocation12 + $0x10] sm:$0xff] }
  0xe9   : > { %2357 = vmatprep.subr.bf16.mxu1 %v2356_v8  ;;  %v975_v3 = vld [vmem:[#allocation12 + $0x3a8] sm:$0xff]  ;;  %v974_v8 = vld [vmem:[#allocation12 + $0x3a0] sm:$0xff] }
  0xea   : > { %2291 = vmatpush1.bf16.msra.mxu0 %v2290_v7  ;;  %v2372_v6 = vpack.c.bf16 %v975_v3, %v971_v63  ;;  %v970_v7 = vld [vmem:[#allocation12 + $0x380] sm:$0xff]  ;;  %v594_v9 = vld [vmem:[#allocation11 + $0x1c8] sm:$0xff]  ;;  %v864_v63 = vld [vmem:[#allocation12 + $0x30] sm:$0xff] }
  0xeb   : > { %2293 = vmatprep.subr.bf16.mxu0 %v2292_v26  ;;  %v2374_v10 = vpack.c.bf16 %v974_v8, %v970_v7  ;;  %v813_v42 = vld [vmem:[%s3469_s2] sm:$0x3]  ;;  %v873_v7 = vld [vmem:[#allocation12 + $0x78] sm:$0xff] }
  0xec   : > { %2359 = vmatpush1.bf16.msra.mxu1 %v2358_v11  ;;  %v596_v11 = vld [vmem:[#allocation11 + $0x1d8] sm:$0xff]  ;;  %v814_v43 = vld [vmem:[%s3470_s3] sm:$0x3] }
  0xed   : > { %v492_v47 = vld [vmem:[%s3469_s2] sm:$0x3]  ;;  %v853_v50 = vrot.slane %v814_v43, %v3253_v41 }
  0xee   : > { %2295 = vmatpush1.bf16.msra.mxu0 %v2294_v29  ;;  %v861_v29 = vld [vmem:[#allocation12 + $0x18] sm:$0xff] }
  0xef   : > { %2297 = vmatprep.subr.bf16.mxu0 %v2296_v36 }
  0xf2   : > { %2299 = vmatpush1.bf16.msra.mxu0 %v2298_v40  ;;  %v3250_v40 = vsub.s32 0, %v3247_v38 }
  0xf3   : > { %2301 = vmatprep.subr.bf16.mxu0 %v2300_v48 }
  0xf4   : > { %v849_v49 = vrot.slane %v814_v43, %v3250_v40  ;;  %v515_v55 = vrot.slane %v492_v47, %v3250_v40 }
  0xf6   : > { %2303 = vmatpush1.bf16.msra.mxu0 %v2302_v52  ;;  %v493_v52 = vld [vmem:[%s3470_s3] sm:$0x3] }
  0xf7   : > { %2305 = vmatprep.subr.bf16.mxu0 %v2304_v61  ;;  %v528_v58 = vrot.slane %v493_v52, %v3250_v40 }
  0xfa   : > { %2307 = vmatpush1.bf16.msra.mxu0 %v2306_v5 }
 0x14d   : > { %v817_v12 = vpop.xlane.xlu0 %816 }
 0x14e   : > { %v819_v13 = vmul.f32 0.00390625, %v817_v12  ;;  %v593_v12 = vld [vmem:[#allocation11 + $0x1c0] sm:$0xff] }
 0x150   : > { %v3227_v14 = vsub.f32 %v3212_v0, %v819_v13  ;;  %v3230_v15 = vsub.f32 %v3214_v1, %v819_v13  ;;  %v595_v13 = vld [vmem:[#allocation11 + $0x1d0] sm:$0xff] }
 0x151   : > { %v496_v16 = vpop.xlane.xlu0 %495 }
 0x152   : > { %v498_v17 = vmul.f32 0.00390625, %v496_v16  ;;  %v822_v18 = vmul.f32 %v3227_v14, %v3227_v14  ;;  %v823_v19 = vmul.f32 %v3230_v15, %v3230_v15  ;;  %v2308_v16 = vpack.c.bf16 %v596_v11, %v594_v9 }
 0x154   : > { %v3237_v20 = vsub.f32 %v3217_v2, %v498_v17  ;;  %v3240_v21 = vsub.f32 %v3222_v4, %v498_v17  ;;  %v824_v22 = vadd.f32 %v823_v19, %v822_v18  ;;  %v947_v2 = vld [vmem:[#allocation12 + $0x2c8] sm:$0xff]  ;;  %v946_v4 = vld [vmem:[#allocation12 + $0x2c0] sm:$0xff]  ;;  %2309 = vmatprep.subr.bf16.mxu0 %v2308_v16  ;;  %v877_v16 = vld [vmem:[#allocation12 + $0x98] sm:$0xff] }
 0x155   : > { %v2360_v32 = vpack.c.bf16 %v951_v30, %v947_v2  ;;  %v2362_v33 = vpack.c.bf16 %v950_v31, %v946_v4  ;;  %v979_v17 = vld [vmem:[#allocation12 + $0x3c8] sm:$0xff]  ;;  %v978_v19 = vld [vmem:[#allocation12 + $0x3c0] sm:$0xff]  ;;  %v2314_v2 = vpack.c.bf16 %v599_v28, %v597_v27  ;;  %v865_v30 = vld [vmem:[#allocation12 + $0x38] sm:$0xff]  ;;  %v2883_v31 = vmov 0.0  }
 0x156   : > { %825 = vadd.xlane.f32.xlu1 %v824_v22  ;;  %v501_v0 = vmul.f32 %v3237_v20, %v3237_v20  ;;  %v502_v1 = vmul.f32 %v3240_v21, %v3240_v21  ;;  %v983_v18 = vld [vmem:[#allocation12 + $0x3e8] sm:$0xff]  ;;  %v2310_v22 = vpack.c.bf16 %v595_v13, %v593_v12  ;;  %v2380_v4 = vpack.c.bf16 %v865_v30, %v861_v29  ;;  %v868_v12 = vld [vmem:[#allocation12 + $0x50] sm:$0xff]  ;;  %v897_v27 = vld [vmem:[#allocation12 + $0x138] sm:$0xff] }
 0x157   : > { %2361 = vmatprep.subr.bf16.mxu1 %v2360_v32  ;;  %v872_v13 = vld [vmem:[#allocation12 + $0x70] sm:$0xff]  ;;  %807 = vst.msk [vmem:[#allocation4] sm:$0xff] %vm804_vm1, %v2883_v31  ;;  %808 = vst.msk [vmem:[#allocation4 + $0x8] sm:$0xff] %vm804_vm1, %v2883_v31 }
 0x158   : > { %v503_v23 = vadd.f32 %v502_v1, %v501_v0  ;;  %2363 = vmatpush1.bf16.msra.mxu1 %v2362_v33  ;;  %v2376_v0 = vpack.c.bf16 %v983_v18, %v979_v17  ;;  %v982_v1 = vld [vmem:[#allocation12 + $0x3e0] sm:$0xff]  ;;  %2311 = vmatpush1.bf16.msra.mxu0 %v2310_v22  ;;  %v876_v18 = vld [vmem:[#allocation12 + $0x90] sm:$0xff]  ;;  %v885_v22 = vld [vmem:[#allocation12 + $0xd8] sm:$0xff] }
 0x159   : > { %2365 = vmatprep.subr.bf16.mxu1 %v2364_v44  ;;  %v2378_v26 = vpack.c.bf16 %v982_v1, %v978_v19  ;;  %v836_v44 = vrot.slane %v813_v42, %v3250_v40  ;;  %v880_v19 = vld [vmem:[#allocation12 + $0xb0] sm:$0xff] }
 0x15a   : > { %504 = vadd.xlane.f32.xlu1 %v503_v23  ;;  %v598_v23 = vld [vmem:[#allocation11 + $0x1e8] sm:$0xff]  ;;  %v2390_v1 = vpack.c.bf16 %v880_v19, %v876_v18  ;;  %v892_v29 = vld [vmem:[#allocation12 + $0x110] sm:$0xff] }
 0x15b   : > { %v2312_v25 = vpack.c.bf16 %v600_v24, %v598_v23  ;;  %v884_v24 = vld [vmem:[#allocation12 + $0xd0] sm:$0xff] }
 0x15c   : > { %2367 = vmatpush1.bf16.msra.mxu1 %v2366_v45  ;;  %v840_v45 = vrot.slane %v813_v42, %v3253_v41  ;;  %v896_v30 = vld [vmem:[#allocation12 + $0x130] sm:$0xff] }
 0x15d   : > { %2369 = vmatprep.subr.bf16.mxu1 %v2368_v56  ;;  %2313 = vmatprep.subr.bf16.mxu0 %v2312_v25  ;;  %v519_v56 = vrot.slane %v492_v47, %v3253_v41  ;;  %v888_v25 = vld [vmem:[#allocation12 + $0xf0] sm:$0xff]  ;;  %v921_v47 = vld [vmem:[#allocation12 + $0x1f8] sm:$0xff] }
 0x15e   : > { %2315 = vmatpush1.bf16.msra.mxu0 %v2314_v2  ;;  %v2394_v28 = vpack.c.bf16 %v888_v25, %v884_v24  ;;  %v956_v19 = vld [vmem:[#allocation12 + $0x310] sm:$0xff] }
 0x15f   : > { %2381 = vmatprep.subr.bf16.mxu0 %v2380_v4  ;;  %v901_v4 = vld [vmem:[#allocation12 + $0x158] sm:$0xff]  ;;  %v964_v25 = vld [vmem:[#allocation12 + $0x350] sm:$0xff] }
 0x160   : > { %2371 = vmatpush1.bf16.msra.mxu1 %v2370_v57 }
 0x161   : > { %2373 = vmatprep.subr.bf16.mxu1 %v2372_v6  ;;  %v869_v6 = vld [vmem:[#allocation12 + $0x58] sm:$0xff] }
 0x162   : > { %v2384_v11 = vpack.c.bf16 %v873_v7, %v869_v6  ;;  %v940_v7 = vld [vmem:[#allocation12 + $0x290] sm:$0xff] }
 0x164   : > { %2375 = vmatpush1.bf16.msra.mxu1 %v2374_v10  ;;  %v2382_v10 = vpack.c.bf16 %v864_v63, %v860_v62  ;;  %v936_v62 = vld [vmem:[#allocation12 + $0x270] sm:$0xff]  ;;  %v941_v63 = vld [vmem:[#allocation12 + $0x298] sm:$0xff] }
 0x165   : > { %2377 = vmatprep.subr.bf16.mxu1 %v2376_v0  ;;  %v889_v0 = vld [vmem:[#allocation12 + $0xf8] sm:$0xff] }
 0x166   : > { %v2392_v23 = vpack.c.bf16 %v889_v0, %v885_v22  ;;  %v960_v22 = vld [vmem:[#allocation12 + $0x330] sm:$0xff]  ;;  %v965_v0 = vld [vmem:[#allocation12 + $0x358] sm:$0xff] }
 0x168   : > { %2379 = vmatpush1.bf16.msra.mxu1 %v2378_v26  ;;  %v893_v26 = vld [vmem:[#allocation12 + $0x118] sm:$0xff] }
 0x169   : > { %2242 = vmatprep.subr.mxu1 %v2883_v31  ;;  %v2396_v2 = vpack.c.bf16 %v897_v27, %v893_v26  ;;  %v968_v26 = vld [vmem:[#allocation12 + $0x370] sm:$0xff]  ;;  %v973_v27 = vld [vmem:[#allocation12 + $0x398] sm:$0xff] }
 0x1e3   : > { %v826_v32 = vpop.xlane.xlu1 %825 }
 0x1e4   : > { %v827_v33 = vmul.f32 0.00390625, %v826_v32  ;;  %v905_v32 = vld [vmem:[#allocation12 + $0x178] sm:$0xff] }
 0x1e5   : > { %v2400_v34 = vpack.c.bf16 %v905_v32, %v901_v4  ;;  %v976_v4 = vld [vmem:[#allocation12 + $0x3b0] sm:$0xff]  ;;  %v981_v32 = vld [vmem:[#allocation12 + $0x3d8] sm:$0xff] }
 0x1e6   : > { %v828_v35 = vadd.f32 1e-05, %v827_v33  ;;  %v2398_v33 = vpack.c.bf16 %v896_v30, %v892_v29  ;;  %v972_v30 = vld [vmem:[#allocation12 + $0x390] sm:$0xff] }
 0x1e7   : > { %v505_v36 = vpop.xlane.xlu1 %504 }
 0x1e8   : > { %2618 = vrsqrt.f32 %v828_v35  ;;  %v506_v37 = vmul.f32 0.00390625, %v505_v36  ;;  %v900_v35 = vld [vmem:[#allocation12 + $0x150] sm:$0xff] }
 0x1e9   : > { %v904_v36 = vld [vmem:[#allocation12 + $0x170] sm:$0xff] }
 0x1ea   : > { %v507_v39 = vadd.f32 1e-05, %v506_v37  ;;  %v909_v37 = vld [vmem:[#allocation12 + $0x198] sm:$0xff]  ;;  %v2402_v42 = vpack.c.bf16 %v904_v36, %v900_v35  ;;  %v980_v36 = vld [vmem:[#allocation12 + $0x3d0] sm:$0xff] }
 0x1ec   : > { %2620 = vrsqrt.f32 %v507_v39  ;;  %v913_v39 = vld [vmem:[#allocation12 + $0x1b8] sm:$0xff] }
 0x1ed   : > { %v2404_v43 = vpack.c.bf16 %v913_v39, %v909_v37  ;;  %v984_v37 = vld [vmem:[#allocation12 + $0x3f0] sm:$0xff] }
 0x1ee   : > { %v2442_v39 = vpack.c.bf16 %v984_v37, %v980_v36 }
 0x1f2   : > { %v2619_v46 = vpop.eup %2618 }
 0x1f3   : > { %v831_v48 = vmul.f32 %v2619_v46, %v3230_v15  ;;  %v830_v51 = vmul.f32 %v2619_v46, %v3227_v14  ;;  %v532_v15 = vrot.slane %v493_v52, %v3253_v41  ;;  %v917_v46 = vld [vmem:[#allocation12 + $0x1d8] sm:$0xff] }
 0x1f4   : > { %v925_v52 = vld [vmem:[#allocation12 + $0x218] sm:$0xff] }
 0x1f5   : > { %v844_v53 = vmul.f32 %v840_v45, %v831_v48  ;;  %v843_v54 = vmul.f32 %v836_v44, %v830_v51  ;;  %v908_v44 = vld [vmem:[#allocation12 + $0x190] sm:$0xff] }
 0x1f6   : > { %v2621_v57 = vpop.eup %2620  ;;  %v912_v45 = vld [vmem:[#allocation12 + $0x1b0] sm:$0xff] }
 0x1f7   : > { %v857_v59 = vadd.f32 %v853_v50, %v844_v53  ;;  %v3277_v60 = vadd.f32 %v849_v49, %v843_v54  ;;  %v510_v14 = vmul.f32 %v2621_v57, %v3240_v21  ;;  %v509_v61 = vmul.f32 %v2621_v57, %v3237_v20  ;;  %v881_v21 = vld [vmem:[#allocation12 + $0xb8] sm:$0xff]  ;;  %v916_v50 = vld [vmem:[#allocation12 + $0x1d0] sm:$0xff] }
 0x1f8   : > { %v2386_v20 = vpack.c.bf16 %v872_v13, %v868_v12  ;;  %v2388_v17 = vpack.c.bf16 %v881_v21, %v877_v16  ;;  %v2406_v48 = vpack.c.bf16 %v912_v45, %v908_v44  ;;  %v2408_v49 = vpack.c.bf16 %v921_v47, %v917_v46  ;;  %v920_v51 = vld [vmem:[#allocation12 + $0x1f0] sm:$0xff]  ;;  %v929_v53 = vld [vmem:[#allocation12 + $0x238] sm:$0xff]  ;;  %v3291_v44 = vld [vmem:[%s3474_s7] sm:$0xf] }
 0x1f9   : > { %1072 = vmatprep.mubr.f32.mxu1 %v857_v59  ;;  %v523_v3 = vmul.f32 %v519_v56, %v510_v14  ;;  %v522_v5 = vmul.f32 %v515_v55, %v509_v61  ;;  %v2410_v54 = vpack.c.bf16 %v920_v51, %v916_v50  ;;  %v2412_v55 = vpack.c.bf16 %v929_v53, %v925_v52  ;;  %v924_v56 = vld [vmem:[#allocation12 + $0x210] sm:$0xff]  ;;  %v957_v21 = vld [vmem:[#allocation12 + $0x318] sm:$0xff] }
 0x1fa   : > { %1073 = vmatmul.mubr.f32.vlgmr.msra.gmra.mrb[0].mxu1 %v3277_v60  ;;  %v928_v57 = vld [vmem:[#allocation12 + $0x230] sm:$0xff]  ;;  %v2886_v46 = vmov 1934713408  }
 0x1fb   : > { %v536_v8 = vadd.f32 %v532_v15, %v523_v3  ;;  %v535_v9 = vadd.f32 %v528_v58, %v522_v5  ;;  %v933_v58 = vld [vmem:[#allocation12 + $0x258] sm:$0xff]  ;;  %v932_v61 = vld [vmem:[#allocation12 + $0x250] sm:$0xff]  ;;  %2244 = vmatprep.mubr.msk.f32.mxu1 %vm2884_vm0, %v2883_v31  ;;  %v719_v47 = vunpack.c.l.s4 %v2886_v46 }
 0x1fc   : > { %v937_v15 = vld [vmem:[#allocation12 + $0x278] sm:$0xff]  ;;  %v2418_v5 = vpack.c.bf16 %v936_v62, %v932_v61  ;;  %v948_v13 = vld [vmem:[#allocation12 + $0x2d0] sm:$0xff] }
 0x1fd   : > { %677 = vmatprep.mubr.f32.mxu0 %v536_v8  ;;  %v2416_v14 = vpack.c.bf16 %v937_v15, %v933_v58  ;;  %v945_v3 = vld [vmem:[#allocation12 + $0x2b8] sm:$0xff]  ;;  %v944_v8 = vld [vmem:[#allocation12 + $0x2b0] sm:$0xff]  ;;  %v720_v51 = vunpack.c.0.s8 %v719_v47 }
 0x1fe   : > { %678 = vmatmul.mubr.f32.vlgmr.msra.gmra.mrb[0].mxu0 %v535_v9  ;;  %v2420_v6 = vpack.c.bf16 %v945_v3, %v941_v63  ;;  %v949_v9 = vld [vmem:[#allocation12 + $0x2d8] sm:$0xff]  ;;  %v952_v16 = vld [vmem:[#allocation12 + $0x2f0] sm:$0xff] }
 0x1ff   : > { %2383 = vmatpush1.bf16.msra.mxu0 %v2382_v10  ;;  %1143 = vmatprep.mubr.f32.mxu0 %v857_v59  ;;  %v2414_v59 = vpack.c.bf16 %v928_v57, %v924_v56  ;;  %v953_v10 = vld [vmem:[#allocation12 + $0x2f8] sm:$0xff] }
 0x200   : > { %2385 = vmatprep.subr.bf16.mxu0 %v2384_v11  ;;  %v2422_v11 = vpack.c.bf16 %v944_v8, %v940_v7  ;;  %v2424_v12 = vpack.c.bf16 %v953_v10, %v949_v9 }
 0x203   : > { %2387 = vmatpush1.bf16.msra.mxu0 %v2386_v20  ;;  %v961_v20 = vld [vmem:[#allocation12 + $0x338] sm:$0xff] }
 0x204   : > { %2389 = vmatprep.subr.bf16.mxu0 %v2388_v17  ;;  %v2426_v17 = vpack.c.bf16 %v952_v16, %v948_v13  ;;  %v2428_v18 = vpack.c.bf16 %v961_v20, %v957_v21 }
 0x207   : > { %2391 = vmatpush1.bf16.msra.mxu0 %v2390_v1  ;;  %v969_v1 = vld [vmem:[#allocation12 + $0x378] sm:$0xff] }
 0x208   : > { %2393 = vmatprep.subr.bf16.mxu0 %v2392_v23  ;;  %v2430_v23 = vpack.c.bf16 %v960_v22, %v956_v19  ;;  %v2432_v24 = vpack.c.bf16 %v969_v1, %v965_v0 }
 0x20b   : > { %2395 = vmatpush1.bf16.msra.mxu0 %v2394_v28  ;;  %v977_v28 = vld [vmem:[#allocation12 + $0x3b8] sm:$0xff] }
 0x20c   : > { %2397 = vmatprep.subr.bf16.mxu0 %v2396_v2  ;;  %v2434_v2 = vpack.c.bf16 %v968_v26, %v964_v25  ;;  %v2436_v29 = vpack.c.bf16 %v977_v28, %v973_v27 }
 0x20f   : > { %2399 = vmatpush1.bf16.msra.mxu0 %v2398_v33  ;;  %v985_v33 = vld [vmem:[#allocation12 + $0x3f8] sm:$0xff] }
 0x210   : > { %2401 = vmatprep.subr.bf16.mxu0 %v2400_v34  ;;  %v2438_v34 = vpack.c.bf16 %v976_v4, %v972_v30  ;;  %v2440_v35 = vpack.c.bf16 %v985_v33, %v981_v32 }
 0x213   : > { %2403 = vmatpush1.bf16.msra.mxu0 %v2402_v42  ;;  %v2885_v42 = vmov 1983009808  }
 0x214   : > { %2405 = vmatprep.subr.bf16.mxu0 %v2404_v43  ;;  %v688_v43 = vunpack.c.l.s4 %v2885_v42 }
 0x216   : > { %v689_v45 = vunpack.c.0.s8 %v688_v43 }
 0x217   : > { %2407 = vmatpush1.bf16.msra.mxu0 %v2406_v48  ;;  %v995_v48 = vrot.slane %v3291_v44, %v3253_v41 }
 0x218   : > { %2409 = vmatprep.subr.bf16.mxu0 %v2408_v49  ;;  %v601_v49 = vld [vmem:[%s3472_s5] sm:$0x3]  ;;  %v3301_v50 = vsub.s32 %v689_v45, %v3247_v38 }
 0x219   : > { %v610_v57 = vrot.slane %v601_v49, %v3253_v41 }
 0x21b   : > { %2411 = vmatpush1.bf16.msra.mxu0 %v2410_v54 }
 0x21c   : > { %2413 = vmatprep.subr.bf16.mxu0 %v2412_v55  ;;  %v606_v55 = vrot.slane %v601_v49, %v3250_v40 }
 0x21f   : > { %2415 = vmatpush1.bf16.msra.mxu0 %v2414_v59  ;;  %v3308_v59 = vsub.s32 %v720_v51, %v3247_v38 }
 0x220   : > { %2417 = vmatprep.subr.bf16.mxu0 %v2416_v14 }
 0x223   : > { %2419 = vmatpush1.bf16.msra.mxu0 %v2418_v5 }
 0x224   : > { %2421 = vmatprep.subr.bf16.mxu0 %v2420_v6 }
 0x227   : > { %2423 = vmatpush1.bf16.msra.mxu0 %v2422_v11 }
 0x228   : > { %2425 = vmatprep.subr.bf16.mxu0 %v2424_v12 }
 0x22b   : > { %2427 = vmatpush1.bf16.msra.mxu0 %v2426_v17 }
 0x22c   : > { %2429 = vmatprep.subr.bf16.mxu0 %v2428_v18 }
 0x22f   : > { %2431 = vmatpush1.bf16.msra.mxu0 %v2430_v23 }
 0x230   : > { %2433 = vmatprep.subr.bf16.mxu0 %v2432_v24 }
 0x233   : > { %2435 = vmatpush1.bf16.msra.mxu0 %v2434_v2 }
 0x234   : > { %2437 = vmatprep.subr.bf16.mxu0 %v2436_v29 }
 0x237   : > { %2439 = vmatpush1.bf16.msra.mxu0 %v2438_v34 }
 0x238   : > { %2441 = vmatprep.subr.bf16.mxu0 %v2440_v35 }
 0x23b   : > { %2443 = vmatpush1.bf16.msra.mxu0 %v2442_v39 }
 0x23c   : > { %2232 = vmatprep.subr.mxu0 %v2883_v31 }
 0x23e   : > { %1144 = vmatmul.mubr.f32.vlgmr.msra.gmra.mrb[2].mxu0 %v3277_v60  ;;  %v991_v60 = vrot.slane %v3291_v44, %v3250_v40 }
 0x23f   : > { %2234 = vmatprep.mubr.msk.f32.mxu0 %vm2884_vm0, %v2883_v31 }
 0x2cd   : > { %v1074_v52 = vpop.f32.mrb[0].mxu1 }
 0x2ce   : > { %v1075_v53 = vadd.f32 %v1074_v52, %v991_v60  ;;  %v1076_v54 = vpop.f32.mrb[1].mxu1 }
 0x2cf   : > { %v1077_v56 = vadd.f32 %v1076_v54, %v995_v48 }
 0x2d0   : > { %v1150_v58 = vcombine.high %v1075_v53, %v2883_v31  ;;  %v1157_v15 = vrot.slane %v1075_v53, %v3301_v50 }
 0x2d1   : > { %v1165_v14 = vcombine.high %v1077_v56, %v2883_v31  ;;  %v1172_v61 = vrot.slane %v1077_v56, %v3301_v50  ;;  %v679_v62 = vpop.f32.mrb[0].mxu0 }
 0x2d2   : > { %v1164_v63 = vrot.slane %v1150_v58, %v3301_v50  ;;  %v680_v3 = vadd.f32 %v679_v62, %v606_v55  ;;  %v681_v5 = vpop.f32.mrb[1].mxu0 }
 0x2d3   : > { %v1179_v6 = vrot.slane %v1165_v14, %v3301_v50  ;;  %v1180_v7 = vcombine.low %v1157_v15, %v1172_v61  ;;  %v1181_v8 = vcombine.high %v1157_v15, %v1172_v61  ;;  %v682_v9 = vadd.f32 %v681_v5, %v610_v57 }
 0x2d4   : > { %v684_v10 = vmul.f32 0.088388346, %v680_v3  ;;  %v1002_v3 = vsub.s32 3, %v3247_v38 }
 0x2d5   : > { %v1188_v11 = vrot.slane %v1180_v7, %v3308_v59  ;;  %v1195_v12 = vrot.slane %v1181_v8, %v3308_v59  ;;  %v1196_v13 = vcombine.low %v1164_v63, %v1179_v6  ;;  %v1197_v16 = vcombine.high %v1164_v63, %v1179_v6 }
 0x2d6   : > { %v686_v21 = vcombine.high %v684_v10, %v2883_v31  ;;  %v693_v20 = vrot.slane %v684_v10, %v3301_v50  ;;  %v685_v17 = vmul.f32 0.088388346, %v682_v9  ;;  %v998_v63 = vsub.s32 2, %v3247_v38 }
 0x2d7   : > { %v1204_v18 = vrot.slane %v1196_v13, %v3308_v59  ;;  %v1211_v19 = vrot.slane %v1197_v16, %v3308_v59  ;;  %v1216_v22 = vcombine.low %v1188_v11, %v1195_v12  ;;  %v2208_v0 = vcombine.high %v1188_v11, %v1195_v12 }
 0x2d8   : > { %v700_v1 = vrot.slane %v686_v21, %v3301_v50  ;;  %v701_v23 = vcombine.high %v685_v17, %v2883_v31  ;;  %v708_v24 = vrot.slane %v685_v17, %v3301_v50  ;;  %v999_v5 = vrot.slane %v3291_v44, %v998_v63 }
 0x2d9   : > { %v1223_v25 = vrot.slane %v1216_v22, %v3301_v50  ;;  %v1231_v26 = vrot.slane %v2208_v0, %v3301_v50  ;;  %v1232_v27 = vcombine.low %v1204_v18, %v1211_v19  ;;  %v2209_v28 = vcombine.high %v1204_v18, %v1211_v19 }
 0x2da   : > { %v715_v2 = vrot.slane %v701_v23, %v3301_v50  ;;  %v716_v29 = vcombine.low %v693_v20, %v708_v24  ;;  %v717_v30 = vcombine.high %v693_v20, %v708_v24  ;;  %v1003_v6 = vrot.slane %v3291_v44, %v1002_v3 }
 0x2db   : > { %v1239_v4 = vrot.slane %v1232_v27, %v3301_v50  ;;  %v1247_v32 = vrot.slane %v2209_v28, %v3301_v50  ;;  %v1248_v33 = vcombine.low %v1223_v25, %v1231_v26 }
 0x2dc   : > { %v724_v34 = vrot.slane %v716_v29, %v3308_v59  ;;  %v731_v35 = vrot.slane %v717_v30, %v3308_v59  ;;  %v732_v36 = vcombine.low %v700_v1, %v715_v2  ;;  %v733_v37 = vcombine.high %v700_v1, %v715_v2 }
 0x2dd   : > { %v1256_v39 = vcombine.low %v1239_v4, %v1247_v32  ;;  %v1255_v47 = vrot.slane %v1248_v33, %v3308_v59 }
 0x2de   : > { %v740_v42 = vrot.slane %v732_v36, %v3308_v59  ;;  %v747_v43 = vrot.slane %v733_v37, %v3308_v59  ;;  %v752_v45 = vcombine.low %v724_v34, %v731_v35  ;;  %v2206_v46 = vcombine.high %v724_v34, %v731_v35 }
 0x2df   : > { %v1263_v60 = vrot.slane %v1256_v39, %v3308_v59  ;;  %v2887_v36 = vmov -inf  }
 0x2e0   : > { %v759_v48 = vrot.slane %v752_v45, %v3301_v50  ;;  %v767_v49 = vrot.slane %v2206_v46, %v3301_v50  ;;  %v768_v51 = vcombine.low %v740_v42, %v747_v43  ;;  %v2207_v52 = vcombine.high %v740_v42, %v747_v43  ;;  %805 = vst.msk [vmem:[#allocation3] sm:$0xff] %vm804_vm1, %v2887_v36 }
 0x2e1   : > { %v1264_v53 = vcombine.low %v1255_v47, %v1263_v60  ;;  %v1265_v54 = vcombine.high %v1255_v47, %v1263_v60  ;;  %806 = vst.msk [vmem:[#allocation3 + $0x8] sm:$0xff] %vm804_vm1, %v2887_v36  ;;  %v2888_v47 = vmov 0   ;;  %v1896_v36 = vld [vmem:[#allocation14 + $0xa8] sm:$0xff] }
 0x2e2   : > { %v775_v55 = vrot.slane %v768_v51, %v3301_v50  ;;  %v783_v56 = vrot.slane %v2207_v52, %v3301_v50  ;;  %v784_v57 = vcombine.low %v759_v48, %v767_v49  ;;  %2616 = vset.pattern.permute.xlu0 %v2888_v47  ;;  %2617 = vset.pattern.permute.xlu1 %v2888_v47  ;;  %v1902_v47 = vld [vmem:[#allocation14 + $0xd8] sm:$0xff] }
 0x2e3   : > { %2233 = vmatpush3.xpose.msra.mxu0 %v1264_v53 }
 0x2e4   : > { %2237 = vmatprep.subr.mxu0 %v2883_v31  ;;  %v792_v58 = vcombine.low %v775_v55, %v783_v56  ;;  %v791_v15 = vrot.slane %v784_v57, %v3308_v59 }
 0x2e6   : > { %v799_v14 = vrot.slane %v792_v58, %v3308_v59 }
 0x2e7   : > { %v1524_v60 = vld [vmem:[#allocation3] sm:$0xff] }
 0x2e8   : > { %v800_v61 = vcombine.low %v791_v15, %v799_v14  ;;  %v801_v62 = vcombine.high %v791_v15, %v799_v14  ;;  %v1525_v51 = vld [vmem:[#allocation3 + $0x8] sm:$0xff] }
 0x2ea   : > { %2235 = vmatmul.mubr.f32.vlgmr.msra.gmra.mrb[4].mxu0 %v800_v61 }
 0x2eb   : > { %2238 = vmatpush3.xpose.msra.mxu0 %v1265_v54  ;;  %2239 = vmatprep.mubr.msk.f32.mxu0 %vm2884_vm0, %v2883_v31 }
 0x2ee   : > { %2240 = vmatmul.mubr.f32.vlgmr.msra.gmra.mrb[6].mxu0 %v801_v62 }
 0x311   : > { %v1145_v7 = vpop.f32.mrb[2].mxu0 }
 0x312   : > { %v1146_v8 = vadd.f32 %v1145_v7, %v999_v5  ;;  %v1147_v9 = vpop.f32.mrb[3].mxu0 }
 0x313   : > { %v1148_v10 = vadd.f32 %v1147_v9, %v1003_v6 }
 0x314   : > { %v1266_v11 = vcombine.high %v1146_v8, %v2883_v31  ;;  %v1273_v12 = vrot.slane %v1146_v8, %v3301_v50 }
 0x315   : > { %v1281_v13 = vcombine.high %v1148_v10, %v2883_v31  ;;  %v1288_v16 = vrot.slane %v1148_v10, %v3301_v50  ;;  %v1876_v10 = vld [vmem:[#allocation14 + $0x8] sm:$0xff] }
 0x316   : > { %v1280_v21 = vrot.slane %v1266_v11, %v3301_v50  ;;  %v1878_v11 = vld [vmem:[#allocation14 + $0x18] sm:$0xff] }
 0x317   : > { %v1295_v38 = vrot.slane %v1281_v13, %v3301_v50  ;;  %v1296_v20 = vcombine.low %v1273_v12, %v1288_v16  ;;  %v1297_v17 = vcombine.high %v1273_v12, %v1288_v16  ;;  %v1875_v12 = vld [vmem:[#allocation14] sm:$0xff]  ;;  %v2444_v13 = vpack.c.bf16 %v1878_v11, %v1876_v10  ;;  %v1877_v16 = vld [vmem:[#allocation14 + $0x10] sm:$0xff] }
 0x318   : > { %v1911_v10 = vld [vmem:[#allocation14 + $0x120] sm:$0xff]  ;;  %v1913_v11 = vld [vmem:[#allocation14 + $0x130] sm:$0xff] }
 0x319   : > { %v1304_v44 = vrot.slane %v1296_v20, %v3308_v59  ;;  %v1311_v18 = vrot.slane %v1297_v17, %v3308_v59  ;;  %v1312_v19 = vcombine.low %v1280_v21, %v1295_v38  ;;  %v1313_v22 = vcombine.high %v1280_v21, %v1295_v38  ;;  %v1880_v21 = vld [vmem:[#allocation14 + $0x28] sm:$0xff]  ;;  %v1882_v38 = vld [vmem:[#allocation14 + $0x38] sm:$0xff] }
 0x31a   : > { %v2446_v20 = vpack.c.bf16 %v1877_v16, %v1875_v12  ;;  %v2448_v17 = vpack.c.bf16 %v1882_v38, %v1880_v21  ;;  %v2482_v12 = vpack.c.bf16 %v1913_v11, %v1911_v10  ;;  %v1558_v38 = vld [vmem:[#allocation4 + $0x8] sm:$0xff] }
 0x31b   : > { %v1320_v0 = vrot.slane %v1312_v19, %v3308_v59  ;;  %v1327_v1 = vrot.slane %v1313_v22, %v3308_v59  ;;  %v1332_v23 = vcombine.low %v1304_v44, %v1311_v18  ;;  %v2210_v24 = vcombine.high %v1304_v44, %v1311_v18  ;;  %v1879_v44 = vld [vmem:[#allocation14 + $0x20] sm:$0xff]  ;;  %v1881_v18 = vld [vmem:[#allocation14 + $0x30] sm:$0xff]  ;;  %v1884_v19 = vld [vmem:[#allocation14 + $0x48] sm:$0xff] }
 0x31c   : > { %v1886_v22 = vld [vmem:[#allocation14 + $0x58] sm:$0xff] }
 0x31d   : > { %v1339_v25 = vrot.slane %v1332_v23, %v3301_v50  ;;  %v1347_v26 = vrot.slane %v2210_v24, %v3301_v50  ;;  %v1348_v27 = vcombine.low %v1320_v0, %v1327_v1  ;;  %v2211_v28 = vcombine.high %v1320_v0, %v1327_v1  ;;  %v1883_v23 = vld [vmem:[#allocation14 + $0x40] sm:$0xff]  ;;  %v1885_v24 = vld [vmem:[#allocation14 + $0x50] sm:$0xff] }
 0x31e   : > { %v2450_v0 = vpack.c.bf16 %v1881_v18, %v1879_v44  ;;  %v2452_v1 = vpack.c.bf16 %v1886_v22, %v1884_v19 }
 0x31f   : > { %v1355_v2 = vrot.slane %v1348_v27, %v3301_v50  ;;  %v1363_v29 = vrot.slane %v2211_v28, %v3301_v50  ;;  %v1364_v30 = vcombine.low %v1339_v25, %v1347_v26  ;;  %v1888_v25 = vld [vmem:[#allocation14 + $0x68] sm:$0xff]  ;;  %v1890_v26 = vld [vmem:[#allocation14 + $0x78] sm:$0xff]  ;;  %v2454_v27 = vpack.c.bf16 %v1885_v24, %v1883_v23  ;;  %v1915_v24 = vld [vmem:[#allocation14 + $0x140] sm:$0xff] }
 0x320   : > { %v2456_v28 = vpack.c.bf16 %v1890_v26, %v1888_v25  ;;  %v1918_v23 = vld [vmem:[#allocation14 + $0x158] sm:$0xff]  ;;  %v1917_v25 = vld [vmem:[#allocation14 + $0x150] sm:$0xff] }
 0x321   : > { %v1372_v4 = vcombine.low %v1355_v2, %v1363_v29  ;;  %v1371_v32 = vrot.slane %v1364_v30, %v3308_v59  ;;  %v1887_v2 = vld [vmem:[#allocation14 + $0x60] sm:$0xff]  ;;  %v1889_v29 = vld [vmem:[#allocation14 + $0x70] sm:$0xff]  ;;  %v1892_v30 = vld [vmem:[#allocation14 + $0x88] sm:$0xff]  ;;  %v2486_v26 = vpack.c.bf16 %v1917_v25, %v1915_v24 }
 0x323   : > { %v1379_v33 = vrot.slane %v1372_v4, %v3308_v59  ;;  %v1894_v4 = vld [vmem:[#allocation14 + $0x98] sm:$0xff] }
 0x325   : > { %v1380_v34 = vcombine.low %v1371_v32, %v1379_v33  ;;  %v1381_v35 = vcombine.high %v1371_v32, %v1379_v33  ;;  %v2458_v32 = vpack.c.bf16 %v1889_v29, %v1887_v2  ;;  %v2460_v33 = vpack.c.bf16 %v1894_v4, %v1892_v30  ;;  %v1919_v29 = vld [vmem:[#allocation14 + $0x160] sm:$0xff]  ;;  %v1921_v30 = vld [vmem:[#allocation14 + $0x170] sm:$0xff] }
 0x326   : > { %v2490_v4 = vpack.c.bf16 %v1921_v30, %v1919_v29 }
 0x327   : > { %2243 = vmatpush3.msra.mxu1 %v1380_v34  ;;  %v1891_v34 = vld [vmem:[#allocation14 + $0x80] sm:$0xff] }
 0x328   : > { %2247 = vmatprep.subr.mxu1 %v2883_v31 }
 0x3bd   : > { %v1450_v37 = vpop.f32.mrb[4].mxu0 }
 0x3be   : > { %v2236_v39 = vpop.f32.mrb[5].mxu0  ;;  %v1527_v42 = vsel %vm1526_vm2, %v1450_v37, -inf }
 0x3bf   : > { %1528 = vmax.xlane.f32.xlu0 %v1527_v42 }
 0x3c1   : > { %v1520_v43 = vpop.f32.mrb[6].mxu0 }
 0x3c2   : > { %v2241_v45 = vpop.f32.mrb[7].mxu0  ;;  %v1530_v46 = vsel %vm1526_vm2, %v1520_v43, -inf }
 0x3c3   : > { %1531 = vmax.xlane.f32.xlu1 %v1530_v46  ;;  %v1897_v45 = vld [vmem:[#allocation14 + $0xb0] sm:$0xff]  ;;  %v1900_v46 = vld [vmem:[#allocation14 + $0xc8] sm:$0xff] }
 0x44c   : > { %v1529_v48 = vpop.xlane.xlu0 %1528 }
 0x44d   : > { %v1533_v49 = vmax.f32 %v1524_v60, %v1529_v48  ;;  %v2468_v48 = vpack.c.bf16 %v1902_v47, %v1900_v46  ;;  %v1929_v46 = vld [vmem:[#allocation14 + $0x1b0] sm:$0xff] }
 0x44f   : > { %v1535_v52 = vsub.f32 %v1524_v60, %v1533_v49  ;;  %1736 = vst.msk [vmem:[#allocation3] sm:$0xff] %vm804_vm1, %v1533_v49  ;;  %1543 = vperm.xlu0 %2616, %v1533_v49   ;;  %v1899_v49 = vld [vmem:[#allocation14 + $0xc0] sm:$0xff] }
 0x450   : > { %v1532_v53 = vpop.xlane.xlu1 %1531 }
 0x451   : > { %v1534_v54 = vmax.f32 %v1525_v51, %v1532_v53  ;;  %v1537_v5 = vmul.f32 1.442695, %v1535_v52  ;;  %v1904_v52 = vld [vmem:[#allocation14 + $0xe8] sm:$0xff]  ;;  %v1906_v53 = vld [vmem:[#allocation14 + $0xf8] sm:$0xff] }
 0x453   : > { %v1536_v55 = vsub.f32 %v1525_v51, %v1534_v54  ;;  %1737 = vst.msk [vmem:[#allocation3 + $0x8] sm:$0xff] %vm804_vm1, %v1534_v54  ;;  %1548 = vperm.xlu1 %2617, %v1534_v54   ;;  %v1901_v51 = vld [vmem:[#allocation14 + $0xd0] sm:$0xff] }
 0x454   : > { %v2470_v54 = vpack.c.bf16 %v1901_v51, %v1899_v49  ;;  %v1931_v49 = vld [vmem:[#allocation14 + $0x1c0] sm:$0xff] }
 0x455   : > { %v1539_v7 = vmul.f32 1.442695, %v1536_v55  ;;  %v2472_v55 = vpack.c.bf16 %v1906_v53, %v1904_v52  ;;  %v1933_v52 = vld [vmem:[#allocation14 + $0x1d0] sm:$0xff]  ;;  %v1936_v53 = vld [vmem:[#allocation14 + $0x1e8] sm:$0xff] }
 0x4ce   : > { %v1544_v56 = vpop.permute.xlu0 %1543 }
 0x4cf   : > { %v1551_v57 = vsub.f32 %v1450_v37, %v1544_v56  ;;  %v1898_v37 = vld [vmem:[#allocation14 + $0xb8] sm:$0xff]  ;;  %v1903_v56 = vld [vmem:[#allocation14 + $0xe0] sm:$0xff] }
 0x4d0   : > { %v2464_v42 = vpack.c.bf16 %v1898_v37, %v1896_v36  ;;  %v1925_v36 = vld [vmem:[#allocation14 + $0x190] sm:$0xff] }
 0x4d1   : > { %v1553_v58 = vmul.f32 1.442695, %v1551_v57  ;;  %v1905_v57 = vld [vmem:[#allocation14 + $0xf0] sm:$0xff] }
 0x4d2   : > { %v1549_v15 = vpop.permute.xlu1 %1548 }
 0x4d3   : > { %2622 = vpow2.f32 %v1553_v58  ;;  %v1552_v14 = vsub.f32 %v1520_v43, %v1549_v15  ;;  %v1895_v43 = vld [vmem:[#allocation14 + $0xa0] sm:$0xff]  ;;  %v1908_v58 = vld [vmem:[#allocation14 + $0x108] sm:$0xff]  ;;  %v1910_v15 = vld [vmem:[#allocation14 + $0x118] sm:$0xff] }
 0x4d4   : > { %v2466_v60 = vpack.c.bf16 %v1897_v45, %v1895_v43  ;;  %v1927_v45 = vld [vmem:[#allocation14 + $0x1a0] sm:$0xff] }
 0x4d5   : > { %v1555_v61 = vmul.f32 1.442695, %v1552_v14  ;;  %v2474_v14 = vpack.c.bf16 %v1905_v57, %v1903_v56  ;;  %v2498_v47 = vpack.c.bf16 %v1929_v46, %v1927_v45  ;;  %v1935_v57 = vld [vmem:[#allocation14 + $0x1e0] sm:$0xff] }
 0x4d6   : > { %v2022_v45 = vld [vmem:[%s3192_s22] sm:$0xff] }
 0x4d7   : > { %2624 = vpow2.f32 %v1555_v61  ;;  %v2476_v61 = vpack.c.bf16 %v1910_v15, %v1908_v58  ;;  %v1937_v58 = vld [vmem:[#allocation14 + $0x1f0] sm:$0xff] }
 0x4d8   : > { %2626 = vpow2.f32 %v1537_v5  ;;  %v1914_v5 = vld [vmem:[#allocation14 + $0x138] sm:$0xff]  ;;  %v2506_v15 = vpack.c.bf16 %v1937_v58, %v1935_v57 }
 0x4d9   : > { %2628 = vpow2.f32 %v1539_v7 }
 0x4dd   : > { %v2623_v62 = vpop.eup %2622 }
 0x4de   : > { %2245 = vmatmul.mubr.msk.f32.vlgmr.msra.gmra.mrb[2].mxu1 %vm1526_vm2, %v2623_v62  ;;  %v1561_v63 = vsel %vm1526_vm2, %v2623_v62, 0.0  ;;  %v1907_v62 = vld [vmem:[#allocation14 + $0x100] sm:$0xff] }
 0x4df   : > { %2248 = vmatpush3.msra.mxu1 %v1381_v35  ;;  %1562 = vadd.xlane.f32.xlu1 %v1561_v63  ;;  %v1893_v35 = vld [vmem:[#allocation14 + $0x90] sm:$0xff] }
 0x4e0   : > { %2249 = vmatprep.mubr.msk.f32.mxu1 %vm2884_vm0, %v2883_v31  ;;  %2445 = vmatprep.subr.bf16.mxu1 %v2444_v13  ;;  %v2462_v39 = vpack.c.bf16 %v1893_v35, %v1891_v34  ;;  %v1909_v63 = vld [vmem:[#allocation14 + $0x110] sm:$0xff]  ;;  %v1923_v35 = vld [vmem:[#allocation14 + $0x180] sm:$0xff] }
 0x4e1   : > { %v2625_v3 = vpop.eup %2624  ;;  %v1557_v13 = vld [vmem:[#allocation4] sm:$0xff]  ;;  %v2494_v37 = vpack.c.bf16 %v1925_v36, %v1923_v35 }
 0x4e2   : > { %2250 = vmatmul.mubr.msk.f32.vlgmr.msra.gmra.mrb[4].mxu1 %vm1526_vm2, %v2625_v3  ;;  %v1564_v6 = vsel %vm1526_vm2, %v2625_v3, 0.0  ;;  %v3380_v8 = vpop.eup %2626  ;;  %v1912_v3 = vld [vmem:[#allocation14 + $0x128] sm:$0xff] }
 0x4e3   : > { %1565 = vadd.xlane.f32.xlu0 %v1564_v6  ;;  %v3383_v9 = vpop.eup %2628  ;;  %2447 = vmatpush1.bf16.msra.mxu1 %v2446_v20  ;;  %v2478_v6 = vpack.c.bf16 %v1909_v63, %v1907_v62  ;;  %v2480_v7 = vpack.c.bf16 %v1914_v5, %v1912_v3  ;;  %v1559_v16 = vmul.f32 %v3380_v8, %v1557_v13 }
 0x4e4   : > { %2449 = vmatprep.subr.bf16.mxu1 %v2448_v17  ;;  %v1560_v17 = vmul.f32 %v3383_v9, %v1558_v38 }
 0x4e7   : > { %2451 = vmatpush1.bf16.msra.mxu1 %v2450_v0 }
 0x4e8   : > { %2453 = vmatprep.subr.bf16.mxu1 %v2452_v1  ;;  %v1916_v1 = vld [vmem:[#allocation14 + $0x148] sm:$0xff] }
 0x4eb   : > { %2455 = vmatpush1.bf16.msra.mxu1 %v2454_v27 }
 0x4ec   : > { %2457 = vmatprep.subr.bf16.mxu1 %v2456_v28  ;;  %v1922_v28 = vld [vmem:[#allocation14 + $0x178] sm:$0xff] }
 0x4ef   : > { %2459 = vmatpush1.bf16.msra.mxu1 %v2458_v32  ;;  %v1924_v32 = vld [vmem:[#allocation14 + $0x188] sm:$0xff] }
 0x4f0   : > { %1576 = vperm.xlu1 %2617, %v3380_v8   ;;  %2461 = vmatprep.subr.bf16.mxu1 %v2460_v33  ;;  %v2484_v8 = vpack.c.bf16 %v1918_v23, %v1916_v1  ;;  %v1926_v33 = vld [vmem:[#allocation14 + $0x198] sm:$0xff] }
 0x4f1   : > { %v2492_v34 = vpack.c.bf16 %v1926_v33, %v1924_v32 }
 0x4f3   : > { %2463 = vmatpush1.bf16.msra.mxu1 %v2462_v39  ;;  %v1928_v39 = vld [vmem:[#allocation14 + $0x1a8] sm:$0xff] }
 0x4f4   : > { %1581 = vperm.xlu1 %2617, %v3383_v9   ;;  %2465 = vmatprep.subr.bf16.mxu1 %v2464_v42  ;;  %v1920_v9 = vld [vmem:[#allocation14 + $0x168] sm:$0xff]  ;;  %v1930_v42 = vld [vmem:[#allocation14 + $0x1b8] sm:$0xff] }
 0x4f5   : > { %v2488_v2 = vpack.c.bf16 %v1922_v28, %v1920_v9  ;;  %v2496_v43 = vpack.c.bf16 %v1930_v42, %v1928_v39  ;;  %v1939_v39 = vld [vmem:[%s3518_s16] sm:$0x3] }
 0x4f6   : > { %v1944_v42 = vrot.slane %v1939_v39, %v3250_v40 }
 0x4f7   : > { %2467 = vmatpush1.bf16.msra.mxu1 %v2466_v60  ;;  %v1932_v60 = vld [vmem:[#allocation14 + $0x1c8] sm:$0xff] }
 0x4f8   : > { %2469 = vmatprep.subr.bf16.mxu1 %v2468_v48  ;;  %v1934_v48 = vld [vmem:[#allocation14 + $0x1d8] sm:$0xff] }
 0x4f9   : > { %v2500_v51 = vpack.c.bf16 %v1934_v48, %v1932_v60  ;;  %v2023_v60 = vld [vmem:[%s3192_s22 + $0x8] sm:$0xff]  ;;  %s2778_s22 = scalar_lea.vmem %s3420_s8, 256 }
 0x4fa   : > { %p2779_p0 = scmp.ne.s32.totalorder %s3420_s8, %s2778_s22  ;;  %p2786_p13 = scmp.lt.s32.totalorder %s2784_s28, %s2778_s22 }
 0x4fb   : > { %2471 = vmatpush1.bf16.msra.mxu1 %v2470_v54  ;;  %v1938_v54 = vld [vmem:[#allocation14 + $0x1f8] sm:$0xff] }
 0x4fc   : > { %2473 = vmatprep.subr.bf16.mxu1 %v2472_v55  ;;  %v2502_v55 = vpack.c.bf16 %v1933_v52, %v1931_v49  ;;  %v2504_v56 = vpack.c.bf16 %v1938_v54, %v1936_v53  ;;  %p2780_p4 = pnand %p2779_p0, %p3520_p2  ;;  %p2787_p10 = por %p2786_p13, %p2785_p1 }
 0x4fe   : > { %p2781_p8 = pneg %p2780_p4 }
 0x4ff   : > { %2475 = vmatpush1.bf16.msra.mxu1 %v2474_v14 }
 0x500   : > { %2477 = vmatprep.subr.bf16.mxu1 %v2476_v61  ;;  %p2788_p11 = pnand %p2787_p10, %p2781_p8 }
 0x503   : > { %2479 = vmatpush1.bf16.msra.mxu1 %v2478_v6 }
 0x504   : > { %2481 = vmatprep.subr.bf16.mxu1 %v2480_v7 }
 0x507   : > { %2483 = vmatpush1.bf16.msra.mxu1 %v2482_v12 }
 0x508   : > { %2485 = vmatprep.subr.bf16.mxu1 %v2484_v8 }
 0x50b   : > { %2487 = vmatpush1.bf16.msra.mxu1 %v2486_v26 }
 0x50c   : > { %2489 = vmatprep.subr.bf16.mxu1 %v2488_v2 }
 0x50f   : > { %2491 = vmatpush1.bf16.msra.mxu1 %v2490_v4 }
 0x510   : > { %2493 = vmatprep.subr.bf16.mxu1 %v2492_v34 }
 0x513   : > { %2495 = vmatpush1.bf16.msra.mxu1 %v2494_v37 }
 0x514   : > { %2497 = vmatprep.subr.bf16.mxu1 %v2496_v43 }
 0x517   : > { %2499 = vmatpush1.bf16.msra.mxu1 %v2498_v47 }
 0x518   : > { %2501 = vmatprep.subr.bf16.mxu1 %v2500_v51 }
 0x51b   : > { %2503 = vmatpush1.bf16.msra.mxu1 %v2502_v55 }
 0x51c   : > { %2505 = vmatprep.subr.bf16.mxu1 %v2504_v56 }
 0x51f   : > { %2507 = vmatpush1.bf16.msra.mxu1 %v2506_v15 }
 0x56c   : > { %v1563_v21 = vpop.xlane.xlu1 %1562 }
 0x56d   : > { %v1567_v20 = vadd.f32 %v1563_v21, %v1559_v16 }
 0x56f   : > { %1570 = vst.msk [vmem:[#allocation4] sm:$0xff] %vm804_vm1, %v1567_v20 }
 0x570   : > { %v1566_v44 = vpop.xlane.xlu0 %1565  ;;  %v1577_v3 = vpop.permute.xlu1 %1576 }
 0x571   : > { %v1568_v18 = vadd.f32 %v1566_v44, %v1560_v17  ;;  %v1584_v6 = vmul.f32 0.0, %v1577_v3 }
 0x573   : > { %1571 = vst.msk [vmem:[#allocation4 + $0x8] sm:$0xff] %vm804_vm1, %v1568_v18 }
 0x574   : > { %v1582_v5 = vpop.permute.xlu1 %1581 }
 0x575   : > { %v1585_v11 = vmul.f32 0.0, %v1582_v5 }
 0x576   : > { %v1741_v19 = vld [vmem:[#allocation4] sm:$0xff] }
 0x577   : > { %2630 = vrcp.f32 %v1741_v19 }
 0x57a   : > { %v1742_v22 = vld [vmem:[#allocation4 + $0x8] sm:$0xff] }
 0x57b   : > { %2632 = vrcp.f32 %v1742_v22 }
 0x581   : > { %v2631_v0 = vpop.eup %2630 }
 0x582   : > { %1749 = vperm.xlu1 %2617, %v2631_v0  }
 0x585   : > { %v2633_v27 = vpop.eup %2632 }
 0x586   : > { %1754 = vperm.xlu0 %2616, %v2633_v27  }
 0x5b1   : > { %v1655_v14 = vpop.f32.mrb[2].mxu1 }
 0x5b2   : > { %v2246_v61 = vpop.f32.mrb[3].mxu1  ;;  %v1732_v7 = vadd.f32 %v1655_v14, %v1584_v6 }
 0x5b5   : > { %v1728_v62 = vpop.f32.mrb[4].mxu1 }
 0x5b6   : > { %v2251_v63 = vpop.f32.mrb[5].mxu1  ;;  %v1733_v13 = vadd.f32 %v1728_v62, %v1585_v11 }
 0x601   : > { %v1750_v10 = vpop.permute.xlu1 %1749 }
 0x602   : > { %v1757_v12 = vmul.f32 %v1750_v10, %v1732_v7 }
 0x604   : > { %v1759_v21 = vcombine.high %v1757_v12, %v2883_v31  ;;  %v1766_v20 = vrot.slane %v1757_v12, %v3301_v50 }
 0x605   : > { %v1755_v16 = vpop.permute.xlu0 %1754 }
 0x606   : > { %v1758_v38 = vmul.f32 %v1755_v16, %v1733_v13  ;;  %v1773_v18 = vrot.slane %v1759_v21, %v3301_v50 }
 0x608   : > { %v1774_v17 = vcombine.high %v1758_v38, %v2883_v31  ;;  %v1781_v44 = vrot.slane %v1758_v38, %v3301_v50 }
 0x60a   : > { %v1788_v19 = vrot.slane %v1774_v17, %v3301_v50  ;;  %v1789_v22 = vcombine.low %v1766_v20, %v1781_v44  ;;  %v1790_v0 = vcombine.high %v1766_v20, %v1781_v44 }
 0x60c   : > { %v1797_v1 = vrot.slane %v1789_v22, %v3308_v59  ;;  %v1804_v23 = vrot.slane %v1790_v0, %v3308_v59  ;;  %v1805_v8 = vcombine.low %v1773_v18, %v1788_v19  ;;  %v1806_v24 = vcombine.high %v1773_v18, %v1788_v19 }
 0x60e   : > { %v1813_v25 = vrot.slane %v1805_v8, %v3308_v59  ;;  %v1820_v26 = vrot.slane %v1806_v24, %v3308_v59  ;;  %v1825_v27 = vcombine.low %v1797_v1, %v1804_v23  ;;  %v2214_v31 = vcombine.high %v1797_v1, %v1804_v23 }
 0x610   : > { %v1841_v9 = vcombine.low %v1813_v25, %v1820_v26  ;;  %v2215_v28 = vcombine.high %v1813_v25, %v1820_v26  ;;  %v1832_v2 = vrot.slane %v1825_v27, %v3301_v50  ;;  %v1840_v29 = vrot.slane %v2214_v31, %v3301_v50 }
 0x612   : > { %v1848_v30 = vrot.slane %v1841_v9, %v3301_v50  ;;  %v1856_v4 = vrot.slane %v2215_v28, %v3301_v50  ;;  %v1857_v32 = vcombine.low %v1832_v2, %v1840_v29  ;;  %v1948_v50 = vrot.slane %v1939_v39, %v3253_v41 }
 0x614   : > { %v1865_v33 = vcombine.low %v1848_v30, %v1856_v4  ;;  %v1864_v34 = vrot.slane %v1857_v32, %v3308_v59 }
 0x616   : > { %v1872_v35 = vrot.slane %v1865_v33, %v3308_v59 }
 0x618   : > { %v1874_v36 = vcombine.high %v1864_v34, %v1872_v35  ;;  %v1873_v37 = vcombine.low %v1864_v34, %v1872_v35 }
 0x61a   : > { %2015 = vmatprep.mubr.f32.mxu1 %v1874_v36 }
 0x61b   : > { %2016 = vmatmul.mubr.f32.vlgmr.msra.gmra.mrb[6].mxu1 %v1873_v37 }
 0x6ee   : > { %v2017_v43 = vpop.f32.mrb[6].mxu1 }
 0x6ef   : > { %v2018_v46 = vadd.f32 %v2017_v43, %v1944_v42  ;;  %v2019_v47 = vpop.f32.mrb[7].mxu1 }
 0x6f0   : > { %v2020_v59 = vadd.f32 %v2019_v47, %v1948_v50 }
 0x6f1   : > { %v2024_v48 = vadd.f32 %v2022_v45, %v2018_v46 }
 0x6f2   : > { %v2025_v49 = vadd.f32 %v2023_v60, %v2020_v59 }
 0x6f3   : > { %2026 = vst [vmem:[%s485_s21] sm:$0xff] %v2024_v48 }
 0x6f4   : > { %2027 = vst [vmem:[%s485_s21 + $0x8] sm:$0xff] %v2025_v49 }
 0x6f5   : > { %2791 = shalt.err (!%p2788_p11)
}
 0x6f6   : > { %s2792_s25 = scalar_lea.hbm %s3418_s26, 256  ;;  %s2796_s30 = scalar_lea.hbm %s3519_s27, 512 }
 0x6f7   : > { %p2793_p6 = scmp.ne.s32.totalorder %s3418_s26, %s2792_s25  ;;  %p2797_p12 = scmp.lt.u32.totalorder %s3418_s26, %s3519_s27 }
 0x6f8   : > { %p2798_p5 = scmp.lt.u32.totalorder %s2796_s30, %s2792_s25  ;;  %p2800_p0 = scmp.lt.u32.totalorder %s2792_s25, %s3418_s26 }
 0x6f9   : > { %p2794_p3 = pnand %p2793_p6, %p3520_p2 }
 0x6fa   : > { %p2799_p9 = por %p2798_p5, %p2797_p12 }
 0x6fb   : > { %p2795_p7 = pneg %p2794_p3 }
 0x6fc   : > { %p2801_p4 = por %p2800_p0, %p2799_p9 }
 0x6fe   : > { %p2802_p8 = pnand %p2801_p4, %p2795_p7 }
 0x700   : > { %2805 = shalt.err (!%p2802_p8)
}
 0x701   : > { %2524 = dma.vmem_to_hbm [thread:$0]  (%p3520_p2), %s3420_s8, 256, %s3418_s26, %s2029_s24  }
 0x702 PF: > { %s3521_s16 = sld [smem:[#allocation21_spill]]  ;;  %s3522_s19 = sld [smem:[#allocation23_spill]] }
 0x703   : > { %p3524_p13 = scmp.ge.s32.totalorder %s2872_s18, 2 }
 0x708   : > { %s2057_s21 = sand.u32 1, %s3521_s16   ;;  %p3523_p1 = scmp.ne.s32.totalorder %s3522_s19, 0 }
 0x709   : > { %s2058_s9 = scalar_lea.sflag [#allocation8], %s2057_s21 }
 0x70a   : > { %p2544_p10 = pnand %p3524_p13, %p3523_p1 }
 0x70c   : > { %2847 = dma.done.wait (!%p2544_p10), %s2058_s9, 256  }
 0x70d   : > { %2849 = vsyncadd (!%p2544_p10), %s2058_s9, 4294967040  ;;  %s30_s18 = sadd.s32 1, %s2872_s18   ;;  %s3525_s11 = sld [smem:[#allocation24_spill]] }
 0x70e   : > { %p27_p11 = scmp.ge.s32.totalorder %s30_s18, 4   ;;  %s3526_s13 = smov %s2856_s14 }
 0x70f   : > { %s3527_s14 = smov %s2860_s15  ;;  %s3528_s15 = smov %s3112_s20 }
 0x710   : > { %s3529_s16 = smov %s2868_s17  ;;  %29 = sbr.rel (!%p27_p11) target bundleno = 15 (0xf), region = 138 }
 0x713   : > { %s3530_s17 = smov %s3525_s11 }
 0x717   :  { %2063 = vsyncpa [#allocation7], 1 }
 0x718   :  { %2065 = vsyncpa [#allocation7 + $0x1], 1 }
 0x719   :  { %2066 = vsyncpa [#allocation10], 1 }
 0x71a   :  { %2068 = vsyncpa [#allocation10 + $0x1], 1 }
 0x71b   :  { %2069 = vsyncpa [#allocation13], 1 }
 0x71c   :  { %2070 = vsyncpa [#allocation8], 1 }
 0x71d   :  { %2072 = vsyncpa [#allocation8 + $0x1], 1 }

</bundles_post_ra>
